<compile_context>
chip_gen: v5e
topology: v5e:2x2
jax: 0.10.0
libtpu: 0.0.40
codegen_flags: <defaults>
</compile_context>

<pallas_src>
import math

import jax
import jax.numpy as jnp
from jax.experimental import pallas as pl
from jax.experimental.pallas import tpu as pltpu

# ----------------------------- config (small, synthetic) ---------------------
B, S, H = 2, 8, 32          # batch, seq_len, hidden
NH, DH = 4, 8               # heads, head_dim (NH*DH == H)
I = 4 * H                   # FFN intermediate
L = 5                       # num_labels
VOCAB = 100
MAX_POS = 64
NLAYERS = 2
LN_EPS = 1e-12
NEG = -1e9


# ----------------------------- in-kernel helpers -----------------------------
def _ln(x, g, b):
    mu = jnp.mean(x, axis=-1, keepdims=True)
    var = jnp.mean((x - mu) ** 2, axis=-1, keepdims=True)
    return (x - mu) * jax.lax.rsqrt(var + LN_EPS) * g + b


def _gelu(x):
    # TODO(synk): BERT uses exact erf-based GELU; tanh approximation used here.
    return 0.5 * x * (1.0 + jnp.tanh(0.7978845608028654 * (x + 0.044715 * x * x * x)))


def _row_to_col(row, r_idx, c_idx):
    """(1, L) -> (L, 1) via masked lane-reduction (no transpose); iotas hoisted."""
    n = r_idx.shape[0]
    return jnp.sum(jnp.where(r_idx == c_idx, jnp.broadcast_to(row, (n, n)), 0.0),
                   axis=1, keepdims=True)


def _encoder_emissions(xemb_ref, bias_ref, embln_ref,
                       wqkv_ref, bqkv_ref, wo_ref, w1_ref, b1_ref, w2_ref,
                       vecs_ref, clsw_ref, clsb_ref, qkv_scr):
    """Embedding LN -> NLAYERS encoder layers -> classifier for one batch element.

    Returns (emissions (S, L), additive key-mask bias (1, S))."""
    bias = bias_ref[0]                                           # (1, S)
    x = _ln(xemb_ref[0], embln_ref[0:1, :], embln_ref[1:2, :])   # (S, H)
    scale = 1.0 / math.sqrt(DH)

    for l in range(NLAYERS):                                     # static unroll
        # fused QKV: one (S,H)@(H,3H) matmul, staged in VMEM scratch so the
        # per-head slices below are plain ref windows.
        qkv_scr[...] = (jnp.dot(x, wqkv_ref[l], preferred_element_type=jnp.float32)
                        + bqkv_ref[l])
        wo_l = wo_ref[l]                                         # (H, H)
        acc = jnp.zeros((S, H), jnp.float32)
        for h in range(NH):                                      # static unroll
            off = h * DH
            qh = qkv_scr[:, off:off + DH]                        # (S, DH)
            kh = qkv_scr[:, H + off:H + off + DH]
            vh = qkv_scr[:, 2 * H + off:2 * H + off + DH]
            sc = jax.lax.dot_general(qh, kh, (((1,), (1,)), ((), ())),
                                     preferred_element_type=jnp.float32)
            sc = sc * scale + bias                               # (S, S)
            sc = sc - jnp.max(sc, axis=-1, keepdims=True)
            p = jnp.exp(sc)
            p = p * pl.reciprocal(jnp.sum(p, axis=-1, keepdims=True), approx=True)
            ctx = jnp.dot(p, vh, preferred_element_type=jnp.float32)    # (S, DH)
            # per-head row-block of Wo == single projection of concatenated ctx
            acc = acc + jnp.dot(ctx, wo_l[off:off + DH, :],
                                preferred_element_type=jnp.float32)
        vecs_l = vecs_ref[l]                                     # (6, H)
        attn_out = acc + vecs_l[0:1, :]
        h1 = _ln(x + attn_out, vecs_l[1:2, :], vecs_l[2:3, :])
        ff = jnp.dot(_gelu(jnp.dot(h1, w1_ref[l], preferred_element_type=jnp.float32)
                           + b1_ref[l]),
                     w2_ref[l], preferred_element_type=jnp.float32) + vecs_l[3:4, :]
        x = _ln(h1 + ff, vecs_l[4:5, :], vecs_l[5:6, :])

    emissions = (jnp.dot(x, clsw_ref[...], preferred_element_type=jnp.float32)
                 + clsb_ref[...])                                # (S, L)
    return emissions, bias


# ----------------------------- fused kernels ----------------------------------
def bert_crf_decode_kernel(mask_sm,                              # SMEM (B, S) int32
                           xemb_ref, bias_ref, embln_ref,
                           wqkv_ref, bqkv_ref, wo_ref, w1_ref, b1_ref, w2_ref,
                           vecs_ref, clsw_ref, clsb_ref,
                           trans_ref, start_ref, end_ref,
                           tags_ref, qkv_scr, bp_scr):
    b = pl.program_id(0)
    em, bias = _encoder_emissions(xemb_ref, bias_ref, embln_ref,
                                  wqkv_ref, bqkv_ref, wo_ref, w1_ref, b1_ref,
                                  w2_ref, vecs_ref, clsw_ref, clsb_ref, qkv_scr)
    trans = trans_ref[...]
    # iotas built once (JAX does not CSE broadcast_in_dim)
    r_ll = jax.lax.broadcasted_iota(jnp.int32, (L, L), 0)
    c_ll = jax.lax.broadcasted_iota(jnp.int32, (L, L), 1)
    tag_iota = jax.lax.broadcasted_iota(jnp.int32, (1, L), 1)
    pos_iota = jax.lax.broadcasted_iota(jnp.int32, (1, S), 1)

    # Viterbi forward pass; backpointers stored in VMEM scratch (S, 1, L)
    score = start_ref[...] + em[0:1, :]                          # (1, L)
    for t in range(1, S):
        valid = mask_sm[b, t] > 0                                # SMEM scalar read
        combined = _row_to_col(score, r_ll, c_ll) + trans + em[t:t + 1, :]
        new_score = jnp.max(combined, axis=0, keepdims=True)     # (1, L)
        bp = jnp.min(jnp.where(combined >= new_score, r_ll, L),
                     axis=0, keepdims=True)                      # first argmax
        score = jnp.where(valid, new_score, score)
        bp_scr[t] = jnp.where(valid, bp, tag_iota)               # identity if masked

    score = score + end_ref[...]
    best = jnp.max(score, axis=1, keepdims=True)
    cur = jnp.min(jnp.where(score >= best, tag_iota, L),
                  axis=1, keepdims=True)                         # (1, 1) int32

    tags = [None] * S
    tags[S - 1] = cur
    for t in range(S - 2, -1, -1):
        cur = jnp.sum(jnp.where(tag_iota == cur, bp_scr[t + 1], 0),
                      axis=1, keepdims=True)
        tags[t] = cur

    out = jnp.zeros((1, S), jnp.int32)
    for t in range(S):
        out = out + jnp.where(pos_iota == t, tags[t], 0)
    out = jnp.where(bias > NEG * 0.5, out, -1)   # -1 where attention_mask == 0
    tags_ref[0] = out


def bert_crf_loss_kernel(mask_sm, lab_sm,                        # SMEM (B, S) int32
                         xemb_ref, bias_ref, embln_ref,
                         wqkv_ref, bqkv_ref, wo_ref, w1_ref, b1_ref, w2_ref,
                         vecs_ref, clsw_ref, clsb_ref,
                         trans_ref, start_ref, end_ref,
                         llh_ref, qkv_scr):
    b = pl.program_id(0)
    em, _ = _encoder_emissions(xemb_ref, bias_ref, embln_ref,
                               wqkv_ref, bqkv_ref, wo_ref, w1_ref, b1_ref,
                               w2_ref, vecs_ref, clsw_ref, clsb_ref, qkv_scr)
    trans = trans_ref[...]
    r_ll = jax.lax.broadcasted_iota(jnp.int32, (L, L), 0)
    c_ll = jax.lax.broadcasted_iota(jnp.int32, (L, L), 1)
    tag_iota = jax.lax.broadcasted_iota(jnp.int32, (1, L), 1)

    # numerator: score of the gold path (torchcrf requires mask[:, 0] == 1)
    l0 = lab_sm[b, 0]
    num = jnp.sum(jnp.where(tag_iota == l0, start_ref[...] + em[0:1, :], 0.0),
                  axis=1, keepdims=True)                         # (1, 1)
    last_tag = l0
    for t in range(1, S):
        valid = mask_sm[b, t] > 0
        lt = lab_sm[b, t]
        lp = lab_sm[b, t - 1]
        e_t = jnp.sum(jnp.where(tag_iota == lt, em[t:t + 1, :], 0.0),
                      axis=1, keepdims=True)
        tr = jnp.sum(jnp.sum(jnp.where((r_ll == lp) & (c_ll == lt), trans, 0.0),
                             axis=0, keepdims=True), axis=1, keepdims=True)
        num = num + jnp.where(valid, e_t + tr, 0.0)
        last_tag = jnp.where(valid, lt, last_tag)
    num = num + jnp.sum(jnp.where(tag_iota == last_tag, end_ref[...], 0.0),
                        axis=1, keepdims=True)

    # denominator: log partition (forward algorithm)
    alpha = start_ref[...] + em[0:1, :]
    for t in range(1, S):
        valid = mask_sm[b, t] > 0
        combined = _row_to_col(alpha, r_ll, c_ll) + trans + em[t:t + 1, :]
        cmax = jnp.max(combined, axis=0, keepdims=True)
        new_alpha = cmax + jnp.log(jnp.sum(jnp.exp(combined - cmax),
                                           axis=0, keepdims=True))
        alpha = jnp.where(valid, new_alpha, alpha)
    final = alpha + end_ref[...]
    fmax = jnp.max(final, axis=1, keepdims=True)
    denom = fmax + jnp.log(jnp.sum(jnp.exp(final - fmax), axis=1, keepdims=True))

    llh_ref[0] = num - denom                                     # (1, 1)


# ----------------------------- pallas_call wrappers ---------------------------
def _const_spec(shape):
    zeros = (0,) * len(shape)
    return pl.BlockSpec(shape, lambda *_args, _z=zeros: _z)


def _batch_spec(shape):
    tail = (0,) * (len(shape) - 1)
    return pl.BlockSpec(shape, lambda b, *_prefetch, _t=tail: (b,) + _t)


def _in_specs():
    return [
        _batch_spec((1, S, H)),             # summed embeddings
        _batch_spec((1, 1, S)),             # additive attention-mask bias
        _const_spec((2, H)),                # embedding LN (gamma; beta)
        _const_spec((NLAYERS, H, 3 * H)),   # fused Wqkv
        _const_spec((NLAYERS, 1, 3 * H)),   # fused bqkv
        _const_spec((NLAYERS, H, H)),       # Wo
        _const_spec((NLAYERS, H, I)),       # FFN W1
        _const_spec((NLAYERS, 1, I)),       # FFN b1
        _const_spec((NLAYERS, I, H)),       # FFN W2
        _const_spec((NLAYERS, 6, H)),       # [bo, ln1_g, ln1_b, b2, ln2_g, ln2_b]
        _const_spec((H, L)),                # classifier W
        _const_spec((1, L)),                # classifier b
        _const_spec((L, L)),                # CRF transitions
        _const_spec((1, L)),                # CRF start
        _const_spec((1, L)),                # CRF end
    ]


def _flat_params(p):
    return (p["emb_ln"], p["wqkv"], p["bqkv"], p["wo"], p["w1"], p["b1"], p["w2"],
            p["vecs"], p["cls_w"], p["cls_b"], p["crf_trans"], p["crf_start"],
            p["crf_end"])


_COMPILER_PARAMS = pltpu.CompilerParams(
    dimension_semantics=("parallel",),       # batch elems independent -> v7x 2 TCs
    vmem_limit_bytes=32 * 1024 * 1024,
)


def bert_crf_decode_pallas(params, x_emb, attn_bias, attention_mask):
    grid_spec = pltpu.PrefetchScalarGridSpec(
        num_scalar_prefetch=1,               # attention_mask -> SMEM scalars
        grid=(B,),
        in_specs=_in_specs(),
        out_specs=_batch_spec((1, 1, S)),
        scratch_shapes=[pltpu.VMEM((S, 3 * H), jnp.float32),   # fused QKV staging
                        pltpu.VMEM((S, 1, L), jnp.int32)],     # Viterbi backpointers
    )
    return pl.pallas_call(
        bert_crf_decode_kernel,
        out_shape=jax.ShapeDtypeStruct((B, 1, S), jnp.int32),
        grid_spec=grid_spec,
        compiler_params=_COMPILER_PARAMS,
    )(attention_mask.astype(jnp.int32), x_emb, attn_bias, *_flat_params(params))


def bert_crf_loss_pallas(params, x_emb, attn_bias, attention_mask, labels):
    grid_spec = pltpu.PrefetchScalarGridSpec(
        num_scalar_prefetch=2,               # attention_mask, labels -> SMEM scalars
        grid=(B,),
        in_specs=_in_specs(),
        out_specs=_batch_spec((1, 1, 1)),
        scratch_shapes=[pltpu.VMEM((S, 3 * H), jnp.float32)],
    )
    return pl.pallas_call(
        bert_crf_loss_kernel,
        out_shape=jax.ShapeDtypeStruct((B, 1, 1), jnp.float32),
        grid_spec=grid_spec,
        compiler_params=_COMPILER_PARAMS,
    )(attention_mask.astype(jnp.int32), labels.astype(jnp.int32),
      x_emb, attn_bias, *_flat_params(params))


# ----------------------------- parameters (synthetic, deterministic) ----------
def init_params(key):
    keys = iter(jax.random.split(key, 64))
    nrm = lambda shp: jax.random.normal(next(keys), shp, jnp.float32) * 0.02
    uni = lambda shp: jax.random.uniform(next(keys), shp, jnp.float32, -0.1, 0.1)

    wqkv, bqkv, wo, w1, b1, w2, vecs = [], [], [], [], [], [], []
    for _ in range(NLAYERS):
        wq, wk, wv = nrm((H, H)), nrm((H, H)), nrm((H, H))
        wqkv.append(jnp.concatenate([wq, wk, wv], axis=1))       # (H, 3H)
        bqkv.append(jnp.zeros((1, 3 * H), jnp.float32))
        wo.append(nrm((H, H)))
        w1.append(nrm((H, I)))
        b1.append(jnp.zeros((1, I), jnp.float32))
        w2.append(nrm((I, H)))
        vecs.append(jnp.concatenate([
            jnp.zeros((1, H), jnp.float32),                      # bo
            jnp.ones((1, H), jnp.float32),                       # ln1 gamma
            jnp.zeros((1, H), jnp.float32),                      # ln1 beta
            jnp.zeros((1, H), jnp.float32),                      # FFN b2
            jnp.ones((1, H), jnp.float32),                       # ln2 gamma
            jnp.zeros((1, H), jnp.float32),                      # ln2 beta
        ], axis=0))                                              # (6, H)

    return {
        "word_emb": nrm((VOCAB, H)),
        "pos_emb": nrm((MAX_POS, H)),
        "type_emb": nrm((2, H)),
        "emb_ln": jnp.concatenate([jnp.ones((1, H), jnp.float32),
                                   jnp.zeros((1, H), jnp.float32)], axis=0),
        "wqkv": jnp.stack(wqkv), "bqkv": jnp.stack(bqkv), "wo": jnp.stack(wo),
        "w1": jnp.stack(w1), "b1": jnp.stack(b1), "w2": jnp.stack(w2),
        "vecs": jnp.stack(vecs),
        "cls_w": nrm((H, L)), "cls_b": jnp.zeros((1, L), jnp.float32),
        "crf_start": uni((1, L)), "crf_end": uni((1, L)), "crf_trans": uni((L, L)),
    }


# ----------------------------- forward (BertCRF.forward) ----------------------
def bert_crf_forward(params, input_ids, attention_mask, labels=None):
    bsz, seq = input_ids.shape
    # embedding gathers are glue; summed embedding feeds straight into the kernel
    emb = (params["word_emb"][input_ids]
           + params["pos_emb"][:seq][None, :, :]
           + params["type_emb"][0][None, None, :])
    maskf = attention_mask.astype(jnp.float32)
    attn_bias = ((1.0 - maskf) * NEG)[:, None, :]                # (B, 1, S)

    if labels is not None:
        llh = bert_crf_loss_pallas(params, emb, attn_bias, attention_mask, labels)
        return -jnp.sum(llh)                 # torchcrf default reduction='sum'
    tags = bert_crf_decode_pallas(params, emb, attn_bias, attention_mask)
    return tags[:, 0, :]                     # (B, S); -1 where attention_mask == 0


# ----------------------------- demo -------------------------------------------
if __name__ == "__main__":
    key = jax.random.PRNGKey(0)
    pkey, ikey, lkey = jax.random.split(key, 3)
    params = init_params(pkey)

    input_ids = jax.random.randint(ikey, (B, S), 0, VOCAB, dtype=jnp.int32)
    attention_mask = jnp.array([[1, 1, 1, 1, 1, 1, 1, 1],
                                [1, 1, 1, 1, 1, 1, 0, 0]], dtype=jnp.int32)
    labels = jax.random.randint(lkey, (B, S), 0, L, dtype=jnp.int32)

    decode_fn = jax.jit(lambda p, ids, m: bert_crf_forward(p, ids, m))
    loss_fn = jax.jit(lambda p, ids, m, lab: bert_crf_forward(p, ids, m, lab))

    # labels=None branch -> viterbi decode predictions (one fused pallas_call)
    preds = jax.block_until_ready(decode_fn(params, input_ids, attention_mask))
    # labels given branch -> CRF negative log-likelihood (one fused pallas_call)
    loss = jax.block_until_ready(loss_fn(params, input_ids, attention_mask, labels))

    assert preds.shape == (B, S)
    assert loss.shape == ()
    print("KERNEL_OK")
</pallas_src>

<mosaic_0001>
module attributes {stable_mosaic.version = 11 : i64} {
  func.func @bert_crf_decode_kernel(%arg0: i32, %arg1: memref<2x8xi32, #tpu.memory_space<smem>>, %arg2: memref<1x8x32xf32, #tpu.memory_space<vmem>>, %arg3: memref<1x1x8xf32, #tpu.memory_space<vmem>>, %arg4: memref<2x32xf32, #tpu.memory_space<vmem>>, %arg5: memref<2x32x96xf32, #tpu.memory_space<vmem>>, %arg6: memref<2x1x96xf32, #tpu.memory_space<vmem>>, %arg7: memref<2x32x32xf32, #tpu.memory_space<vmem>>, %arg8: memref<2x32x128xf32, #tpu.memory_space<vmem>>, %arg9: memref<2x1x128xf32, #tpu.memory_space<vmem>>, %arg10: memref<2x128x32xf32, #tpu.memory_space<vmem>>, %arg11: memref<2x6x32xf32, #tpu.memory_space<vmem>>, %arg12: memref<32x5xf32, #tpu.memory_space<vmem>>, %arg13: memref<1x5xf32, #tpu.memory_space<vmem>>, %arg14: memref<5x5xf32, #tpu.memory_space<vmem>>, %arg15: memref<1x5xf32, #tpu.memory_space<vmem>>, %arg16: memref<1x5xf32, #tpu.memory_space<vmem>>, %arg17: memref<1x1x8xi32, #tpu.memory_space<vmem>>, %arg18: memref<8x96xf32, #tpu.memory_space<vmem>>, %arg19: memref<8x1x5xi32, #tpu.memory_space<vmem>>) attributes {dimension_semantics = [#tpu.dimension_semantics<parallel>], iteration_bounds = array<i64: 2>, scalar_prefetch = 1 : i64, scratch_operands = 2 : i64, tpu.core_type = #tpu.core_type<tc>, window_params = [{transform_indices = @transform_0, window_bounds = array<i64: 1, 8, 32>}, {transform_indices = @transform_1, window_bounds = array<i64: 1, 1, 8>}, {pipeline_mode = #tpu.pipeline_mode<synchronous>, transform_indices = @transform_2, window_bounds = array<i64: 2, 32>}, {pipeline_mode = #tpu.pipeline_mode<synchronous>, transform_indices = @transform_3, window_bounds = array<i64: 2, 32, 96>}, {pipeline_mode = #tpu.pipeline_mode<synchronous>, transform_indices = @transform_4, window_bounds = array<i64: 2, 1, 96>}, {pipeline_mode = #tpu.pipeline_mode<synchronous>, transform_indices = @transform_5, window_bounds = array<i64: 2, 32, 32>}, {pipeline_mode = #tpu.pipeline_mode<synchronous>, transform_indices = @transform_6, window_bounds = array<i64: 2, 32, 128>}, {pipeline_mode = #tpu.pipeline_mode<synchronous>, transform_indices = @transform_7, window_bounds = array<i64: 2, 1, 128>}, {pipeline_mode = #tpu.pipeline_mode<synchronous>, transform_indices = @transform_8, window_bounds = array<i64: 2, 128, 32>}, {pipeline_mode = #tpu.pipeline_mode<synchronous>, transform_indices = @transform_9, window_bounds = array<i64: 2, 6, 32>}, {pipeline_mode = #tpu.pipeline_mode<synchronous>, transform_indices = @transform_10, window_bounds = array<i64: 32, 5>}, {pipeline_mode = #tpu.pipeline_mode<synchronous>, transform_indices = @transform_11, window_bounds = array<i64: 1, 5>}, {pipeline_mode = #tpu.pipeline_mode<synchronous>, transform_indices = @transform_12, window_bounds = array<i64: 5, 5>}, {pipeline_mode = #tpu.pipeline_mode<synchronous>, transform_indices = @transform_13, window_bounds = array<i64: 1, 5>}, {pipeline_mode = #tpu.pipeline_mode<synchronous>, transform_indices = @transform_14, window_bounds = array<i64: 1, 5>}, {transform_indices = @transform_15, window_bounds = array<i64: 1, 1, 8>}]} {
    %c0 = arith.constant 0 : index
    %c0_0 = arith.constant 0 : index
    %c0_1 = arith.constant 0 : index
    %0 = vector.load %arg3[%c0, %c0_0, %c0_1] : memref<1x1x8xf32, #tpu.memory_space<vmem>>, vector<1x1x8xf32>
    %1 = vector.shape_cast %0 : vector<1x1x8xf32> to vector<1x8xf32>
    %c0_2 = arith.constant 0 : index
    %c0_3 = arith.constant 0 : index
    %c0_4 = arith.constant 0 : index
    %2 = vector.load %arg2[%c0_2, %c0_3, %c0_4] : memref<1x8x32xf32, #tpu.memory_space<vmem>>, vector<1x8x32xf32>
    %3 = vector.shape_cast %2 : vector<1x8x32xf32> to vector<8x32xf32>
    %c0_5 = arith.constant 0 : index
    %c0_6 = arith.constant 0 : index
    %4 = vector.load %arg4[%c0_5, %c0_6] : memref<2x32xf32, #tpu.memory_space<vmem>>, vector<1x32xf32>
    %c1 = arith.constant 1 : index
    %c0_7 = arith.constant 0 : index
    %5 = vector.load %arg4[%c1, %c0_7] : memref<2x32xf32, #tpu.memory_space<vmem>>, vector<1x32xf32>
    %cst = arith.constant dense<0.000000e+00> : vector<8xf32>
    %6 = vector.multi_reduction <add>, %3, %cst [1] : vector<8x32xf32> to vector<8xf32>
    %7 = vector.shape_cast %6 : vector<8xf32> to vector<8x1xf32>
    %cst_8 = arith.constant 3.200000e+01 : f32
    %8 = vector.broadcast %cst_8 : f32 to vector<8x1xf32>
    %9 = arith.divf %7, %8 : vector<8x1xf32>
    %10 = vector.broadcast %9 : vector<8x1xf32> to vector<8x32xf32>
    %11 = arith.subf %3, %10 : vector<8x32xf32>
    %12 = arith.mulf %11, %11 : vector<8x32xf32>
    %cst_9 = arith.constant dense<0.000000e+00> : vector<8xf32>
    %13 = vector.multi_reduction <add>, %12, %cst_9 [1] : vector<8x32xf32> to vector<8xf32>
    %14 = vector.shape_cast %13 : vector<8xf32> to vector<8x1xf32>
    %cst_10 = arith.constant 3.200000e+01 : f32
    %15 = vector.broadcast %cst_10 : f32 to vector<8x1xf32>
    %16 = arith.divf %14, %15 : vector<8x1xf32>
    %17 = vector.broadcast %9 : vector<8x1xf32> to vector<8x32xf32>
    %18 = arith.subf %3, %17 : vector<8x32xf32>
    %cst_11 = arith.constant 9.99999996E-13 : f32
    %19 = vector.broadcast %cst_11 : f32 to vector<8x1xf32>
    %20 = arith.addf %16, %19 : vector<8x1xf32>
    %21 = math.rsqrt %20 : vector<8x1xf32>
    %22 = vector.broadcast %21 : vector<8x1xf32> to vector<8x32xf32>
    %23 = arith.mulf %18, %22 : vector<8x32xf32>
    %24 = vector.broadcast %4 : vector<1x32xf32> to vector<8x32xf32>
    %25 = arith.mulf %23, %24 : vector<8x32xf32>
    %26 = vector.broadcast %5 : vector<1x32xf32> to vector<8x32xf32>
    %27 = arith.addf %25, %26 : vector<8x32xf32>
    %c0_12 = arith.constant 0 : index
    %c0_13 = arith.constant 0 : index
    %c0_14 = arith.constant 0 : index
    %28 = vector.load %arg5[%c0_12, %c0_13, %c0_14] : memref<2x32x96xf32, #tpu.memory_space<vmem>>, vector<1x32x96xf32>
    %29 = vector.shape_cast %28 : vector<1x32x96xf32> to vector<32x96xf32>
    %cst_15 = arith.constant dense<0.000000e+00> : vector<8x96xf32>
    %30 = tpu.matmul %27, %29, %cst_15 {dimension_numbers = #tpu.dot_dimension_numbers<[1], [0], [0], [1], [0, 0, 1, 1], [], []>} : vector<8x32xf32>, vector<32x96xf32>, vector<8x96xf32> -> vector<8x96xf32>
    %c0_16 = arith.constant 0 : index
    %c0_17 = arith.constant 0 : index
    %c0_18 = arith.constant 0 : index
    %31 = vector.load %arg6[%c0_16, %c0_17, %c0_18] : memref<2x1x96xf32, #tpu.memory_space<vmem>>, vector<1x1x96xf32>
    %32 = vector.shape_cast %31 : vector<1x1x96xf32> to vector<1x96xf32>
    %33 = vector.broadcast %32 : vector<1x96xf32> to vector<8x96xf32>
    %34 = arith.addf %30, %33 : vector<8x96xf32>
    %c0_19 = arith.constant 0 : index
    %c0_20 = arith.constant 0 : index
    %35 = vector.load %arg18[%c0_19, %c0_20] : memref<8x96xf32, #tpu.memory_space<vmem>>, vector<8x96xf32>
    tpu.vector_store %arg18[%c0_19, %c0_20], %34 {strides = array<i32>} : memref<8x96xf32, #tpu.memory_space<vmem>>, vector<8x96xf32>,
    %c0_21 = arith.constant 0 : index
    %c0_22 = arith.constant 0 : index
    %c0_23 = arith.constant 0 : index
    %36 = vector.load %arg7[%c0_21, %c0_22, %c0_23] : memref<2x32x32xf32, #tpu.memory_space<vmem>>, vector<1x32x32xf32>
    %37 = vector.shape_cast %36 : vector<1x32x32xf32> to vector<32x32xf32>
    %cst_24 = arith.constant 0.000000e+00 : f32
    %38 = vector.broadcast %cst_24 : f32 to vector<8x32xf32>
    %c0_25 = arith.constant 0 : index
    %c0_26 = arith.constant 0 : index
    %39 = vector.load %arg18[%c0_25, %c0_26] : memref<8x96xf32, #tpu.memory_space<vmem>>, vector<8x8xf32>
    %c0_27 = arith.constant 0 : index
    %c32 = arith.constant 32 : index
    %40 = vector.load %arg18[%c0_27, %c32] : memref<8x96xf32, #tpu.memory_space<vmem>>, vector<8x8xf32>
    %c0_28 = arith.constant 0 : index
    %c64 = arith.constant 64 : index
    %41 = vector.load %arg18[%c0_28, %c64] : memref<8x96xf32, #tpu.memory_space<vmem>>, vector<8x8xf32>
    %cst_29 = arith.constant dense<0.000000e+00> : vector<8x8xf32>
    %42 = tpu.matmul %39, %40, %cst_29 {dimension_numbers = #tpu.dot_dimension_numbers<[1], [1], [0], [0], [0, 0, 1, 0], [], []>} : vector<8x8xf32>, vector<8x8xf32>, vector<8x8xf32> -> vector<8x8xf32>
    %cst_30 = arith.constant 0.353553385 : f32
    %43 = vector.broadcast %cst_30 : f32 to vector<8x8xf32>
    %44 = arith.mulf %42, %43 : vector<8x8xf32>
    %45 = vector.broadcast %1 : vector<1x8xf32> to vector<8x8xf32>
    %46 = arith.addf %44, %45 : vector<8x8xf32>
    %cst_31 = arith.constant dense<0xFF800000> : vector<8xf32>
    %47 = vector.multi_reduction <maximumf>, %46, %cst_31 [1] : vector<8x8xf32> to vector<8xf32>
    %48 = vector.shape_cast %47 : vector<8xf32> to vector<8x1xf32>
    %49 = vector.broadcast %48 : vector<8x1xf32> to vector<8x8xf32>
    %50 = arith.subf %46, %49 : vector<8x8xf32>
    %51 = math.exp %50 : vector<8x8xf32>
    %cst_32 = arith.constant dense<0.000000e+00> : vector<8xf32>
    %52 = vector.multi_reduction <add>, %51, %cst_32 [1] : vector<8x8xf32> to vector<8xf32>
    %53 = vector.shape_cast %52 : vector<8xf32> to vector<8x1xf32>
    %54 = tpu.reciprocal %53 {approx = true} : vector<8x1xf32> -> vector<8x1xf32>
    %55 = vector.broadcast %54 : vector<8x1xf32> to vector<8x8xf32>
    %56 = arith.mulf %51, %55 : vector<8x8xf32>
    %cst_33 = arith.constant dense<0.000000e+00> : vector<8x8xf32>
    %57 = tpu.matmul %56, %41, %cst_33 {dimension_numbers = #tpu.dot_dimension_numbers<[1], [0], [0], [1], [0, 0, 1, 1], [], []>} : vector<8x8xf32>, vector<8x8xf32>, vector<8x8xf32> -> vector<8x8xf32>
    %58 = vector.extract_strided_slice %37 {offsets = [0, 0], sizes = [8, 32], strides = [1, 1]} : vector<32x32xf32> to vector<8x32xf32>
    %cst_34 = arith.constant dense<0.000000e+00> : vector<8x32xf32>
    %59 = tpu.matmul %57, %58, %cst_34 {dimension_numbers = #tpu.dot_dimension_numbers<[1], [0], [0], [1], [0, 0, 1, 1], [], []>} : vector<8x8xf32>, vector<8x32xf32>, vector<8x32xf32> -> vector<8x32xf32>
    %60 = arith.addf %38, %59 : vector<8x32xf32>
    %c0_35 = arith.constant 0 : index
    %c8 = arith.constant 8 : index
    %61 = vector.load %arg18[%c0_35, %c8] : memref<8x96xf32, #tpu.memory_space<vmem>>, vector<8x8xf32>
    %c0_36 = arith.constant 0 : index
    %c40 = arith.constant 40 : index
    %62 = vector.load %arg18[%c0_36, %c40] : memref<8x96xf32, #tpu.memory_space<vmem>>, vector<8x8xf32>
    %c0_37 = arith.constant 0 : index
    %c72 = arith.constant 72 : index
    %63 = vector.load %arg18[%c0_37, %c72] : memref<8x96xf32, #tpu.memory_space<vmem>>, vector<8x8xf32>
    %cst_38 = arith.constant dense<0.000000e+00> : vector<8x8xf32>
    %64 = tpu.matmul %61, %62, %cst_38 {dimension_numbers = #tpu.dot_dimension_numbers<[1], [1], [0], [0], [0, 0, 1, 0], [], []>} : vector<8x8xf32>, vector<8x8xf32>, vector<8x8xf32> -> vector<8x8xf32>
    %cst_39 = arith.constant 0.353553385 : f32
    %65 = vector.broadcast %cst_39 : f32 to vector<8x8xf32>
    %66 = arith.mulf %64, %65 : vector<8x8xf32>
    %67 = vector.broadcast %1 : vector<1x8xf32> to vector<8x8xf32>
    %68 = arith.addf %66, %67 : vector<8x8xf32>
    %cst_40 = arith.constant dense<0xFF800000> : vector<8xf32>
    %69 = vector.multi_reduction <maximumf>, %68, %cst_40 [1] : vector<8x8xf32> to vector<8xf32>
    %70 = vector.shape_cast %69 : vector<8xf32> to vector<8x1xf32>
    %71 = vector.broadcast %70 : vector<8x1xf32> to vector<8x8xf32>
    %72 = arith.subf %68, %71 : vector<8x8xf32>
    %73 = math.exp %72 : vector<8x8xf32>
    %cst_41 = arith.constant dense<0.000000e+00> : vector<8xf32>
    %74 = vector.multi_reduction <add>, %73, %cst_41 [1] : vector<8x8xf32> to vector<8xf32>
    %75 = vector.shape_cast %74 : vector<8xf32> to vector<8x1xf32>
    %76 = tpu.reciprocal %75 {approx = true} : vector<8x1xf32> -> vector<8x1xf32>
    %77 = vector.broadcast %76 : vector<8x1xf32> to vector<8x8xf32>
    %78 = arith.mulf %73, %77 : vector<8x8xf32>
    %cst_42 = arith.constant dense<0.000000e+00> : vector<8x8xf32>
    %79 = tpu.matmul %78, %63, %cst_42 {dimension_numbers = #tpu.dot_dimension_numbers<[1], [0], [0], [1], [0, 0, 1, 1], [], []>} : vector<8x8xf32>, vector<8x8xf32>, vector<8x8xf32> -> vector<8x8xf32>
    %80 = vector.extract_strided_slice %37 {offsets = [8, 0], sizes = [8, 32], strides = [1, 1]} : vector<32x32xf32> to vector<8x32xf32>
    %cst_43 = arith.constant dense<0.000000e+00> : vector<8x32xf32>
    %81 = tpu.matmul %79, %80, %cst_43 {dimension_numbers = #tpu.dot_dimension_numbers<[1], [0], [0], [1], [0, 0, 1, 1], [], []>} : vector<8x8xf32>, vector<8x32xf32>, vector<8x32xf32> -> vector<8x32xf32>
    %82 = arith.addf %60, %81 : vector<8x32xf32>
    %c0_44 = arith.constant 0 : index
    %c16 = arith.constant 16 : index
    %83 = vector.load %arg18[%c0_44, %c16] : memref<8x96xf32, #tpu.memory_space<vmem>>, vector<8x8xf32>
    %c0_45 = arith.constant 0 : index
    %c48 = arith.constant 48 : index
    %84 = vector.load %arg18[%c0_45, %c48] : memref<8x96xf32, #tpu.memory_space<vmem>>, vector<8x8xf32>
    %c0_46 = arith.constant 0 : index
    %c80 = arith.constant 80 : index
    %85 = vector.load %arg18[%c0_46, %c80] : memref<8x96xf32, #tpu.memory_space<vmem>>, vector<8x8xf32>
    %cst_47 = arith.constant dense<0.000000e+00> : vector<8x8xf32>
    %86 = tpu.matmul %83, %84, %cst_47 {dimension_numbers = #tpu.dot_dimension_numbers<[1], [1], [0], [0], [0, 0, 1, 0], [], []>} : vector<8x8xf32>, vector<8x8xf32>, vector<8x8xf32> -> vector<8x8xf32>
    %cst_48 = arith.constant 0.353553385 : f32
    %87 = vector.broadcast %cst_48 : f32 to vector<8x8xf32>
    %88 = arith.mulf %86, %87 : vector<8x8xf32>
    %89 = vector.broadcast %1 : vector<1x8xf32> to vector<8x8xf32>
    %90 = arith.addf %88, %89 : vector<8x8xf32>
    %cst_49 = arith.constant dense<0xFF800000> : vector<8xf32>
    %91 = vector.multi_reduction <maximumf>, %90, %cst_49 [1] : vector<8x8xf32> to vector<8xf32>
    %92 = vector.shape_cast %91 : vector<8xf32> to vector<8x1xf32>
    %93 = vector.broadcast %92 : vector<8x1xf32> to vector<8x8xf32>
    %94 = arith.subf %90, %93 : vector<8x8xf32>
    %95 = math.exp %94 : vector<8x8xf32>
    %cst_50 = arith.constant dense<0.000000e+00> : vector<8xf32>
    %96 = vector.multi_reduction <add>, %95, %cst_50 [1] : vector<8x8xf32> to vector<8xf32>
    %97 = vector.shape_cast %96 : vector<8xf32> to vector<8x1xf32>
    %98 = tpu.reciprocal %97 {approx = true} : vector<8x1xf32> -> vector<8x1xf32>
    %99 = vector.broadcast %98 : vector<8x1xf32> to vector<8x8xf32>
    %100 = arith.mulf %95, %99 : vector<8x8xf32>
    %cst_51 = arith.constant dense<0.000000e+00> : vector<8x8xf32>
    %101 = tpu.matmul %100, %85, %cst_51 {dimension_numbers = #tpu.dot_dimension_numbers<[1], [0], [0], [1], [0, 0, 1, 1], [], []>} : vector<8x8xf32>, vector<8x8xf32>, vector<8x8xf32> -> vector<8x8xf32>
    %102 = vector.extract_strided_slice %37 {offsets = [16, 0], sizes = [8, 32], strides = [1, 1]} : vector<32x32xf32> to vector<8x32xf32>
    %cst_52 = arith.constant dense<0.000000e+00> : vector<8x32xf32>
    %103 = tpu.matmul %101, %102, %cst_52 {dimension_numbers = #tpu.dot_dimension_numbers<[1], [0], [0], [1], [0, 0, 1, 1], [], []>} : vector<8x8xf32>, vector<8x32xf32>, vector<8x32xf32> -> vector<8x32xf32>
    %104 = arith.addf %82, %103 : vector<8x32xf32>
    %c0_53 = arith.constant 0 : index
    %c24 = arith.constant 24 : index
    %105 = vector.load %arg18[%c0_53, %c24] : memref<8x96xf32, #tpu.memory_space<vmem>>, vector<8x8xf32>
    %c0_54 = arith.constant 0 : index
    %c56 = arith.constant 56 : index
    %106 = vector.load %arg18[%c0_54, %c56] : memref<8x96xf32, #tpu.memory_space<vmem>>, vector<8x8xf32>
    %c0_55 = arith.constant 0 : index
    %c88 = arith.constant 88 : index
    %107 = vector.load %arg18[%c0_55, %c88] : memref<8x96xf32, #tpu.memory_space<vmem>>, vector<8x8xf32>
    %cst_56 = arith.constant dense<0.000000e+00> : vector<8x8xf32>
    %108 = tpu.matmul %105, %106, %cst_56 {dimension_numbers = #tpu.dot_dimension_numbers<[1], [1], [0], [0], [0, 0, 1, 0], [], []>} : vector<8x8xf32>, vector<8x8xf32>, vector<8x8xf32> -> vector<8x8xf32>
    %cst_57 = arith.constant 0.353553385 : f32
    %109 = vector.broadcast %cst_57 : f32 to vector<8x8xf32>
    %110 = arith.mulf %108, %109 : vector<8x8xf32>
    %111 = vector.broadcast %1 : vector<1x8xf32> to vector<8x8xf32>
    %112 = arith.addf %110, %111 : vector<8x8xf32>
    %cst_58 = arith.constant dense<0xFF800000> : vector<8xf32>
    %113 = vector.multi_reduction <maximumf>, %112, %cst_58 [1] : vector<8x8xf32> to vector<8xf32>
    %114 = vector.shape_cast %113 : vector<8xf32> to vector<8x1xf32>
    %115 = vector.broadcast %114 : vector<8x1xf32> to vector<8x8xf32>
    %116 = arith.subf %112, %115 : vector<8x8xf32>
    %117 = math.exp %116 : vector<8x8xf32>
    %cst_59 = arith.constant dense<0.000000e+00> : vector<8xf32>
    %118 = vector.multi_reduction <add>, %117, %cst_59 [1] : vector<8x8xf32> to vector<8xf32>
    %119 = vector.shape_cast %118 : vector<8xf32> to vector<8x1xf32>
    %120 = tpu.reciprocal %119 {approx = true} : vector<8x1xf32> -> vector<8x1xf32>
    %121 = vector.broadcast %120 : vector<8x1xf32> to vector<8x8xf32>
    %122 = arith.mulf %117, %121 : vector<8x8xf32>
    %cst_60 = arith.constant dense<0.000000e+00> : vector<8x8xf32>
    %123 = tpu.matmul %122, %107, %cst_60 {dimension_numbers = #tpu.dot_dimension_numbers<[1], [0], [0], [1], [0, 0, 1, 1], [], []>} : vector<8x8xf32>, vector<8x8xf32>, vector<8x8xf32> -> vector<8x8xf32>
    %124 = vector.extract_strided_slice %37 {offsets = [24, 0], sizes = [8, 32], strides = [1, 1]} : vector<32x32xf32> to vector<8x32xf32>
    %cst_61 = arith.constant dense<0.000000e+00> : vector<8x32xf32>
    %125 = tpu.matmul %123, %124, %cst_61 {dimension_numbers = #tpu.dot_dimension_numbers<[1], [0], [0], [1], [0, 0, 1, 1], [], []>} : vector<8x8xf32>, vector<8x32xf32>, vector<8x32xf32> -> vector<8x32xf32>
    %126 = arith.addf %104, %125 : vector<8x32xf32>
    %c0_62 = arith.constant 0 : index
    %c0_63 = arith.constant 0 : index
    %c0_64 = arith.constant 0 : index
    %127 = vector.load %arg11[%c0_62, %c0_63, %c0_64] : memref<2x6x32xf32, #tpu.memory_space<vmem>>, vector<1x6x32xf32>
    %128 = vector.shape_cast %127 : vector<1x6x32xf32> to vector<6x32xf32>
    %129 = vector.extract_strided_slice %128 {offsets = [0, 0], sizes = [1, 32], strides = [1, 1]} : vector<6x32xf32> to vector<1x32xf32>
    %130 = vector.broadcast %129 : vector<1x32xf32> to vector<8x32xf32>
    %131 = arith.addf %126, %130 : vector<8x32xf32>
    %132 = arith.addf %27, %131 : vector<8x32xf32>
    %133 = vector.extract_strided_slice %128 {offsets = [1, 0], sizes = [1, 32], strides = [1, 1]} : vector<6x32xf32> to vector<1x32xf32>
    %134 = vector.extract_strided_slice %128 {offsets = [2, 0], sizes = [1, 32], strides = [1, 1]} : vector<6x32xf32> to vector<1x32xf32>
    %cst_65 = arith.constant dense<0.000000e+00> : vector<8xf32>
    %135 = vector.multi_reduction <add>, %132, %cst_65 [1] : vector<8x32xf32> to vector<8xf32>
    %136 = vector.shape_cast %135 : vector<8xf32> to vector<8x1xf32>
    %cst_66 = arith.constant 3.200000e+01 : f32
    %137 = vector.broadcast %cst_66 : f32 to vector<8x1xf32>
    %138 = arith.divf %136, %137 : vector<8x1xf32>
    %139 = vector.broadcast %138 : vector<8x1xf32> to vector<8x32xf32>
    %140 = arith.subf %132, %139 : vector<8x32xf32>
    %141 = arith.mulf %140, %140 : vector<8x32xf32>
    %cst_67 = arith.constant dense<0.000000e+00> : vector<8xf32>
    %142 = vector.multi_reduction <add>, %141, %cst_67 [1] : vector<8x32xf32> to vector<8xf32>
    %143 = vector.shape_cast %142 : vector<8xf32> to vector<8x1xf32>
    %cst_68 = arith.constant 3.200000e+01 : f32
    %144 = vector.broadcast %cst_68 : f32 to vector<8x1xf32>
    %145 = arith.divf %143, %144 : vector<8x1xf32>
    %146 = vector.broadcast %138 : vector<8x1xf32> to vector<8x32xf32>
    %147 = arith.subf %132, %146 : vector<8x32xf32>
    %cst_69 = arith.constant 9.99999996E-13 : f32
    %148 = vector.broadcast %cst_69 : f32 to vector<8x1xf32>
    %149 = arith.addf %145, %148 : vector<8x1xf32>
    %150 = math.rsqrt %149 : vector<8x1xf32>
    %151 = vector.broadcast %150 : vector<8x1xf32> to vector<8x32xf32>
    %152 = arith.mulf %147, %151 : vector<8x32xf32>
    %153 = vector.broadcast %133 : vector<1x32xf32> to vector<8x32xf32>
    %154 = arith.mulf %152, %153 : vector<8x32xf32>
    %155 = vector.broadcast %134 : vector<1x32xf32> to vector<8x32xf32>
    %156 = arith.addf %154, %155 : vector<8x32xf32>
    %c0_70 = arith.constant 0 : index
    %c0_71 = arith.constant 0 : index
    %c0_72 = arith.constant 0 : index
    %157 = vector.load %arg8[%c0_70, %c0_71, %c0_72] : memref<2x32x128xf32, #tpu.memory_space<vmem>>, vector<1x32x128xf32>
    %158 = vector.shape_cast %157 : vector<1x32x128xf32> to vector<32x128xf32>
    %cst_73 = arith.constant dense<0.000000e+00> : vector<8x128xf32>
    %159 = tpu.matmul %156, %158, %cst_73 {dimension_numbers = #tpu.dot_dimension_numbers<[1], [0], [0], [1], [0, 0, 1, 1], [], []>} : vector<8x32xf32>, vector<32x128xf32>, vector<8x128xf32> -> vector<8x128xf32>
    %c0_74 = arith.constant 0 : index
    %c0_75 = arith.constant 0 : index
    %c0_76 = arith.constant 0 : index
    %160 = vector.load %arg9[%c0_74, %c0_75, %c0_76] : memref<2x1x128xf32, #tpu.memory_space<vmem>>, vector<1x1x128xf32>
    %161 = vector.shape_cast %160 : vector<1x1x128xf32> to vector<1x128xf32>
    %162 = vector.broadcast %161 : vector<1x128xf32> to vector<8x128xf32>
    %163 = arith.addf %159, %162 : vector<8x128xf32>
    %cst_77 = arith.constant 5.000000e-01 : f32
    %164 = vector.broadcast %cst_77 : f32 to vector<8x128xf32>
    %165 = arith.mulf %164, %163 : vector<8x128xf32>
    %cst_78 = arith.constant 4.471500e-02 : f32
    %166 = vector.broadcast %cst_78 : f32 to vector<8x128xf32>
    %167 = arith.mulf %166, %163 : vector<8x128xf32>
    %168 = arith.mulf %167, %163 : vector<8x128xf32>
    %169 = arith.mulf %168, %163 : vector<8x128xf32>
    %170 = arith.addf %163, %169 : vector<8x128xf32>
    %cst_79 = arith.constant 0.797884583 : f32
    %171 = vector.broadcast %cst_79 : f32 to vector<8x128xf32>
    %172 = arith.mulf %171, %170 : vector<8x128xf32>
    %173 = math.tanh %172 : vector<8x128xf32>
    %cst_80 = arith.constant 1.000000e+00 : f32
    %174 = vector.broadcast %cst_80 : f32 to vector<8x128xf32>
    %175 = arith.addf %174, %173 : vector<8x128xf32>
    %176 = arith.mulf %165, %175 : vector<8x128xf32>
    %c0_81 = arith.constant 0 : index
    %c0_82 = arith.constant 0 : index
    %c0_83 = arith.constant 0 : index
    %177 = vector.load %arg10[%c0_81, %c0_82, %c0_83] : memref<2x128x32xf32, #tpu.memory_space<vmem>>, vector<1x128x32xf32>
    %178 = vector.shape_cast %177 : vector<1x128x32xf32> to vector<128x32xf32>
    %cst_84 = arith.constant dense<0.000000e+00> : vector<8x32xf32>
    %179 = tpu.matmul %176, %178, %cst_84 {dimension_numbers = #tpu.dot_dimension_numbers<[1], [0], [0], [1], [0, 0, 1, 1], [], []>} : vector<8x128xf32>, vector<128x32xf32>, vector<8x32xf32> -> vector<8x32xf32>
    %180 = vector.extract_strided_slice %128 {offsets = [3, 0], sizes = [1, 32], strides = [1, 1]} : vector<6x32xf32> to vector<1x32xf32>
    %181 = vector.broadcast %180 : vector<1x32xf32> to vector<8x32xf32>
    %182 = arith.addf %179, %181 : vector<8x32xf32>
    %183 = arith.addf %156, %182 : vector<8x32xf32>
    %184 = vector.extract_strided_slice %128 {offsets = [4, 0], sizes = [1, 32], strides = [1, 1]} : vector<6x32xf32> to vector<1x32xf32>
    %185 = vector.extract_strided_slice %128 {offsets = [5, 0], sizes = [1, 32], strides = [1, 1]} : vector<6x32xf32> to vector<1x32xf32>
    %cst_85 = arith.constant dense<0.000000e+00> : vector<8xf32>
    %186 = vector.multi_reduction <add>, %183, %cst_85 [1] : vector<8x32xf32> to vector<8xf32>
    %187 = vector.shape_cast %186 : vector<8xf32> to vector<8x1xf32>
    %cst_86 = arith.constant 3.200000e+01 : f32
    %188 = vector.broadcast %cst_86 : f32 to vector<8x1xf32>
    %189 = arith.divf %187, %188 : vector<8x1xf32>
    %190 = vector.broadcast %189 : vector<8x1xf32> to vector<8x32xf32>
    %191 = arith.subf %183, %190 : vector<8x32xf32>
    %192 = arith.mulf %191, %191 : vector<8x32xf32>
    %cst_87 = arith.constant dense<0.000000e+00> : vector<8xf32>
    %193 = vector.multi_reduction <add>, %192, %cst_87 [1] : vector<8x32xf32> to vector<8xf32>
    %194 = vector.shape_cast %193 : vector<8xf32> to vector<8x1xf32>
    %cst_88 = arith.constant 3.200000e+01 : f32
    %195 = vector.broadcast %cst_88 : f32 to vector<8x1xf32>
    %196 = arith.divf %194, %195 : vector<8x1xf32>
    %197 = vector.broadcast %189 : vector<8x1xf32> to vector<8x32xf32>
    %198 = arith.subf %183, %197 : vector<8x32xf32>
    %cst_89 = arith.constant 9.99999996E-13 : f32
    %199 = vector.broadcast %cst_89 : f32 to vector<8x1xf32>
    %200 = arith.addf %196, %199 : vector<8x1xf32>
    %201 = math.rsqrt %200 : vector<8x1xf32>
    %202 = vector.broadcast %201 : vector<8x1xf32> to vector<8x32xf32>
    %203 = arith.mulf %198, %202 : vector<8x32xf32>
    %204 = vector.broadcast %184 : vector<1x32xf32> to vector<8x32xf32>
    %205 = arith.mulf %203, %204 : vector<8x32xf32>
    %206 = vector.broadcast %185 : vector<1x32xf32> to vector<8x32xf32>
    %207 = arith.addf %205, %206 : vector<8x32xf32>
    %c1_90 = arith.constant 1 : index
    %c0_91 = arith.constant 0 : index
    %c0_92 = arith.constant 0 : index
    %208 = vector.load %arg5[%c1_90, %c0_91, %c0_92] : memref<2x32x96xf32, #tpu.memory_space<vmem>>, vector<1x32x96xf32>
    %209 = vector.shape_cast %208 : vector<1x32x96xf32> to vector<32x96xf32>
    %cst_93 = arith.constant dense<0.000000e+00> : vector<8x96xf32>
    %210 = tpu.matmul %207, %209, %cst_93 {dimension_numbers = #tpu.dot_dimension_numbers<[1], [0], [0], [1], [0, 0, 1, 1], [], []>} : vector<8x32xf32>, vector<32x96xf32>, vector<8x96xf32> -> vector<8x96xf32>
    %c1_94 = arith.constant 1 : index
    %c0_95 = arith.constant 0 : index
    %c0_96 = arith.constant 0 : index
    %211 = vector.load %arg6[%c1_94, %c0_95, %c0_96] : memref<2x1x96xf32, #tpu.memory_space<vmem>>, vector<1x1x96xf32>
    %212 = vector.shape_cast %211 : vector<1x1x96xf32> to vector<1x96xf32>
    %213 = vector.broadcast %212 : vector<1x96xf32> to vector<8x96xf32>
    %214 = arith.addf %210, %213 : vector<8x96xf32>
    %c0_97 = arith.constant 0 : index
    %c0_98 = arith.constant 0 : index
    %215 = vector.load %arg18[%c0_97, %c0_98] : memref<8x96xf32, #tpu.memory_space<vmem>>, vector<8x96xf32>
    tpu.vector_store %arg18[%c0_97, %c0_98], %214 {strides = array<i32>} : memref<8x96xf32, #tpu.memory_space<vmem>>, vector<8x96xf32>,
    %c1_99 = arith.constant 1 : index
    %c0_100 = arith.constant 0 : index
    %c0_101 = arith.constant 0 : index
    %216 = vector.load %arg7[%c1_99, %c0_100, %c0_101] : memref<2x32x32xf32, #tpu.memory_space<vmem>>, vector<1x32x32xf32>
    %217 = vector.shape_cast %216 : vector<1x32x32xf32> to vector<32x32xf32>
    %cst_102 = arith.constant 0.000000e+00 : f32
    %218 = vector.broadcast %cst_102 : f32 to vector<8x32xf32>
    %c0_103 = arith.constant 0 : index
    %c0_104 = arith.constant 0 : index
    %219 = vector.load %arg18[%c0_103, %c0_104] : memref<8x96xf32, #tpu.memory_space<vmem>>, vector<8x8xf32>
    %c0_105 = arith.constant 0 : index
    %c32_106 = arith.constant 32 : index
    %220 = vector.load %arg18[%c0_105, %c32_106] : memref<8x96xf32, #tpu.memory_space<vmem>>, vector<8x8xf32>
    %c0_107 = arith.constant 0 : index
    %c64_108 = arith.constant 64 : index
    %221 = vector.load %arg18[%c0_107, %c64_108] : memref<8x96xf32, #tpu.memory_space<vmem>>, vector<8x8xf32>
    %cst_109 = arith.constant dense<0.000000e+00> : vector<8x8xf32>
    %222 = tpu.matmul %219, %220, %cst_109 {dimension_numbers = #tpu.dot_dimension_numbers<[1], [1], [0], [0], [0, 0, 1, 0], [], []>} : vector<8x8xf32>, vector<8x8xf32>, vector<8x8xf32> -> vector<8x8xf32>
    %cst_110 = arith.constant 0.353553385 : f32
    %223 = vector.broadcast %cst_110 : f32 to vector<8x8xf32>
    %224 = arith.mulf %222, %223 : vector<8x8xf32>
    %225 = vector.broadcast %1 : vector<1x8xf32> to vector<8x8xf32>
    %226 = arith.addf %224, %225 : vector<8x8xf32>
    %cst_111 = arith.constant dense<0xFF800000> : vector<8xf32>
    %227 = vector.multi_reduction <maximumf>, %226, %cst_111 [1] : vector<8x8xf32> to vector<8xf32>
    %228 = vector.shape_cast %227 : vector<8xf32> to vector<8x1xf32>
    %229 = vector.broadcast %228 : vector<8x1xf32> to vector<8x8xf32>
    %230 = arith.subf %226, %229 : vector<8x8xf32>
    %231 = math.exp %230 : vector<8x8xf32>
    %cst_112 = arith.constant dense<0.000000e+00> : vector<8xf32>
    %232 = vector.multi_reduction <add>, %231, %cst_112 [1] : vector<8x8xf32> to vector<8xf32>
    %233 = vector.shape_cast %232 : vector<8xf32> to vector<8x1xf32>
    %234 = tpu.reciprocal %233 {approx = true} : vector<8x1xf32> -> vector<8x1xf32>
    %235 = vector.broadcast %234 : vector<8x1xf32> to vector<8x8xf32>
    %236 = arith.mulf %231, %235 : vector<8x8xf32>
    %cst_113 = arith.constant dense<0.000000e+00> : vector<8x8xf32>
    %237 = tpu.matmul %236, %221, %cst_113 {dimension_numbers = #tpu.dot_dimension_numbers<[1], [0], [0], [1], [0, 0, 1, 1], [], []>} : vector<8x8xf32>, vector<8x8xf32>, vector<8x8xf32> -> vector<8x8xf32>
    %238 = vector.extract_strided_slice %217 {offsets = [0, 0], sizes = [8, 32], strides = [1, 1]} : vector<32x32xf32> to vector<8x32xf32>
    %cst_114 = arith.constant dense<0.000000e+00> : vector<8x32xf32>
    %239 = tpu.matmul %237, %238, %cst_114 {dimension_numbers = #tpu.dot_dimension_numbers<[1], [0], [0], [1], [0, 0, 1, 1], [], []>} : vector<8x8xf32>, vector<8x32xf32>, vector<8x32xf32> -> vector<8x32xf32>
    %240 = arith.addf %218, %239 : vector<8x32xf32>
    %c0_115 = arith.constant 0 : index
    %c8_116 = arith.constant 8 : index
    %241 = vector.load %arg18[%c0_115, %c8_116] : memref<8x96xf32, #tpu.memory_space<vmem>>, vector<8x8xf32>
    %c0_117 = arith.constant 0 : index
    %c40_118 = arith.constant 40 : index
    %242 = vector.load %arg18[%c0_117, %c40_118] : memref<8x96xf32, #tpu.memory_space<vmem>>, vector<8x8xf32>
    %c0_119 = arith.constant 0 : index
    %c72_120 = arith.constant 72 : index
    %243 = vector.load %arg18[%c0_119, %c72_120] : memref<8x96xf32, #tpu.memory_space<vmem>>, vector<8x8xf32>
    %cst_121 = arith.constant dense<0.000000e+00> : vector<8x8xf32>
    %244 = tpu.matmul %241, %242, %cst_121 {dimension_numbers = #tpu.dot_dimension_numbers<[1], [1], [0], [0], [0, 0, 1, 0], [], []>} : vector<8x8xf32>, vector<8x8xf32>, vector<8x8xf32> -> vector<8x8xf32>
    %cst_122 = arith.constant 0.353553385 : f32
    %245 = vector.broadcast %cst_122 : f32 to vector<8x8xf32>
    %246 = arith.mulf %244, %245 : vector<8x8xf32>
    %247 = vector.broadcast %1 : vector<1x8xf32> to vector<8x8xf32>
    %248 = arith.addf %246, %247 : vector<8x8xf32>
    %cst_123 = arith.constant dense<0xFF800000> : vector<8xf32>
    %249 = vector.multi_reduction <maximumf>, %248, %cst_123 [1] : vector<8x8xf32> to vector<8xf32>
    %250 = vector.shape_cast %249 : vector<8xf32> to vector<8x1xf32>
    %251 = vector.broadcast %250 : vector<8x1xf32> to vector<8x8xf32>
    %252 = arith.subf %248, %251 : vector<8x8xf32>
    %253 = math.exp %252 : vector<8x8xf32>
    %cst_124 = arith.constant dense<0.000000e+00> : vector<8xf32>
    %254 = vector.multi_reduction <add>, %253, %cst_124 [1] : vector<8x8xf32> to vector<8xf32>
    %255 = vector.shape_cast %254 : vector<8xf32> to vector<8x1xf32>
    %256 = tpu.reciprocal %255 {approx = true} : vector<8x1xf32> -> vector<8x1xf32>
    %257 = vector.broadcast %256 : vector<8x1xf32> to vector<8x8xf32>
    %258 = arith.mulf %253, %257 : vector<8x8xf32>
    %cst_125 = arith.constant dense<0.000000e+00> : vector<8x8xf32>
    %259 = tpu.matmul %258, %243, %cst_125 {dimension_numbers = #tpu.dot_dimension_numbers<[1], [0], [0], [1], [0, 0, 1, 1], [], []>} : vector<8x8xf32>, vector<8x8xf32>, vector<8x8xf32> -> vector<8x8xf32>
    %260 = vector.extract_strided_slice %217 {offsets = [8, 0], sizes = [8, 32], strides = [1, 1]} : vector<32x32xf32> to vector<8x32xf32>
    %cst_126 = arith.constant dense<0.000000e+00> : vector<8x32xf32>
    %261 = tpu.matmul %259, %260, %cst_126 {dimension_numbers = #tpu.dot_dimension_numbers<[1], [0], [0], [1], [0, 0, 1, 1], [], []>} : vector<8x8xf32>, vector<8x32xf32>, vector<8x32xf32> -> vector<8x32xf32>
    %262 = arith.addf %240, %261 : vector<8x32xf32>
    %c0_127 = arith.constant 0 : index
    %c16_128 = arith.constant 16 : index
    %263 = vector.load %arg18[%c0_127, %c16_128] : memref<8x96xf32, #tpu.memory_space<vmem>>, vector<8x8xf32>
    %c0_129 = arith.constant 0 : index
    %c48_130 = arith.constant 48 : index
    %264 = vector.load %arg18[%c0_129, %c48_130] : memref<8x96xf32, #tpu.memory_space<vmem>>, vector<8x8xf32>
    %c0_131 = arith.constant 0 : index
    %c80_132 = arith.constant 80 : index
    %265 = vector.load %arg18[%c0_131, %c80_132] : memref<8x96xf32, #tpu.memory_space<vmem>>, vector<8x8xf32>
    %cst_133 = arith.constant dense<0.000000e+00> : vector<8x8xf32>
    %266 = tpu.matmul %263, %264, %cst_133 {dimension_numbers = #tpu.dot_dimension_numbers<[1], [1], [0], [0], [0, 0, 1, 0], [], []>} : vector<8x8xf32>, vector<8x8xf32>, vector<8x8xf32> -> vector<8x8xf32>
    %cst_134 = arith.constant 0.353553385 : f32
    %267 = vector.broadcast %cst_134 : f32 to vector<8x8xf32>
    %268 = arith.mulf %266, %267 : vector<8x8xf32>
    %269 = vector.broadcast %1 : vector<1x8xf32> to vector<8x8xf32>
    %270 = arith.addf %268, %269 : vector<8x8xf32>
    %cst_135 = arith.constant dense<0xFF800000> : vector<8xf32>
    %271 = vector.multi_reduction <maximumf>, %270, %cst_135 [1] : vector<8x8xf32> to vector<8xf32>
    %272 = vector.shape_cast %271 : vector<8xf32> to vector<8x1xf32>
    %273 = vector.broadcast %272 : vector<8x1xf32> to vector<8x8xf32>
    %274 = arith.subf %270, %273 : vector<8x8xf32>
    %275 = math.exp %274 : vector<8x8xf32>
    %cst_136 = arith.constant dense<0.000000e+00> : vector<8xf32>
    %276 = vector.multi_reduction <add>, %275, %cst_136 [1] : vector<8x8xf32> to vector<8xf32>
    %277 = vector.shape_cast %276 : vector<8xf32> to vector<8x1xf32>
    %278 = tpu.reciprocal %277 {approx = true} : vector<8x1xf32> -> vector<8x1xf32>
    %279 = vector.broadcast %278 : vector<8x1xf32> to vector<8x8xf32>
    %280 = arith.mulf %275, %279 : vector<8x8xf32>
    %cst_137 = arith.constant dense<0.000000e+00> : vector<8x8xf32>
    %281 = tpu.matmul %280, %265, %cst_137 {dimension_numbers = #tpu.dot_dimension_numbers<[1], [0], [0], [1], [0, 0, 1, 1], [], []>} : vector<8x8xf32>, vector<8x8xf32>, vector<8x8xf32> -> vector<8x8xf32>
    %282 = vector.extract_strided_slice %217 {offsets = [16, 0], sizes = [8, 32], strides = [1, 1]} : vector<32x32xf32> to vector<8x32xf32>
    %cst_138 = arith.constant dense<0.000000e+00> : vector<8x32xf32>
    %283 = tpu.matmul %281, %282, %cst_138 {dimension_numbers = #tpu.dot_dimension_numbers<[1], [0], [0], [1], [0, 0, 1, 1], [], []>} : vector<8x8xf32>, vector<8x32xf32>, vector<8x32xf32> -> vector<8x32xf32>
    %284 = arith.addf %262, %283 : vector<8x32xf32>
    %c0_139 = arith.constant 0 : index
    %c24_140 = arith.constant 24 : index
    %285 = vector.load %arg18[%c0_139, %c24_140] : memref<8x96xf32, #tpu.memory_space<vmem>>, vector<8x8xf32>
    %c0_141 = arith.constant 0 : index
    %c56_142 = arith.constant 56 : index
    %286 = vector.load %arg18[%c0_141, %c56_142] : memref<8x96xf32, #tpu.memory_space<vmem>>, vector<8x8xf32>
    %c0_143 = arith.constant 0 : index
    %c88_144 = arith.constant 88 : index
    %287 = vector.load %arg18[%c0_143, %c88_144] : memref<8x96xf32, #tpu.memory_space<vmem>>, vector<8x8xf32>
    %cst_145 = arith.constant dense<0.000000e+00> : vector<8x8xf32>
    %288 = tpu.matmul %285, %286, %cst_145 {dimension_numbers = #tpu.dot_dimension_numbers<[1], [1], [0], [0], [0, 0, 1, 0], [], []>} : vector<8x8xf32>, vector<8x8xf32>, vector<8x8xf32> -> vector<8x8xf32>
    %cst_146 = arith.constant 0.353553385 : f32
    %289 = vector.broadcast %cst_146 : f32 to vector<8x8xf32>
    %290 = arith.mulf %288, %289 : vector<8x8xf32>
    %291 = vector.broadcast %1 : vector<1x8xf32> to vector<8x8xf32>
    %292 = arith.addf %290, %291 : vector<8x8xf32>
    %cst_147 = arith.constant dense<0xFF800000> : vector<8xf32>
    %293 = vector.multi_reduction <maximumf>, %292, %cst_147 [1] : vector<8x8xf32> to vector<8xf32>
    %294 = vector.shape_cast %293 : vector<8xf32> to vector<8x1xf32>
    %295 = vector.broadcast %294 : vector<8x1xf32> to vector<8x8xf32>
    %296 = arith.subf %292, %295 : vector<8x8xf32>
    %297 = math.exp %296 : vector<8x8xf32>
    %cst_148 = arith.constant dense<0.000000e+00> : vector<8xf32>
    %298 = vector.multi_reduction <add>, %297, %cst_148 [1] : vector<8x8xf32> to vector<8xf32>
    %299 = vector.shape_cast %298 : vector<8xf32> to vector<8x1xf32>
    %300 = tpu.reciprocal %299 {approx = true} : vector<8x1xf32> -> vector<8x1xf32>
    %301 = vector.broadcast %300 : vector<8x1xf32> to vector<8x8xf32>
    %302 = arith.mulf %297, %301 : vector<8x8xf32>
    %cst_149 = arith.constant dense<0.000000e+00> : vector<8x8xf32>
    %303 = tpu.matmul %302, %287, %cst_149 {dimension_numbers = #tpu.dot_dimension_numbers<[1], [0], [0], [1], [0, 0, 1, 1], [], []>} : vector<8x8xf32>, vector<8x8xf32>, vector<8x8xf32> -> vector<8x8xf32>
    %304 = vector.extract_strided_slice %217 {offsets = [24, 0], sizes = [8, 32], strides = [1, 1]} : vector<32x32xf32> to vector<8x32xf32>
    %cst_150 = arith.constant dense<0.000000e+00> : vector<8x32xf32>
    %305 = tpu.matmul %303, %304, %cst_150 {dimension_numbers = #tpu.dot_dimension_numbers<[1], [0], [0], [1], [0, 0, 1, 1], [], []>} : vector<8x8xf32>, vector<8x32xf32>, vector<8x32xf32> -> vector<8x32xf32>
    %306 = arith.addf %284, %305 : vector<8x32xf32>
    %c1_151 = arith.constant 1 : index
    %c0_152 = arith.constant 0 : index
    %c0_153 = arith.constant 0 : index
    %307 = vector.load %arg11[%c1_151, %c0_152, %c0_153] : memref<2x6x32xf32, #tpu.memory_space<vmem>>, vector<1x6x32xf32>
    %308 = vector.shape_cast %307 : vector<1x6x32xf32> to vector<6x32xf32>
    %309 = vector.extract_strided_slice %308 {offsets = [0, 0], sizes = [1, 32], strides = [1, 1]} : vector<6x32xf32> to vector<1x32xf32>
    %310 = vector.broadcast %309 : vector<1x32xf32> to vector<8x32xf32>
    %311 = arith.addf %306, %310 : vector<8x32xf32>
    %312 = arith.addf %207, %311 : vector<8x32xf32>
    %313 = vector.extract_strided_slice %308 {offsets = [1, 0], sizes = [1, 32], strides = [1, 1]} : vector<6x32xf32> to vector<1x32xf32>
    %314 = vector.extract_strided_slice %308 {offsets = [2, 0], sizes = [1, 32], strides = [1, 1]} : vector<6x32xf32> to vector<1x32xf32>
    %cst_154 = arith.constant dense<0.000000e+00> : vector<8xf32>
    %315 = vector.multi_reduction <add>, %312, %cst_154 [1] : vector<8x32xf32> to vector<8xf32>
    %316 = vector.shape_cast %315 : vector<8xf32> to vector<8x1xf32>
    %cst_155 = arith.constant 3.200000e+01 : f32
    %317 = vector.broadcast %cst_155 : f32 to vector<8x1xf32>
    %318 = arith.divf %316, %317 : vector<8x1xf32>
    %319 = vector.broadcast %318 : vector<8x1xf32> to vector<8x32xf32>
    %320 = arith.subf %312, %319 : vector<8x32xf32>
    %321 = arith.mulf %320, %320 : vector<8x32xf32>
    %cst_156 = arith.constant dense<0.000000e+00> : vector<8xf32>
    %322 = vector.multi_reduction <add>, %321, %cst_156 [1] : vector<8x32xf32> to vector<8xf32>
    %323 = vector.shape_cast %322 : vector<8xf32> to vector<8x1xf32>
    %cst_157 = arith.constant 3.200000e+01 : f32
    %324 = vector.broadcast %cst_157 : f32 to vector<8x1xf32>
    %325 = arith.divf %323, %324 : vector<8x1xf32>
    %326 = vector.broadcast %318 : vector<8x1xf32> to vector<8x32xf32>
    %327 = arith.subf %312, %326 : vector<8x32xf32>
    %cst_158 = arith.constant 9.99999996E-13 : f32
    %328 = vector.broadcast %cst_158 : f32 to vector<8x1xf32>
    %329 = arith.addf %325, %328 : vector<8x1xf32>
    %330 = math.rsqrt %329 : vector<8x1xf32>
    %331 = vector.broadcast %330 : vector<8x1xf32> to vector<8x32xf32>
    %332 = arith.mulf %327, %331 : vector<8x32xf32>
    %333 = vector.broadcast %313 : vector<1x32xf32> to vector<8x32xf32>
    %334 = arith.mulf %332, %333 : vector<8x32xf32>
    %335 = vector.broadcast %314 : vector<1x32xf32> to vector<8x32xf32>
    %336 = arith.addf %334, %335 : vector<8x32xf32>
    %c1_159 = arith.constant 1 : index
    %c0_160 = arith.constant 0 : index
    %c0_161 = arith.constant 0 : index
    %337 = vector.load %arg8[%c1_159, %c0_160, %c0_161] : memref<2x32x128xf32, #tpu.memory_space<vmem>>, vector<1x32x128xf32>
    %338 = vector.shape_cast %337 : vector<1x32x128xf32> to vector<32x128xf32>
    %cst_162 = arith.constant dense<0.000000e+00> : vector<8x128xf32>
    %339 = tpu.matmul %336, %338, %cst_162 {dimension_numbers = #tpu.dot_dimension_numbers<[1], [0], [0], [1], [0, 0, 1, 1], [], []>} : vector<8x32xf32>, vector<32x128xf32>, vector<8x128xf32> -> vector<8x128xf32>
    %c1_163 = arith.constant 1 : index
    %c0_164 = arith.constant 0 : index
    %c0_165 = arith.constant 0 : index
    %340 = vector.load %arg9[%c1_163, %c0_164, %c0_165] : memref<2x1x128xf32, #tpu.memory_space<vmem>>, vector<1x1x128xf32>
    %341 = vector.shape_cast %340 : vector<1x1x128xf32> to vector<1x128xf32>
    %342 = vector.broadcast %341 : vector<1x128xf32> to vector<8x128xf32>
    %343 = arith.addf %339, %342 : vector<8x128xf32>
    %cst_166 = arith.constant 5.000000e-01 : f32
    %344 = vector.broadcast %cst_166 : f32 to vector<8x128xf32>
    %345 = arith.mulf %344, %343 : vector<8x128xf32>
    %cst_167 = arith.constant 4.471500e-02 : f32
    %346 = vector.broadcast %cst_167 : f32 to vector<8x128xf32>
    %347 = arith.mulf %346, %343 : vector<8x128xf32>
    %348 = arith.mulf %347, %343 : vector<8x128xf32>
    %349 = arith.mulf %348, %343 : vector<8x128xf32>
    %350 = arith.addf %343, %349 : vector<8x128xf32>
    %cst_168 = arith.constant 0.797884583 : f32
    %351 = vector.broadcast %cst_168 : f32 to vector<8x128xf32>
    %352 = arith.mulf %351, %350 : vector<8x128xf32>
    %353 = math.tanh %352 : vector<8x128xf32>
    %cst_169 = arith.constant 1.000000e+00 : f32
    %354 = vector.broadcast %cst_169 : f32 to vector<8x128xf32>
    %355 = arith.addf %354, %353 : vector<8x128xf32>
    %356 = arith.mulf %345, %355 : vector<8x128xf32>
    %c1_170 = arith.constant 1 : index
    %c0_171 = arith.constant 0 : index
    %c0_172 = arith.constant 0 : index
    %357 = vector.load %arg10[%c1_170, %c0_171, %c0_172] : memref<2x128x32xf32, #tpu.memory_space<vmem>>, vector<1x128x32xf32>
    %358 = vector.shape_cast %357 : vector<1x128x32xf32> to vector<128x32xf32>
    %cst_173 = arith.constant dense<0.000000e+00> : vector<8x32xf32>
    %359 = tpu.matmul %356, %358, %cst_173 {dimension_numbers = #tpu.dot_dimension_numbers<[1], [0], [0], [1], [0, 0, 1, 1], [], []>} : vector<8x128xf32>, vector<128x32xf32>, vector<8x32xf32> -> vector<8x32xf32>
    %360 = vector.extract_strided_slice %308 {offsets = [3, 0], sizes = [1, 32], strides = [1, 1]} : vector<6x32xf32> to vector<1x32xf32>
    %361 = vector.broadcast %360 : vector<1x32xf32> to vector<8x32xf32>
    %362 = arith.addf %359, %361 : vector<8x32xf32>
    %363 = arith.addf %336, %362 : vector<8x32xf32>
    %364 = vector.extract_strided_slice %308 {offsets = [4, 0], sizes = [1, 32], strides = [1, 1]} : vector<6x32xf32> to vector<1x32xf32>
    %365 = vector.extract_strided_slice %308 {offsets = [5, 0], sizes = [1, 32], strides = [1, 1]} : vector<6x32xf32> to vector<1x32xf32>
    %cst_174 = arith.constant dense<0.000000e+00> : vector<8xf32>
    %366 = vector.multi_reduction <add>, %363, %cst_174 [1] : vector<8x32xf32> to vector<8xf32>
    %367 = vector.shape_cast %366 : vector<8xf32> to vector<8x1xf32>
    %cst_175 = arith.constant 3.200000e+01 : f32
    %368 = vector.broadcast %cst_175 : f32 to vector<8x1xf32>
    %369 = arith.divf %367, %368 : vector<8x1xf32>
    %370 = vector.broadcast %369 : vector<8x1xf32> to vector<8x32xf32>
    %371 = arith.subf %363, %370 : vector<8x32xf32>
    %372 = arith.mulf %371, %371 : vector<8x32xf32>
    %cst_176 = arith.constant dense<0.000000e+00> : vector<8xf32>
    %373 = vector.multi_reduction <add>, %372, %cst_176 [1] : vector<8x32xf32> to vector<8xf32>
    %374 = vector.shape_cast %373 : vector<8xf32> to vector<8x1xf32>
    %cst_177 = arith.constant 3.200000e+01 : f32
    %375 = vector.broadcast %cst_177 : f32 to vector<8x1xf32>
    %376 = arith.divf %374, %375 : vector<8x1xf32>
    %377 = vector.broadcast %369 : vector<8x1xf32> to vector<8x32xf32>
    %378 = arith.subf %363, %377 : vector<8x32xf32>
    %cst_178 = arith.constant 9.99999996E-13 : f32
    %379 = vector.broadcast %cst_178 : f32 to vector<8x1xf32>
    %380 = arith.addf %376, %379 : vector<8x1xf32>
    %381 = math.rsqrt %380 : vector<8x1xf32>
    %382 = vector.broadcast %381 : vector<8x1xf32> to vector<8x32xf32>
    %383 = arith.mulf %378, %382 : vector<8x32xf32>
    %384 = vector.broadcast %364 : vector<1x32xf32> to vector<8x32xf32>
    %385 = arith.mulf %383, %384 : vector<8x32xf32>
    %386 = vector.broadcast %365 : vector<1x32xf32> to vector<8x32xf32>
    %387 = arith.addf %385, %386 : vector<8x32xf32>
    %c0_179 = arith.constant 0 : index
    %c0_180 = arith.constant 0 : index
    %388 = vector.load %arg12[%c0_179, %c0_180] : memref<32x5xf32, #tpu.memory_space<vmem>>, vector<32x5xf32>
    %cst_181 = arith.constant dense<0.000000e+00> : vector<8x5xf32>
    %389 = tpu.matmul %387, %388, %cst_181 {dimension_numbers = #tpu.dot_dimension_numbers<[1], [0], [0], [1], [0, 0, 1, 1], [], []>} : vector<8x32xf32>, vector<32x5xf32>, vector<8x5xf32> -> vector<8x5xf32>
    %c0_182 = arith.constant 0 : index
    %c0_183 = arith.constant 0 : index
    %390 = vector.load %arg13[%c0_182, %c0_183] : memref<1x5xf32, #tpu.memory_space<vmem>>, vector<1x5xf32>
    %391 = vector.broadcast %390 : vector<1x5xf32> to vector<8x5xf32>
    %392 = arith.addf %389, %391 : vector<8x5xf32>
    %c0_184 = arith.constant 0 : index
    %c0_185 = arith.constant 0 : index
    %393 = vector.load %arg14[%c0_184, %c0_185] : memref<5x5xf32, #tpu.memory_space<vmem>>, vector<5x5xf32>
    %394 = tpu.iota {dimensions = array<i32: 0>} : vector<5x5xi32>
    %395 = tpu.iota {dimensions = array<i32: 1>} : vector<5x5xi32>
    %396 = tpu.iota {dimensions = array<i32: 1>} : vector<1x5xi32>
    %397 = tpu.iota {dimensions = array<i32: 1>} : vector<1x8xi32>
    %c0_186 = arith.constant 0 : index
    %c0_187 = arith.constant 0 : index
    %398 = vector.load %arg15[%c0_186, %c0_187] : memref<1x5xf32, #tpu.memory_space<vmem>>, vector<1x5xf32>
    %399 = vector.extract_strided_slice %392 {offsets = [0, 0], sizes = [1, 5], strides = [1, 1]} : vector<8x5xf32> to vector<1x5xf32>
    %400 = arith.addf %398, %399 : vector<1x5xf32>
    %401 = arith.index_cast %arg0 : i32 to index
    %c1_188 = arith.constant 1 : index
    %402 = memref.load %arg1[%401, %c1_188] : memref<2x8xi32, #tpu.memory_space<smem>>
    %c0_i32 = arith.constant 0 : i32
    %403 = arith.cmpi sgt, %402, %c0_i32 : i32
    %404 = arith.cmpi eq, %394, %395 : vector<5x5xi32>
    %405 = vector.shape_cast %400 : vector<1x5xf32> to vector<1x5xf32>
    %406 = vector.broadcast %405 : vector<1x5xf32> to vector<5x5xf32>
    %cst_189 = arith.constant 0.000000e+00 : f32
    %407 = vector.broadcast %cst_189 : f32 to vector<5x5xf32>
    %408 = arith.select %404, %406, %407 : vector<5x5xi1>, vector<5x5xf32>
    %cst_190 = arith.constant dense<0.000000e+00> : vector<5xf32>
    %409 = vector.multi_reduction <add>, %408, %cst_190 [1] : vector<5x5xf32> to vector<5xf32>
    %410 = vector.shape_cast %409 : vector<5xf32> to vector<5x1xf32>
    %411 = vector.broadcast %410 : vector<5x1xf32> to vector<5x5xf32>
    %412 = arith.addf %411, %393 : vector<5x5xf32>
    %413 = vector.extract_strided_slice %392 {offsets = [1, 0], sizes = [1, 5], strides = [1, 1]} : vector<8x5xf32> to vector<1x5xf32>
    %414 = vector.broadcast %413 : vector<1x5xf32> to vector<5x5xf32>
    %415 = arith.addf %412, %414 : vector<5x5xf32>
    %cst_191 = arith.constant dense<0xFF800000> : vector<5xf32>
    %416 = vector.multi_reduction <maximumf>, %415, %cst_191 [0] : vector<5x5xf32> to vector<5xf32>
    %417 = vector.shape_cast %416 : vector<5xf32> to vector<1x5xf32>
    %418 = vector.broadcast %417 : vector<1x5xf32> to vector<5x5xf32>
    %419 = arith.cmpf oge, %415, %418 : vector<5x5xf32>
    %c5_i32 = arith.constant 5 : i32
    %420 = vector.broadcast %c5_i32 : i32 to vector<5x5xi32>
    %421 = arith.select %419, %394, %420 : vector<5x5xi1>, vector<5x5xi32>
    %cst_192 = arith.constant dense<2147483647> : vector<5xi32>
    %422 = vector.multi_reduction <minsi>, %421, %cst_192 [0] : vector<5x5xi32> to vector<5xi32>
    %423 = vector.shape_cast %422 : vector<5xi32> to vector<1x5xi32>
    %424 = arith.select %403, %417, %400 : vector<1x5xf32>
    %425 = arith.select %403, %423, %396 : vector<1x5xi32>
    %c1_193 = arith.constant 1 : index
    %c0_194 = arith.constant 0 : index
    %c0_195 = arith.constant 0 : index
    %426 = vector.load %arg19[%c1_193, %c0_194, %c0_195] : memref<8x1x5xi32, #tpu.memory_space<vmem>>, vector<1x1x5xi32>
    %427 = vector.shape_cast %426 : vector<1x1x5xi32> to vector<1x5xi32>
    %428 = vector.shape_cast %425 : vector<1x5xi32> to vector<1x1x5xi32>
    tpu.vector_store %arg19[%c1_193, %c0_194, %c0_195], %428 {strides = array<i32>} : memref<8x1x5xi32, #tpu.memory_space<vmem>>, vector<1x1x5xi32>,
    %429 = arith.index_cast %arg0 : i32 to index
    %c2 = arith.constant 2 : index
    %430 = memref.load %arg1[%429, %c2] : memref<2x8xi32, #tpu.memory_space<smem>>
    %c0_i32_196 = arith.constant 0 : i32
    %431 = arith.cmpi sgt, %430, %c0_i32_196 : i32
    %432 = arith.cmpi eq, %394, %395 : vector<5x5xi32>
    %433 = vector.shape_cast %424 : vector<1x5xf32> to vector<1x5xf32>
    %434 = vector.broadcast %433 : vector<1x5xf32> to vector<5x5xf32>
    %cst_197 = arith.constant 0.000000e+00 : f32
    %435 = vector.broadcast %cst_197 : f32 to vector<5x5xf32>
    %436 = arith.select %432, %434, %435 : vector<5x5xi1>, vector<5x5xf32>
    %cst_198 = arith.constant dense<0.000000e+00> : vector<5xf32>
    %437 = vector.multi_reduction <add>, %436, %cst_198 [1] : vector<5x5xf32> to vector<5xf32>
    %438 = vector.shape_cast %437 : vector<5xf32> to vector<5x1xf32>
    %439 = vector.broadcast %438 : vector<5x1xf32> to vector<5x5xf32>
    %440 = arith.addf %439, %393 : vector<5x5xf32>
    %441 = vector.extract_strided_slice %392 {offsets = [2, 0], sizes = [1, 5], strides = [1, 1]} : vector<8x5xf32> to vector<1x5xf32>
    %442 = vector.broadcast %441 : vector<1x5xf32> to vector<5x5xf32>
    %443 = arith.addf %440, %442 : vector<5x5xf32>
    %cst_199 = arith.constant dense<0xFF800000> : vector<5xf32>
    %444 = vector.multi_reduction <maximumf>, %443, %cst_199 [0] : vector<5x5xf32> to vector<5xf32>
    %445 = vector.shape_cast %444 : vector<5xf32> to vector<1x5xf32>
    %446 = vector.broadcast %445 : vector<1x5xf32> to vector<5x5xf32>
    %447 = arith.cmpf oge, %443, %446 : vector<5x5xf32>
    %c5_i32_200 = arith.constant 5 : i32
    %448 = vector.broadcast %c5_i32_200 : i32 to vector<5x5xi32>
    %449 = arith.select %447, %394, %448 : vector<5x5xi1>, vector<5x5xi32>
    %cst_201 = arith.constant dense<2147483647> : vector<5xi32>
    %450 = vector.multi_reduction <minsi>, %449, %cst_201 [0] : vector<5x5xi32> to vector<5xi32>
    %451 = vector.shape_cast %450 : vector<5xi32> to vector<1x5xi32>
    %452 = arith.select %431, %445, %424 : vector<1x5xf32>
    %453 = arith.select %431, %451, %396 : vector<1x5xi32>
    %c2_202 = arith.constant 2 : index
    %c0_203 = arith.constant 0 : index
    %c0_204 = arith.constant 0 : index
    %454 = vector.load %arg19[%c2_202, %c0_203, %c0_204] : memref<8x1x5xi32, #tpu.memory_space<vmem>>, vector<1x1x5xi32>
    %455 = vector.shape_cast %454 : vector<1x1x5xi32> to vector<1x5xi32>
    %456 = vector.shape_cast %453 : vector<1x5xi32> to vector<1x1x5xi32>
    tpu.vector_store %arg19[%c2_202, %c0_203, %c0_204], %456 {strides = array<i32>} : memref<8x1x5xi32, #tpu.memory_space<vmem>>, vector<1x1x5xi32>,
    %457 = arith.index_cast %arg0 : i32 to index
    %c3 = arith.constant 3 : index
    %458 = memref.load %arg1[%457, %c3] : memref<2x8xi32, #tpu.memory_space<smem>>
    %c0_i32_205 = arith.constant 0 : i32
    %459 = arith.cmpi sgt, %458, %c0_i32_205 : i32
    %460 = arith.cmpi eq, %394, %395 : vector<5x5xi32>
    %461 = vector.shape_cast %452 : vector<1x5xf32> to vector<1x5xf32>
    %462 = vector.broadcast %461 : vector<1x5xf32> to vector<5x5xf32>
    %cst_206 = arith.constant 0.000000e+00 : f32
    %463 = vector.broadcast %cst_206 : f32 to vector<5x5xf32>
    %464 = arith.select %460, %462, %463 : vector<5x5xi1>, vector<5x5xf32>
    %cst_207 = arith.constant dense<0.000000e+00> : vector<5xf32>
    %465 = vector.multi_reduction <add>, %464, %cst_207 [1] : vector<5x5xf32> to vector<5xf32>
    %466 = vector.shape_cast %465 : vector<5xf32> to vector<5x1xf32>
    %467 = vector.broadcast %466 : vector<5x1xf32> to vector<5x5xf32>
    %468 = arith.addf %467, %393 : vector<5x5xf32>
    %469 = vector.extract_strided_slice %392 {offsets = [3, 0], sizes = [1, 5], strides = [1, 1]} : vector<8x5xf32> to vector<1x5xf32>
    %470 = vector.broadcast %469 : vector<1x5xf32> to vector<5x5xf32>
    %471 = arith.addf %468, %470 : vector<5x5xf32>
    %cst_208 = arith.constant dense<0xFF800000> : vector<5xf32>
    %472 = vector.multi_reduction <maximumf>, %471, %cst_208 [0] : vector<5x5xf32> to vector<5xf32>
    %473 = vector.shape_cast %472 : vector<5xf32> to vector<1x5xf32>
    %474 = vector.broadcast %473 : vector<1x5xf32> to vector<5x5xf32>
    %475 = arith.cmpf oge, %471, %474 : vector<5x5xf32>
    %c5_i32_209 = arith.constant 5 : i32
    %476 = vector.broadcast %c5_i32_209 : i32 to vector<5x5xi32>
    %477 = arith.select %475, %394, %476 : vector<5x5xi1>, vector<5x5xi32>
    %cst_210 = arith.constant dense<2147483647> : vector<5xi32>
    %478 = vector.multi_reduction <minsi>, %477, %cst_210 [0] : vector<5x5xi32> to vector<5xi32>
    %479 = vector.shape_cast %478 : vector<5xi32> to vector<1x5xi32>
    %480 = arith.select %459, %473, %452 : vector<1x5xf32>
    %481 = arith.select %459, %479, %396 : vector<1x5xi32>
    %c3_211 = arith.constant 3 : index
    %c0_212 = arith.constant 0 : index
    %c0_213 = arith.constant 0 : index
    %482 = vector.load %arg19[%c3_211, %c0_212, %c0_213] : memref<8x1x5xi32, #tpu.memory_space<vmem>>, vector<1x1x5xi32>
    %483 = vector.shape_cast %482 : vector<1x1x5xi32> to vector<1x5xi32>
    %484 = vector.shape_cast %481 : vector<1x5xi32> to vector<1x1x5xi32>
    tpu.vector_store %arg19[%c3_211, %c0_212, %c0_213], %484 {strides = array<i32>} : memref<8x1x5xi32, #tpu.memory_space<vmem>>, vector<1x1x5xi32>,
    %485 = arith.index_cast %arg0 : i32 to index
    %c4 = arith.constant 4 : index
    %486 = memref.load %arg1[%485, %c4] : memref<2x8xi32, #tpu.memory_space<smem>>
    %c0_i32_214 = arith.constant 0 : i32
    %487 = arith.cmpi sgt, %486, %c0_i32_214 : i32
    %488 = arith.cmpi eq, %394, %395 : vector<5x5xi32>
    %489 = vector.shape_cast %480 : vector<1x5xf32> to vector<1x5xf32>
    %490 = vector.broadcast %489 : vector<1x5xf32> to vector<5x5xf32>
    %cst_215 = arith.constant 0.000000e+00 : f32
    %491 = vector.broadcast %cst_215 : f32 to vector<5x5xf32>
    %492 = arith.select %488, %490, %491 : vector<5x5xi1>, vector<5x5xf32>
    %cst_216 = arith.constant dense<0.000000e+00> : vector<5xf32>
    %493 = vector.multi_reduction <add>, %492, %cst_216 [1] : vector<5x5xf32> to vector<5xf32>
    %494 = vector.shape_cast %493 : vector<5xf32> to vector<5x1xf32>
    %495 = vector.broadcast %494 : vector<5x1xf32> to vector<5x5xf32>
    %496 = arith.addf %495, %393 : vector<5x5xf32>
    %497 = vector.extract_strided_slice %392 {offsets = [4, 0], sizes = [1, 5], strides = [1, 1]} : vector<8x5xf32> to vector<1x5xf32>
    %498 = vector.broadcast %497 : vector<1x5xf32> to vector<5x5xf32>
    %499 = arith.addf %496, %498 : vector<5x5xf32>
    %cst_217 = arith.constant dense<0xFF800000> : vector<5xf32>
    %500 = vector.multi_reduction <maximumf>, %499, %cst_217 [0] : vector<5x5xf32> to vector<5xf32>
    %501 = vector.shape_cast %500 : vector<5xf32> to vector<1x5xf32>
    %502 = vector.broadcast %501 : vector<1x5xf32> to vector<5x5xf32>
    %503 = arith.cmpf oge, %499, %502 : vector<5x5xf32>
    %c5_i32_218 = arith.constant 5 : i32
    %504 = vector.broadcast %c5_i32_218 : i32 to vector<5x5xi32>
    %505 = arith.select %503, %394, %504 : vector<5x5xi1>, vector<5x5xi32>
    %cst_219 = arith.constant dense<2147483647> : vector<5xi32>
    %506 = vector.multi_reduction <minsi>, %505, %cst_219 [0] : vector<5x5xi32> to vector<5xi32>
    %507 = vector.shape_cast %506 : vector<5xi32> to vector<1x5xi32>
    %508 = arith.select %487, %501, %480 : vector<1x5xf32>
    %509 = arith.select %487, %507, %396 : vector<1x5xi32>
    %c4_220 = arith.constant 4 : index
    %c0_221 = arith.constant 0 : index
    %c0_222 = arith.constant 0 : index
    %510 = vector.load %arg19[%c4_220, %c0_221, %c0_222] : memref<8x1x5xi32, #tpu.memory_space<vmem>>, vector<1x1x5xi32>
    %511 = vector.shape_cast %510 : vector<1x1x5xi32> to vector<1x5xi32>
    %512 = vector.shape_cast %509 : vector<1x5xi32> to vector<1x1x5xi32>
    tpu.vector_store %arg19[%c4_220, %c0_221, %c0_222], %512 {strides = array<i32>} : memref<8x1x5xi32, #tpu.memory_space<vmem>>, vector<1x1x5xi32>,
    %513 = arith.index_cast %arg0 : i32 to index
    %c5 = arith.constant 5 : index
    %514 = memref.load %arg1[%513, %c5] : memref<2x8xi32, #tpu.memory_space<smem>>
    %c0_i32_223 = arith.constant 0 : i32
    %515 = arith.cmpi sgt, %514, %c0_i32_223 : i32
    %516 = arith.cmpi eq, %394, %395 : vector<5x5xi32>
    %517 = vector.shape_cast %508 : vector<1x5xf32> to vector<1x5xf32>
    %518 = vector.broadcast %517 : vector<1x5xf32> to vector<5x5xf32>
    %cst_224 = arith.constant 0.000000e+00 : f32
    %519 = vector.broadcast %cst_224 : f32 to vector<5x5xf32>
    %520 = arith.select %516, %518, %519 : vector<5x5xi1>, vector<5x5xf32>
    %cst_225 = arith.constant dense<0.000000e+00> : vector<5xf32>
    %521 = vector.multi_reduction <add>, %520, %cst_225 [1] : vector<5x5xf32> to vector<5xf32>
    %522 = vector.shape_cast %521 : vector<5xf32> to vector<5x1xf32>
    %523 = vector.broadcast %522 : vector<5x1xf32> to vector<5x5xf32>
    %524 = arith.addf %523, %393 : vector<5x5xf32>
    %525 = vector.extract_strided_slice %392 {offsets = [5, 0], sizes = [1, 5], strides = [1, 1]} : vector<8x5xf32> to vector<1x5xf32>
    %526 = vector.broadcast %525 : vector<1x5xf32> to vector<5x5xf32>
    %527 = arith.addf %524, %526 : vector<5x5xf32>
    %cst_226 = arith.constant dense<0xFF800000> : vector<5xf32>
    %528 = vector.multi_reduction <maximumf>, %527, %cst_226 [0] : vector<5x5xf32> to vector<5xf32>
    %529 = vector.shape_cast %528 : vector<5xf32> to vector<1x5xf32>
    %530 = vector.broadcast %529 : vector<1x5xf32> to vector<5x5xf32>
    %531 = arith.cmpf oge, %527, %530 : vector<5x5xf32>
    %c5_i32_227 = arith.constant 5 : i32
    %532 = vector.broadcast %c5_i32_227 : i32 to vector<5x5xi32>
    %533 = arith.select %531, %394, %532 : vector<5x5xi1>, vector<5x5xi32>
    %cst_228 = arith.constant dense<2147483647> : vector<5xi32>
    %534 = vector.multi_reduction <minsi>, %533, %cst_228 [0] : vector<5x5xi32> to vector<5xi32>
    %535 = vector.shape_cast %534 : vector<5xi32> to vector<1x5xi32>
    %536 = arith.select %515, %529, %508 : vector<1x5xf32>
    %537 = arith.select %515, %535, %396 : vector<1x5xi32>
    %c5_229 = arith.constant 5 : index
    %c0_230 = arith.constant 0 : index
    %c0_231 = arith.constant 0 : index
    %538 = vector.load %arg19[%c5_229, %c0_230, %c0_231] : memref<8x1x5xi32, #tpu.memory_space<vmem>>, vector<1x1x5xi32>
    %539 = vector.shape_cast %538 : vector<1x1x5xi32> to vector<1x5xi32>
    %540 = vector.shape_cast %537 : vector<1x5xi32> to vector<1x1x5xi32>
    tpu.vector_store %arg19[%c5_229, %c0_230, %c0_231], %540 {strides = array<i32>} : memref<8x1x5xi32, #tpu.memory_space<vmem>>, vector<1x1x5xi32>,
    %541 = arith.index_cast %arg0 : i32 to index
    %c6 = arith.constant 6 : index
    %542 = memref.load %arg1[%541, %c6] : memref<2x8xi32, #tpu.memory_space<smem>>
    %c0_i32_232 = arith.constant 0 : i32
    %543 = arith.cmpi sgt, %542, %c0_i32_232 : i32
    %544 = arith.cmpi eq, %394, %395 : vector<5x5xi32>
    %545 = vector.shape_cast %536 : vector<1x5xf32> to vector<1x5xf32>
    %546 = vector.broadcast %545 : vector<1x5xf32> to vector<5x5xf32>
    %cst_233 = arith.constant 0.000000e+00 : f32
    %547 = vector.broadcast %cst_233 : f32 to vector<5x5xf32>
    %548 = arith.select %544, %546, %547 : vector<5x5xi1>, vector<5x5xf32>
    %cst_234 = arith.constant dense<0.000000e+00> : vector<5xf32>
    %549 = vector.multi_reduction <add>, %548, %cst_234 [1] : vector<5x5xf32> to vector<5xf32>
    %550 = vector.shape_cast %549 : vector<5xf32> to vector<5x1xf32>
    %551 = vector.broadcast %550 : vector<5x1xf32> to vector<5x5xf32>
    %552 = arith.addf %551, %393 : vector<5x5xf32>
    %553 = vector.extract_strided_slice %392 {offsets = [6, 0], sizes = [1, 5], strides = [1, 1]} : vector<8x5xf32> to vector<1x5xf32>
    %554 = vector.broadcast %553 : vector<1x5xf32> to vector<5x5xf32>
    %555 = arith.addf %552, %554 : vector<5x5xf32>
    %cst_235 = arith.constant dense<0xFF800000> : vector<5xf32>
    %556 = vector.multi_reduction <maximumf>, %555, %cst_235 [0] : vector<5x5xf32> to vector<5xf32>
    %557 = vector.shape_cast %556 : vector<5xf32> to vector<1x5xf32>
    %558 = vector.broadcast %557 : vector<1x5xf32> to vector<5x5xf32>
    %559 = arith.cmpf oge, %555, %558 : vector<5x5xf32>
    %c5_i32_236 = arith.constant 5 : i32
    %560 = vector.broadcast %c5_i32_236 : i32 to vector<5x5xi32>
    %561 = arith.select %559, %394, %560 : vector<5x5xi1>, vector<5x5xi32>
    %cst_237 = arith.constant dense<2147483647> : vector<5xi32>
    %562 = vector.multi_reduction <minsi>, %561, %cst_237 [0] : vector<5x5xi32> to vector<5xi32>
    %563 = vector.shape_cast %562 : vector<5xi32> to vector<1x5xi32>
    %564 = arith.select %543, %557, %536 : vector<1x5xf32>
    %565 = arith.select %543, %563, %396 : vector<1x5xi32>
    %c6_238 = arith.constant 6 : index
    %c0_239 = arith.constant 0 : index
    %c0_240 = arith.constant 0 : index
    %566 = vector.load %arg19[%c6_238, %c0_239, %c0_240] : memref<8x1x5xi32, #tpu.memory_space<vmem>>, vector<1x1x5xi32>
    %567 = vector.shape_cast %566 : vector<1x1x5xi32> to vector<1x5xi32>
    %568 = vector.shape_cast %565 : vector<1x5xi32> to vector<1x1x5xi32>
    tpu.vector_store %arg19[%c6_238, %c0_239, %c0_240], %568 {strides = array<i32>} : memref<8x1x5xi32, #tpu.memory_space<vmem>>, vector<1x1x5xi32>,
    %569 = arith.index_cast %arg0 : i32 to index
    %c7 = arith.constant 7 : index
    %570 = memref.load %arg1[%569, %c7] : memref<2x8xi32, #tpu.memory_space<smem>>
    %c0_i32_241 = arith.constant 0 : i32
    %571 = arith.cmpi sgt, %570, %c0_i32_241 : i32
    %572 = arith.cmpi eq, %394, %395 : vector<5x5xi32>
    %573 = vector.shape_cast %564 : vector<1x5xf32> to vector<1x5xf32>
    %574 = vector.broadcast %573 : vector<1x5xf32> to vector<5x5xf32>
    %cst_242 = arith.constant 0.000000e+00 : f32
    %575 = vector.broadcast %cst_242 : f32 to vector<5x5xf32>
    %576 = arith.select %572, %574, %575 : vector<5x5xi1>, vector<5x5xf32>
    %cst_243 = arith.constant dense<0.000000e+00> : vector<5xf32>
    %577 = vector.multi_reduction <add>, %576, %cst_243 [1] : vector<5x5xf32> to vector<5xf32>
    %578 = vector.shape_cast %577 : vector<5xf32> to vector<5x1xf32>
    %579 = vector.broadcast %578 : vector<5x1xf32> to vector<5x5xf32>
    %580 = arith.addf %579, %393 : vector<5x5xf32>
    %581 = vector.extract_strided_slice %392 {offsets = [7, 0], sizes = [1, 5], strides = [1, 1]} : vector<8x5xf32> to vector<1x5xf32>
    %582 = vector.broadcast %581 : vector<1x5xf32> to vector<5x5xf32>
    %583 = arith.addf %580, %582 : vector<5x5xf32>
    %cst_244 = arith.constant dense<0xFF800000> : vector<5xf32>
    %584 = vector.multi_reduction <maximumf>, %583, %cst_244 [0] : vector<5x5xf32> to vector<5xf32>
    %585 = vector.shape_cast %584 : vector<5xf32> to vector<1x5xf32>
    %586 = vector.broadcast %585 : vector<1x5xf32> to vector<5x5xf32>
    %587 = arith.cmpf oge, %583, %586 : vector<5x5xf32>
    %c5_i32_245 = arith.constant 5 : i32
    %588 = vector.broadcast %c5_i32_245 : i32 to vector<5x5xi32>
    %589 = arith.select %587, %394, %588 : vector<5x5xi1>, vector<5x5xi32>
    %cst_246 = arith.constant dense<2147483647> : vector<5xi32>
    %590 = vector.multi_reduction <minsi>, %589, %cst_246 [0] : vector<5x5xi32> to vector<5xi32>
    %591 = vector.shape_cast %590 : vector<5xi32> to vector<1x5xi32>
    %592 = arith.select %571, %585, %564 : vector<1x5xf32>
    %593 = arith.select %571, %591, %396 : vector<1x5xi32>
    %c7_247 = arith.constant 7 : index
    %c0_248 = arith.constant 0 : index
    %c0_249 = arith.constant 0 : index
    %594 = vector.load %arg19[%c7_247, %c0_248, %c0_249] : memref<8x1x5xi32, #tpu.memory_space<vmem>>, vector<1x1x5xi32>
    %595 = vector.shape_cast %594 : vector<1x1x5xi32> to vector<1x5xi32>
    %596 = vector.shape_cast %593 : vector<1x5xi32> to vector<1x1x5xi32>
    tpu.vector_store %arg19[%c7_247, %c0_248, %c0_249], %596 {strides = array<i32>} : memref<8x1x5xi32, #tpu.memory_space<vmem>>, vector<1x1x5xi32>,
    %c0_250 = arith.constant 0 : index
    %c0_251 = arith.constant 0 : index
    %597 = vector.load %arg16[%c0_250, %c0_251] : memref<1x5xf32, #tpu.memory_space<vmem>>, vector<1x5xf32>
    %598 = arith.addf %592, %597 : vector<1x5xf32>
    %cst_252 = arith.constant dense<0xFF800000> : vector<1xf32>
    %599 = vector.multi_reduction <maximumf>, %598, %cst_252 [1] : vector<1x5xf32> to vector<1xf32>
    %600 = vector.shape_cast %599 : vector<1xf32> to vector<1x1xf32>
    %601 = vector.broadcast %600 : vector<1x1xf32> to vector<1x5xf32>
    %602 = arith.cmpf oge, %598, %601 : vector<1x5xf32>
    %c5_i32_253 = arith.constant 5 : i32
    %603 = vector.broadcast %c5_i32_253 : i32 to vector<1x5xi32>
    %604 = arith.select %602, %396, %603 : vector<1x5xi1>, vector<1x5xi32>
    %cst_254 = arith.constant dense<2147483647> : vector<1xi32>
    %605 = vector.multi_reduction <minsi>, %604, %cst_254 [1] : vector<1x5xi32> to vector<1xi32>
    %606 = vector.shape_cast %605 : vector<1xi32> to vector<1x1xi32>
    %607 = vector.broadcast %606 : vector<1x1xi32> to vector<1x5xi32>
    %608 = arith.cmpi eq, %396, %607 : vector<1x5xi32>
    %c7_255 = arith.constant 7 : index
    %c0_256 = arith.constant 0 : index
    %c0_257 = arith.constant 0 : index
    %609 = vector.load %arg19[%c7_255, %c0_256, %c0_257] : memref<8x1x5xi32, #tpu.memory_space<vmem>>, vector<1x1x5xi32>
    %610 = vector.shape_cast %609 : vector<1x1x5xi32> to vector<1x5xi32>
    %c0_i32_258 = arith.constant 0 : i32
    %611 = vector.broadcast %c0_i32_258 : i32 to vector<1x5xi32>
    %612 = arith.select %608, %610, %611 : vector<1x5xi1>, vector<1x5xi32>
    %cst_259 = arith.constant dense<0> : vector<1xi32>
    %613 = vector.multi_reduction <add>, %612, %cst_259 [1] : vector<1x5xi32> to vector<1xi32>
    %614 = vector.shape_cast %613 : vector<1xi32> to vector<1x1xi32>
    %615 = vector.broadcast %614 : vector<1x1xi32> to vector<1x5xi32>
    %616 = arith.cmpi eq, %396, %615 : vector<1x5xi32>
    %c6_260 = arith.constant 6 : index
    %c0_261 = arith.constant 0 : index
    %c0_262 = arith.constant 0 : index
    %617 = vector.load %arg19[%c6_260, %c0_261, %c0_262] : memref<8x1x5xi32, #tpu.memory_space<vmem>>, vector<1x1x5xi32>
    %618 = vector.shape_cast %617 : vector<1x1x5xi32> to vector<1x5xi32>
    %c0_i32_263 = arith.constant 0 : i32
    %619 = vector.broadcast %c0_i32_263 : i32 to vector<1x5xi32>
    %620 = arith.select %616, %618, %619 : vector<1x5xi1>, vector<1x5xi32>
    %cst_264 = arith.constant dense<0> : vector<1xi32>
    %621 = vector.multi_reduction <add>, %620, %cst_264 [1] : vector<1x5xi32> to vector<1xi32>
    %622 = vector.shape_cast %621 : vector<1xi32> to vector<1x1xi32>
    %623 = vector.broadcast %622 : vector<1x1xi32> to vector<1x5xi32>
    %624 = arith.cmpi eq, %396, %623 : vector<1x5xi32>
    %c5_265 = arith.constant 5 : index
    %c0_266 = arith.constant 0 : index
    %c0_267 = arith.constant 0 : index
    %625 = vector.load %arg19[%c5_265, %c0_266, %c0_267] : memref<8x1x5xi32, #tpu.memory_space<vmem>>, vector<1x1x5xi32>
    %626 = vector.shape_cast %625 : vector<1x1x5xi32> to vector<1x5xi32>
    %c0_i32_268 = arith.constant 0 : i32
    %627 = vector.broadcast %c0_i32_268 : i32 to vector<1x5xi32>
    %628 = arith.select %624, %626, %627 : vector<1x5xi1>, vector<1x5xi32>
    %cst_269 = arith.constant dense<0> : vector<1xi32>
    %629 = vector.multi_reduction <add>, %628, %cst_269 [1] : vector<1x5xi32> to vector<1xi32>
    %630 = vector.shape_cast %629 : vector<1xi32> to vector<1x1xi32>
    %631 = vector.broadcast %630 : vector<1x1xi32> to vector<1x5xi32>
    %632 = arith.cmpi eq, %396, %631 : vector<1x5xi32>
    %c4_270 = arith.constant 4 : index
    %c0_271 = arith.constant 0 : index
    %c0_272 = arith.constant 0 : index
    %633 = vector.load %arg19[%c4_270, %c0_271, %c0_272] : memref<8x1x5xi32, #tpu.memory_space<vmem>>, vector<1x1x5xi32>
    %634 = vector.shape_cast %633 : vector<1x1x5xi32> to vector<1x5xi32>
    %c0_i32_273 = arith.constant 0 : i32
    %635 = vector.broadcast %c0_i32_273 : i32 to vector<1x5xi32>
    %636 = arith.select %632, %634, %635 : vector<1x5xi1>, vector<1x5xi32>
    %cst_274 = arith.constant dense<0> : vector<1xi32>
    %637 = vector.multi_reduction <add>, %636, %cst_274 [1] : vector<1x5xi32> to vector<1xi32>
    %638 = vector.shape_cast %637 : vector<1xi32> to vector<1x1xi32>
    %639 = vector.broadcast %638 : vector<1x1xi32> to vector<1x5xi32>
    %640 = arith.cmpi eq, %396, %639 : vector<1x5xi32>
    %c3_275 = arith.constant 3 : index
    %c0_276 = arith.constant 0 : index
    %c0_277 = arith.constant 0 : index
    %641 = vector.load %arg19[%c3_275, %c0_276, %c0_277] : memref<8x1x5xi32, #tpu.memory_space<vmem>>, vector<1x1x5xi32>
    %642 = vector.shape_cast %641 : vector<1x1x5xi32> to vector<1x5xi32>
    %c0_i32_278 = arith.constant 0 : i32
    %643 = vector.broadcast %c0_i32_278 : i32 to vector<1x5xi32>
    %644 = arith.select %640, %642, %643 : vector<1x5xi1>, vector<1x5xi32>
    %cst_279 = arith.constant dense<0> : vector<1xi32>
    %645 = vector.multi_reduction <add>, %644, %cst_279 [1] : vector<1x5xi32> to vector<1xi32>
    %646 = vector.shape_cast %645 : vector<1xi32> to vector<1x1xi32>
    %647 = vector.broadcast %646 : vector<1x1xi32> to vector<1x5xi32>
    %648 = arith.cmpi eq, %396, %647 : vector<1x5xi32>
    %c2_280 = arith.constant 2 : index
    %c0_281 = arith.constant 0 : index
    %c0_282 = arith.constant 0 : index
    %649 = vector.load %arg19[%c2_280, %c0_281, %c0_282] : memref<8x1x5xi32, #tpu.memory_space<vmem>>, vector<1x1x5xi32>
    %650 = vector.shape_cast %649 : vector<1x1x5xi32> to vector<1x5xi32>
    %c0_i32_283 = arith.constant 0 : i32
    %651 = vector.broadcast %c0_i32_283 : i32 to vector<1x5xi32>
    %652 = arith.select %648, %650, %651 : vector<1x5xi1>, vector<1x5xi32>
    %cst_284 = arith.constant dense<0> : vector<1xi32>
    %653 = vector.multi_reduction <add>, %652, %cst_284 [1] : vector<1x5xi32> to vector<1xi32>
    %654 = vector.shape_cast %653 : vector<1xi32> to vector<1x1xi32>
    %655 = vector.broadcast %654 : vector<1x1xi32> to vector<1x5xi32>
    %656 = arith.cmpi eq, %396, %655 : vector<1x5xi32>
    %c1_285 = arith.constant 1 : index
    %c0_286 = arith.constant 0 : index
    %c0_287 = arith.constant 0 : index
    %657 = vector.load %arg19[%c1_285, %c0_286, %c0_287] : memref<8x1x5xi32, #tpu.memory_space<vmem>>, vector<1x1x5xi32>
    %658 = vector.shape_cast %657 : vector<1x1x5xi32> to vector<1x5xi32>
    %c0_i32_288 = arith.constant 0 : i32
    %659 = vector.broadcast %c0_i32_288 : i32 to vector<1x5xi32>
    %660 = arith.select %656, %658, %659 : vector<1x5xi1>, vector<1x5xi32>
    %cst_289 = arith.constant dense<0> : vector<1xi32>
    %661 = vector.multi_reduction <add>, %660, %cst_289 [1] : vector<1x5xi32> to vector<1xi32>
    %662 = vector.shape_cast %661 : vector<1xi32> to vector<1x1xi32>
    %c0_i32_290 = arith.constant 0 : i32
    %663 = vector.broadcast %c0_i32_290 : i32 to vector<1x8xi32>
    %c0_i32_291 = arith.constant 0 : i32
    %664 = vector.broadcast %c0_i32_291 : i32 to vector<1x8xi32>
    %665 = arith.cmpi eq, %397, %664 : vector<1x8xi32>
    %c0_i32_292 = arith.constant 0 : i32
    %666 = vector.shape_cast %662 : vector<1x1xi32> to vector<1x1xi32>
    %667 = vector.broadcast %666 : vector<1x1xi32> to vector<1x8xi32>
    %668 = vector.broadcast %c0_i32_292 : i32 to vector<1x8xi32>
    %669 = arith.select %665, %667, %668 : vector<1x8xi1>, vector<1x8xi32>
    %670 = arith.addi %663, %669 : vector<1x8xi32>
    %c1_i32 = arith.constant 1 : i32
    %671 = vector.broadcast %c1_i32 : i32 to vector<1x8xi32>
    %672 = arith.cmpi eq, %397, %671 : vector<1x8xi32>
    %c0_i32_293 = arith.constant 0 : i32
    %673 = vector.shape_cast %654 : vector<1x1xi32> to vector<1x1xi32>
    %674 = vector.broadcast %673 : vector<1x1xi32> to vector<1x8xi32>
    %675 = vector.broadcast %c0_i32_293 : i32 to vector<1x8xi32>
    %676 = arith.select %672, %674, %675 : vector<1x8xi1>, vector<1x8xi32>
    %677 = arith.addi %670, %676 : vector<1x8xi32>
    %c2_i32 = arith.constant 2 : i32
    %678 = vector.broadcast %c2_i32 : i32 to vector<1x8xi32>
    %679 = arith.cmpi eq, %397, %678 : vector<1x8xi32>
    %c0_i32_294 = arith.constant 0 : i32
    %680 = vector.shape_cast %646 : vector<1x1xi32> to vector<1x1xi32>
    %681 = vector.broadcast %680 : vector<1x1xi32> to vector<1x8xi32>
    %682 = vector.broadcast %c0_i32_294 : i32 to vector<1x8xi32>
    %683 = arith.select %679, %681, %682 : vector<1x8xi1>, vector<1x8xi32>
    %684 = arith.addi %677, %683 : vector<1x8xi32>
    %c3_i32 = arith.constant 3 : i32
    %685 = vector.broadcast %c3_i32 : i32 to vector<1x8xi32>
    %686 = arith.cmpi eq, %397, %685 : vector<1x8xi32>
    %c0_i32_295 = arith.constant 0 : i32
    %687 = vector.shape_cast %638 : vector<1x1xi32> to vector<1x1xi32>
    %688 = vector.broadcast %687 : vector<1x1xi32> to vector<1x8xi32>
    %689 = vector.broadcast %c0_i32_295 : i32 to vector<1x8xi32>
    %690 = arith.select %686, %688, %689 : vector<1x8xi1>, vector<1x8xi32>
    %691 = arith.addi %684, %690 : vector<1x8xi32>
    %c4_i32 = arith.constant 4 : i32
    %692 = vector.broadcast %c4_i32 : i32 to vector<1x8xi32>
    %693 = arith.cmpi eq, %397, %692 : vector<1x8xi32>
    %c0_i32_296 = arith.constant 0 : i32
    %694 = vector.shape_cast %630 : vector<1x1xi32> to vector<1x1xi32>
    %695 = vector.broadcast %694 : vector<1x1xi32> to vector<1x8xi32>
    %696 = vector.broadcast %c0_i32_296 : i32 to vector<1x8xi32>
    %697 = arith.select %693, %695, %696 : vector<1x8xi1>, vector<1x8xi32>
    %698 = arith.addi %691, %697 : vector<1x8xi32>
    %c5_i32_297 = arith.constant 5 : i32
    %699 = vector.broadcast %c5_i32_297 : i32 to vector<1x8xi32>
    %700 = arith.cmpi eq, %397, %699 : vector<1x8xi32>
    %c0_i32_298 = arith.constant 0 : i32
    %701 = vector.shape_cast %622 : vector<1x1xi32> to vector<1x1xi32>
    %702 = vector.broadcast %701 : vector<1x1xi32> to vector<1x8xi32>
    %703 = vector.broadcast %c0_i32_298 : i32 to vector<1x8xi32>
    %704 = arith.select %700, %702, %703 : vector<1x8xi1>, vector<1x8xi32>
    %705 = arith.addi %698, %704 : vector<1x8xi32>
    %c6_i32 = arith.constant 6 : i32
    %706 = vector.broadcast %c6_i32 : i32 to vector<1x8xi32>
    %707 = arith.cmpi eq, %397, %706 : vector<1x8xi32>
    %c0_i32_299 = arith.constant 0 : i32
    %708 = vector.shape_cast %614 : vector<1x1xi32> to vector<1x1xi32>
    %709 = vector.broadcast %708 : vector<1x1xi32> to vector<1x8xi32>
    %710 = vector.broadcast %c0_i32_299 : i32 to vector<1x8xi32>
    %711 = arith.select %707, %709, %710 : vector<1x8xi1>, vector<1x8xi32>
    %712 = arith.addi %705, %711 : vector<1x8xi32>
    %c7_i32 = arith.constant 7 : i32
    %713 = vector.broadcast %c7_i32 : i32 to vector<1x8xi32>
    %714 = arith.cmpi eq, %397, %713 : vector<1x8xi32>
    %c0_i32_300 = arith.constant 0 : i32
    %715 = vector.shape_cast %606 : vector<1x1xi32> to vector<1x1xi32>
    %716 = vector.broadcast %715 : vector<1x1xi32> to vector<1x8xi32>
    %717 = vector.broadcast %c0_i32_300 : i32 to vector<1x8xi32>
    %718 = arith.select %714, %716, %717 : vector<1x8xi1>, vector<1x8xi32>
    %719 = arith.addi %712, %718 : vector<1x8xi32>
    %cst_301 = arith.constant -5.000000e+08 : f32
    %720 = vector.broadcast %cst_301 : f32 to vector<1x8xf32>
    %721 = arith.cmpf ogt, %1, %720 : vector<1x8xf32>
    %c-1_i32 = arith.constant -1 : i32
    %722 = vector.broadcast %c-1_i32 : i32 to vector<1x8xi32>
    %723 = arith.select %721, %719, %722 : vector<1x8xi1>, vector<1x8xi32>
    %c0_302 = arith.constant 0 : index
    %c0_303 = arith.constant 0 : index
    %c0_304 = arith.constant 0 : index
    %724 = vector.load %arg17[%c0_302, %c0_303, %c0_304] : memref<1x1x8xi32, #tpu.memory_space<vmem>>, vector<1x1x8xi32>
    %725 = vector.shape_cast %724 : vector<1x1x8xi32> to vector<1x8xi32>
    %726 = vector.shape_cast %723 : vector<1x8xi32> to vector<1x1x8xi32>
    tpu.vector_store %arg17[%c0_302, %c0_303, %c0_304], %726 {strides = array<i32>} : memref<1x1x8xi32, #tpu.memory_space<vmem>>, vector<1x1x8xi32>,
    return
  }
  func.func @transform_0(%arg0: i32, %arg1: memref<2x8xi32, #tpu.memory_space<smem>>) -> (i32, i32, i32) {
    %c0_i32 = arith.constant 0 : i32
    %c0_i32_0 = arith.constant 0 : i32
    %c0_i32_1 = arith.constant 0 : i32
    return %arg0, %c0_i32, %c0_i32_0 : i32, i32, i32
  }
  func.func @transform_1(%arg0: i32, %arg1: memref<2x8xi32, #tpu.memory_space<smem>>) -> (i32, i32, i32) {
    %c0_i32 = arith.constant 0 : i32
    %c0_i32_0 = arith.constant 0 : i32
    %c0_i32_1 = arith.constant 0 : i32
    return %arg0, %c0_i32, %c0_i32_0 : i32, i32, i32
  }
  func.func @transform_2(%arg0: i32, %arg1: memref<2x8xi32, #tpu.memory_space<smem>>) -> (i32, i32) {
    %c0_i32 = arith.constant 0 : i32
    %c0_i32_0 = arith.constant 0 : i32
    %c0_i32_1 = arith.constant 0 : i32
    return %c0_i32, %c0_i32_0 : i32, i32
  }
  func.func @transform_3(%arg0: i32, %arg1: memref<2x8xi32, #tpu.memory_space<smem>>) -> (i32, i32, i32) {
    %c0_i32 = arith.constant 0 : i32
    %c0_i32_0 = arith.constant 0 : i32
    %c0_i32_1 = arith.constant 0 : i32
    %c0_i32_2 = arith.constant 0 : i32
    return %c0_i32, %c0_i32_0, %c0_i32_1 : i32, i32, i32
  }
  func.func @transform_4(%arg0: i32, %arg1: memref<2x8xi32, #tpu.memory_space<smem>>) -> (i32, i32, i32) {
    %c0_i32 = arith.constant 0 : i32
    %c0_i32_0 = arith.constant 0 : i32
    %c0_i32_1 = arith.constant 0 : i32
    %c0_i32_2 = arith.constant 0 : i32
    return %c0_i32, %c0_i32_0, %c0_i32_1 : i32, i32, i32
  }
  func.func @transform_5(%arg0: i32, %arg1: memref<2x8xi32, #tpu.memory_space<smem>>) -> (i32, i32, i32) {
    %c0_i32 = arith.constant 0 : i32
    %c0_i32_0 = arith.constant 0 : i32
    %c0_i32_1 = arith.constant 0 : i32
    %c0_i32_2 = arith.constant 0 : i32
    return %c0_i32, %c0_i32_0, %c0_i32_1 : i32, i32, i32
  }
  func.func @transform_6(%arg0: i32, %arg1: memref<2x8xi32, #tpu.memory_space<smem>>) -> (i32, i32, i32) {
    %c0_i32 = arith.constant 0 : i32
    %c0_i32_0 = arith.constant 0 : i32
    %c0_i32_1 = arith.constant 0 : i32
    %c0_i32_2 = arith.constant 0 : i32
    return %c0_i32, %c0_i32_0, %c0_i32_1 : i32, i32, i32
  }
  func.func @transform_7(%arg0: i32, %arg1: memref<2x8xi32, #tpu.memory_space<smem>>) -> (i32, i32, i32) {
    %c0_i32 = arith.constant 0 : i32
    %c0_i32_0 = arith.constant 0 : i32
    %c0_i32_1 = arith.constant 0 : i32
    %c0_i32_2 = arith.constant 0 : i32
    return %c0_i32, %c0_i32_0, %c0_i32_1 : i32, i32, i32
  }
  func.func @transform_8(%arg0: i32, %arg1: memref<2x8xi32, #tpu.memory_space<smem>>) -> (i32, i32, i32) {
    %c0_i32 = arith.constant 0 : i32
    %c0_i32_0 = arith.constant 0 : i32
    %c0_i32_1 = arith.constant 0 : i32
    %c0_i32_2 = arith.constant 0 : i32
    return %c0_i32, %c0_i32_0, %c0_i32_1 : i32, i32, i32
  }
  func.func @transform_9(%arg0: i32, %arg1: memref<2x8xi32, #tpu.memory_space<smem>>) -> (i32, i32, i32) {
    %c0_i32 = arith.constant 0 : i32
    %c0_i32_0 = arith.constant 0 : i32
    %c0_i32_1 = arith.constant 0 : i32
    %c0_i32_2 = arith.constant 0 : i32
    return %c0_i32, %c0_i32_0, %c0_i32_1 : i32, i32, i32
  }
  func.func @transform_10(%arg0: i32, %arg1: memref<2x8xi32, #tpu.memory_space<smem>>) -> (i32, i32) {
    %c0_i32 = arith.constant 0 : i32
    %c0_i32_0 = arith.constant 0 : i32
    %c0_i32_1 = arith.constant 0 : i32
    return %c0_i32, %c0_i32_0 : i32, i32
  }
  func.func @transform_11(%arg0: i32, %arg1: memref<2x8xi32, #tpu.memory_space<smem>>) -> (i32, i32) {
    %c0_i32 = arith.constant 0 : i32
    %c0_i32_0 = arith.constant 0 : i32
    %c0_i32_1 = arith.constant 0 : i32
    return %c0_i32, %c0_i32_0 : i32, i32
  }
  func.func @transform_12(%arg0: i32, %arg1: memref<2x8xi32, #tpu.memory_space<smem>>) -> (i32, i32) {
    %c0_i32 = arith.constant 0 : i32
    %c0_i32_0 = arith.constant 0 : i32
    %c0_i32_1 = arith.constant 0 : i32
    return %c0_i32, %c0_i32_0 : i32, i32
  }
  func.func @transform_13(%arg0: i32, %arg1: memref<2x8xi32, #tpu.memory_space<smem>>) -> (i32, i32) {
    %c0_i32 = arith.constant 0 : i32
    %c0_i32_0 = arith.constant 0 : i32
    %c0_i32_1 = arith.constant 0 : i32
    return %c0_i32, %c0_i32_0 : i32, i32
  }
  func.func @transform_14(%arg0: i32, %arg1: memref<2x8xi32, #tpu.memory_space<smem>>) -> (i32, i32) {
    %c0_i32 = arith.constant 0 : i32
    %c0_i32_0 = arith.constant 0 : i32
    %c0_i32_1 = arith.constant 0 : i32
    return %c0_i32, %c0_i32_0 : i32, i32
  }
  func.func @transform_15(%arg0: i32, %arg1: memref<2x8xi32, #tpu.memory_space<smem>>) -> (i32, i32, i32) {
    %c0_i32 = arith.constant 0 : i32
    %c0_i32_0 = arith.constant 0 : i32
    %c0_i32_1 = arith.constant 0 : i32
    return %arg0, %c0_i32, %c0_i32_0 : i32, i32, i32
  }
}

</mosaic_0001>

<bundles_post_ra>
// kernel: _lambda_.1
= control target key start
LH: loop header
LB: loop body
LE: loop exit
PB: predicated region body
PF: predicated region fallthrough
CT: control target
= control target key end

     0   :  { %s2429_s24 = smov [#allocation5]   ;;  %s3195_s0 = inlined_call_operand.vmem [shape: s32[2,8], index: 0, kind: input, shape index: {}]   ;;  %s3196_s1 = inlined_call_operand.vmem [shape: f32[2,8,32], index: 1, kind: input, shape index: {}]   ;;  %s3197_s2 = inlined_call_operand.vmem [shape: f32[2,1,8], index: 2, kind: input, shape index: {}]   ;;  %s3198_s3 = inlined_call_operand.vmem [shape: f32[2,32], index: 3, kind: input, shape index: {}]   ;;  %s3199_s4 = inlined_call_operand.vmem [shape: f32[2,32,96], index: 4, kind: input, shape index: {}]   ;;  %s3200_s5 = inlined_call_operand.vmem [shape: f32[2,1,96], index: 5, kind: input, shape index: {}]   ;;  %s3201_s6 = inlined_call_operand.vmem [shape: f32[2,32,32], index: 6, kind: input, shape index: {}]   ;;  %s3202_s7 = inlined_call_operand.vmem [shape: f32[2,32,128], index: 7, kind: input, shape index: {}]   ;;  %s3203_s8 = inlined_call_operand.vmem [shape: f32[2,1,128], index: 8, kind: input, shape index: {}]   ;;  %s3204_s9 = inlined_call_operand.vmem [shape: f32[2,128,32], index: 9, kind: input, shape index: {}]   ;;  %s3205_s10 = inlined_call_operand.vmem [shape: f32[2,6,32], index: 10, kind: input, shape index: {}]   ;;  %s3206_s11 = inlined_call_operand.vmem [shape: f32[32,5], index: 11, kind: input, shape index: {}]   ;;  %s3207_s12 = inlined_call_operand.vmem [shape: f32[1,5], index: 12, kind: input, shape index: {}]   ;;  %s3208_s13 = inlined_call_operand.vmem [shape: f32[5,5], index: 13, kind: input, shape index: {}]   ;;  %s3209_s14 = inlined_call_operand.vmem [shape: f32[1,5], index: 14, kind: input, shape index: {}]   ;;  %s3210_s15 = inlined_call_operand.vmem [shape: f32[1,5], index: 15, kind: input, shape index: {}]   ;;  %s3211_s16 = inlined_call_operand.hbm [shape: s32[2,1,8], index: 16, kind: output, shape index: {}]  }
   0x1   :  { %3224 = sst [smem:[#allocation11_spill]] %s3195_s0 }
   0x2   :  { %3225 = sst [smem:[#allocation12_spill]] %s3196_s1 }
   0x3   :  { %3226 = sst [smem:[#allocation13_spill]] %s3197_s2 }
   0x4   :  { %3227 = sst [smem:[#allocation14_spill]] %s3198_s3 }
   0x5   :  { %3228 = sst [smem:[#allocation15_spill]] %s3199_s4 }
   0x6   :  { %3229 = sst [smem:[#allocation16_spill]] %s3203_s8 }
   0x7   :  { %s3230_s23 = sld [smem:[#allocation11_spill]] }
   0xd   :  { %s22_s8 = sshll.u32 %s3230_s23, 4  ;;  %s23_s8 = int_to_ptr.vmem [resolvable:$true] %s22_s8 }
   0xe   :  { %25 = dma.vmem_to_smem %s23_s8, 32, %s2429_s24, [#allocation4] }
   0xf   :  { %2407 = dma.done.wait [#allocation4], 32 }
  0x10   :  { %2408 = vsyncadd [#allocation4], 4294967264 }
  0x11   :  { %28 = sfence }
  0x12   :  { %29 = vsyncpa [#allocation7], 0 }
  0x13   :  { %31 = vsyncpa [#allocation7 + $0x1], 0  ;;  %s2530_s25 = smov 0   ;;  %s2532_s26 = smov 0  }
  0x14   :  { %s2534_s27 = smov 0   ;;  %s2536_s28 = smov 0  }
  0x15 LB: > { %s2551_s8 = sadd.s32 4294967295, %s2427_s28   ;;  %s2167_s29 = sadd.s32 4294967294, %s2427_s28   ;;  %s2427_s28 = sphi %s2536_s28, %s3270_s28   ;;  %s2423_s27 = sphi %s2534_s27, %s3269_s27   ;;  %s2419_s26 = sphi %s2532_s26, %s3268_s26   ;;  %s2415_s25 = sphi %s2530_s25, %s3267_s25  }
  0x16   : > { %s2555_s30 = sadd.s32 1, %s2427_s28   ;;  %s369_s0 = sadd.s32 1, %s2423_s27 }
  0x17   : > { %s366_s17 = ssub.s32 %s2427_s28, %s2555_s30  ;;  %p379_p0 = scmp.ne.s32.totalorder %s2423_s27, %s2419_s26 }
  0x18   : > { %p367_p1 = scmp.eq.s32.totalorder %s366_s17, 0  ;;  %p380_p2 = scmp.eq.s32.totalorder %s2551_s8, 1 }
  0x19   : > { %p385_p3 = scmp.ne.s32.totalorder %s2419_s26, %s2415_s25  ;;  %p386_p4 = scmp.eq.s32.totalorder %s2167_s29, 1 }
  0x1a   : > { %s2566_s18 = scalar_select %p367_p1, %s2423_s27, %s369_s0  }
  0x1b   : > { %p2568_p5 = por %p380_p2, %p379_p0  ;;  %p2572_p6 = por %p386_p4, %p385_p3 }
  0x1c   : > { %3231 = sst [smem:[#allocation10_spill]] %s2566_s18  ;;  %p2170_p7 = scmp.ge.s32.totalorder %s2427_s28, 1 }
  0x1d   : > { %p456_p8 = scmp.lt.s32.totalorder %s2427_s28, 3 }
  0x1f   : > { %p457_p9 = pnand %p2170_p7, %p456_p8 }
  0x20   : > { %p505_p10 = scmp.lt.s32.totalorder (!%p457_p9), %s2551_s8, 1  ;;  %s3234_s1 = sld [smem:[#allocation12_spill]] (!%p457_p9) }
  0x21   : > { %460 = sbr.rel (%p457_p9) target bundleno = 7359 (0x1cbf), region = 80  ;;  %s3235_s4 = sld [smem:[#allocation15_spill]] (!%p457_p9) }
  0x22   : > { %s3236_s3 = sld [smem:[#allocation14_spill]] (!%p457_p9)  ;;  %s3222_s24 = smov (!%p457_p9), 88  }
  0x23   : > { %s3221_s0 = smov (!%p457_p9), 96   ;;  %s3237_s2 = sld [smem:[#allocation13_spill]] (!%p457_p9) }
  0x24   : > { %s3215_s23 = smov (!%p457_p9), 72   ;;  %s3223_s17 = smov (!%p457_p9), 120  }
  0x26   : > { %s2580_s21 = scalar_select %p505_p10, %s2551_s8, 1  ;;  %vm516_vm0 = vcmask 261120   ;;  %v2430_v2 = vmov 32.0   ;;  %v2298_v33 = vld [vmem:[%s3200_s5] ss:$0 sm:$0xff]  ;;  %vm581_vm5 = vcmask 785408  }
  0x27   : > { %2303 = vrcp.f32 %v2430_v2  ;;  %v553_v14 = vld [vmem:[%s3235_s4 + $0x18] sm:$0xff]  ;;  %v552_v15 = vld [vmem:[%s3235_s4 + $0x10] sm:$0xff]  ;;  %v551_v16 = vld [vmem:[%s3235_s4 + $0x8] sm:$0xff]  ;;  %vm591_vm6 = vcmask 64512  }
  0x28   : > { %s2171_s22 = sshll.u32 %s2580_s21, 3  ;;  %573 = vmatpush.msra.mxu0 %v553_v14  ;;  %v550_v17 = vld [vmem:[%s3235_s4] sm:$0xff] }
  0x29   : > { %s508_s29 = scalar_lea.vmem %s3234_s1, %s2171_s22  ;;  %v2296_v27 = vld [vmem:[%s3236_s3] ss:$0 sm:$0xff]  ;;  %v2297_v30 = vld [vmem:[%s3236_s3 + $0x1] ss:$0 sm:$0xff]  ;;  %s2634_s18 = scalar_lea.vmem %s3237_s2, %s2580_s21 }
  0x2a   : > { %v513_v0 = vld [vmem:[%s508_s29] sm:$0xff]  ;;  %574 = vmatpush.msra.mxu0 %v552_v15  ;;  %s3213_s29 = smov 64   ;;  %s3220_s22 = smov 56   ;;  %v584_v15 = vld [vmem:[%s3201_s6 + $0x8] sm:$0xff] }
  0x2b   : > { %v517_v1 = vsel %vm516_vm0, %v513_v0, 0.0  ;;  %v2637_v40 = vld [vmem:[%s2634_s18] ss:$0 sm:$0xff]  ;;  %s3219_s21 = smov 112   ;;  %s3214_s1 = smov 80  }
  0x2c   : > { %518 = vadd.xlane.f32.xlu0 %v517_v1  ;;  %575 = vmatpush.msra.mxu0 %v551_v16  ;;  %v583_v54 = vld [vmem:[%s3201_s6] sm:$0xff]  ;;  %s3241_s2 = smov 96   ;;  %s3242_s3 = smov 56  }
  0x2d   : > { %v2304_v3 = vpop.eup %2303 }
  0x2e   : > { %v521_v4 = vmul.f32 32.0, %v2304_v3  ;;  %vm525_vm1 = vweird.f32 %v2304_v3  ;;  %576 = vmatpush.msra.mxu0 %v550_v17 }
  0x30   : > { %v522_v5 = vsub.f32 1.0, %v521_v4 }
  0x32   : > { %v523_v6 = vmul.f32 %v2304_v3, %v522_v5 }
  0x34   : > { %v524_v7 = vadd.f32 %v2304_v3, %v523_v6 }
  0x36   : > { %v2587_v8 = vsel %vm525_vm1, %v2304_v3, %v524_v7 }
  0x9f   : > { %v519_v9 = vpop.xlane.xlu0 %518 }
  0xa0   : > { %v527_v10 = vmul.f32 %v2587_v8, %v519_v9 }
  0xa2   : > { %v528_v11 = vsub.f32 %v513_v0, %v527_v10 }
  0xa4   : > { %v529_v12 = vmul.f32 %v528_v11, %v528_v11 }
  0xa6   : > { %v530_v13 = vsel %vm516_vm0, %v529_v12, 0.0 }
  0xa7   : > { %531 = vadd.xlane.f32.xlu0 %v530_v13 }
 0x11a   : > { %v532_v18 = vpop.xlane.xlu0 %531 }
 0x11b   : > { %v533_v19 = vmul.f32 %v532_v18, %v2587_v8 }
 0x11d   : > { %v534_v20 = vadd.f32 1e-12, %v533_v19 }
 0x11f   : > { %2305 = vrsqrt.f32 %v534_v20  ;;  %vm541_vm3 = vweird.f32 %v534_v20 }
 0x125   : > { %v2306_v21 = vpop.eup %2305 }
 0x126   : > { %v536_v22 = vmul.f32 %v2306_v21, %v534_v20  ;;  %vm542_vm2 = vweird.f32 %v2306_v21 }
 0x127   : > { %vm543_vm4 = vmor %vm541_vm3, %vm542_vm2 }
 0x128   : > { %v537_v23 = vmul.f32 %v2306_v21, %v536_v22 }
 0x12a   : > { %v538_v24 = vmul.f32 0.5, %v537_v23 }
 0x12c   : > { %v539_v25 = vsub.f32 1.5, %v538_v24 }
 0x12e   : > { %v540_v26 = vmul.f32 %v2306_v21, %v539_v25 }
 0x130   : > { %v544_v28 = vsel %vm543_vm4, %v2306_v21, %v540_v26  ;;  %vm1673_vm4 = vcmask 36864  }
 0x131   : > { %v545_v29 = vmul.f32 %v544_v28, %v528_v11 }
 0x133   : > { %v547_v31 = vmul.f32 %v2296_v27, %v545_v29 }
 0x135   : > { %v2610_v32 = vadd.f32 %v2297_v30, %v547_v31 }
 0x137   : > { %2172 = vmatmul.msk.f32.vlgmr.msra.gmra.mxu0 %vm516_vm0, %v2610_v32 }
 0x1b4   : > { %v578_v34 = vpop.f32.mrf.mxu0 }
 0x1b5   : > { %v579_v35 = vadd.f32 %v2298_v33, %v578_v34 }
 0x1b7   : > { %582 = vst.msk [vmem:[#allocation2] sm:$0xff] %vm581_vm5, %v579_v35 }
 0x1be   : > { %v2618_v36 = vld [vmem:[#allocation2] sm:$0xff] }
 0x1bf   : > { %660 = vrot.lane.b32.xlu0 %v2618_v36, %s3222_s24  ;;  %632 = vrot.lane.b32.xlu2 %v2618_v36, %s3213_s29  ;;  %s3216_s29 = smov 104   ;;  %s3239_s24 = smov 120  }
 0x1c0   : > { %589 = vrot.lane.b32.xlu1 %v2618_v36, %s3221_s0  ;;  %s3240_s0 = smov 88  }
 0x219   : > { %v633_v37 = vpop.permute.xlu2 %632 }
 0x21a   : > { %653 = vmatpush.msra.mxu3 %v633_v37 }
 0x231   : > { %v661_v38 = vpop.permute.xlu0 %660 }
 0x232   : > { %v590_v39 = vpop.permute.xlu1 %589  ;;  %2176 = vmatpush.xpose.msk.msrb.mxu3 %vm591_vm6, %v661_v38 }
 0x233   : > { %2173 = vmatpush.xpose.msk.msra.mxu1 %vm591_vm6, %v590_v39 }
 0x236   : > { %2174 = vmatmul.msk.f32.vlgmr.msra.gmra.mxu1 %vm591_vm6, %v2618_v36 }
 0x237   : > { %743 = vmatpush.msrb.mxu1 %v584_v15 }
 0x2b3   : > { %v613_v41 = vpop.f32.mrf.mxu1 }
 0x2b4   : > { %v616_v42 = vmul.f32 0.35355338, %v613_v41 }
 0x2b6   : > { %v620_v43 = vadd.f32 %v2637_v40, %v616_v42 }
 0x2b8   : > { %v621_v44 = vsel %vm591_vm6, %v620_v43, -inf }
 0x2b9   : > { %622 = vmax.xlane.f32.xlu1 %v621_v44 }
 0x2d2   : > { %699 = vrot.lane.b32.xlu1 %v2618_v36, %s3220_s22  ;;  %s3243_s22 = smov 112  }
 0x2da   : > { %864 = vrot.lane.b32.xlu1 %v2618_v36, %s3215_s23  ;;  %s3218_s23 = smov 40  }
 0x2e2   : > { %771 = vrot.lane.b32.xlu1 %v2618_v36, %s3219_s21  ;;  %s3245_s21 = smov 72  }
 0x32c   : > { %v623_v45 = vpop.xlane.xlu1 %622 }
 0x32d   : > { %v624_v46 = vsub.f32 %v620_v43, %v623_v45  ;;  %v585_v43 = vld [vmem:[%s3201_s6 + $0x10] sm:$0xff] }
 0x32e   : > { %856 = vmatpush.msra.mxu1 %v585_v43 }
 0x32f   : > { %v625_v47 = vmul.f32 1.442695, %v624_v46  ;;  %v2695_v46 = vld [vmem:[%s3205_s10] sm:$0x3f] }
 0x331   : > { %2307 = vpow2.f32 %v625_v47 }
 0x337   : > { %v2308_v48 = vpop.eup %2307 }
 0x338   : > { %v627_v49 = vsel %vm591_vm6, %v2308_v48, 0.0 }
 0x339   : > { %628 = vadd.xlane.f32.xlu2 %v627_v49 }
 0x344   : > { %v700_v50 = vpop.permute.xlu1 %699 }
 0x345   : > { %720 = vmatpush.msrb.mxu0 %v700_v50  ;;  %v954_v50 = vperm.slane %v2695_v46, 0 }
 0x34c   : > { %v865_v56 = vpop.permute.xlu1 %864 }
 0x351   : > { %658 = vrot.lane.b32.xlu2 %v2618_v36, %s3223_s17  ;;  %s3244_s17 = smov 104  }
 0x354   : > { %v772_v10 = vpop.permute.xlu1 %771 }
 0x3ac   : > { %v629_v51 = vpop.xlane.xlu2 %628 }
 0x3ad   : > { %2309 = vrcp.f32 %v629_v51 }
 0x3b3   : > { %v2310_v52 = vpop.eup %2309 }
 0x3b4   : > { %v631_v53 = vmul.f32 %v2310_v52, %v2308_v48  ;;  %v659_v55 = vpop.permute.xlu2 %658 }
 0x3b6   : > { %2175 = vmatmul.msk.f32.vlgmr.msra.gmra.mxu3 %vm591_vm6, %v631_v53 }
 0x3b7   : > { %766 = vmatpush.msra.mxu3 %v583_v54 }
 0x3be   : > { %2177 = vmatmul.msk.f32.vlgmr.msrb.gmra.mxu3 %vm591_vm6, %v659_v55 }
 0x3bf   : > { %2185 = vmatpush.xpose.msk.msrb.mxu3 %vm591_vm6, %v865_v56 }
 0x439   : > { %v655_v57 = vpop.f32.mrf.mxu3 }
 0x43a   : > { %2180 = vmatmul.msk.f32.vlgmr.msra.gmra.mxu3 %vm591_vm6, %v655_v57 }
 0x441   : > { %v683_v58 = vpop.f32.mrf.mxu3 }
 0x442   : > { %v686_v59 = vmul.f32 0.35355338, %v683_v58 }
 0x444   : > { %v687_v60 = vadd.f32 %v2637_v40, %v686_v59 }
 0x446   : > { %v688_v61 = vsel %vm591_vm6, %v687_v60, -inf }
 0x447   : > { %689 = vmax.xlane.f32.xlu0 %v688_v61  ;;  %v986_v61 = vld [vmem:[%s3202_s7 + $0x18] sm:$0xff] }
 0x45b   : > { %862 = vrot.lane.b32.xlu0 %v2618_v36, %s3216_s29  ;;  %s3247_s29 = smov 64  }
 0x4ba   : > { %v690_v62 = vpop.xlane.xlu0 %689 }
 0x4bb   : > { %v691_v63 = vsub.f32 %v687_v60, %v690_v62  ;;  %v984_v62 = vld [vmem:[%s3202_s7 + $0x8] sm:$0xff] }
 0x4bd   : > { %v692_v0 = vmul.f32 1.442695, %v691_v63  ;;  %v768_v9 = vpop.f32.mrf.mxu3  ;;  %v983_v63 = vld [vmem:[%s3202_s7] sm:$0xff] }
 0x4bf   : > { %2311 = vpow2.f32 %v692_v0  ;;  %v1038_v0 = vld [vmem:[%s3204_s9 + $0x78] sm:$0xff] }
 0x4c0   : > { %1040 = vmatpush.msra.mxu3 %v1038_v0 }
 0x4c5   : > { %v2312_v1 = vpop.eup %2311 }
 0x4c6   : > { %v694_v2 = vsel %vm591_vm6, %v2312_v1, 0.0 }
 0x4c7   : > { %695 = vadd.xlane.f32.xlu2 %v694_v2  ;;  %v1036_v2 = vld [vmem:[%s3204_s9 + $0x68] sm:$0xff] }
 0x4cd   : > { %v863_v3 = vpop.permute.xlu0 %862 }
 0x4ce   : > { %2186 = vmatmul.msk.f32.vlgmr.msrb.gmra.mxu3 %vm591_vm6, %v863_v3 }
 0x4df   : > { %773 = vrot.lane.b32.xlu2 %v2618_v36, %s3214_s1  ;;  %s3217_s1 = smov 48  }
 0x53a   : > { %v696_v4 = vpop.xlane.xlu2 %695 }
 0x53b   : > { %2313 = vrcp.f32 %v696_v4 }
 0x541   : > { %v2314_v5 = vpop.eup %2313 }
 0x542   : > { %v774_v6 = vpop.permute.xlu2 %773  ;;  %v698_v7 = vmul.f32 %v2314_v5, %v2312_v1  ;;  %v1037_v1 = vld [vmem:[%s3204_s9 + $0x70] sm:$0xff]  ;;  %v1035_v5 = vld [vmem:[%s3204_s9 + $0x60] sm:$0xff] }
 0x543   : > { %2181 = vmatpush.xpose.msk.msra.mxu0 %vm591_vm6, %v774_v6  ;;  %1041 = vmatpush.msra.mxu3 %v1037_v1 }
 0x544   : > { %2178 = vmatmul.msk.f32.vlgmr.msrb.gmra.mxu0 %vm591_vm6, %v698_v7 }
 0x545   : > { %1042 = vmatpush.msra.mxu3 %v1036_v2 }
 0x547   : > { %1043 = vmatpush.msra.mxu3 %v1035_v5  ;;  %v1083_v5 = vperm.slane %v2695_v46, 4 }
 0x54c   : > { %2182 = vmatmul.msk.f32.vlgmr.msra.gmra.mxu0 %vm591_vm6, %v772_v10 }
 0x551   : > { %v887_v11 = vpop.f32.mrf.mxu3 }
 0x552   : > { %v890_v12 = vmul.f32 0.35355338, %v887_v11 }
 0x554   : > { %v891_v13 = vadd.f32 %v2637_v40, %v890_v12 }
 0x556   : > { %v892_v14 = vsel %vm591_vm6, %v891_v13, -inf }
 0x557   : > { %893 = vmax.xlane.f32.xlu0 %v892_v14  ;;  %v979_v14 = vperm.slane %v2695_v46, 1 }
 0x56b   : > { %812 = vrot.lane.b32.xlu0 %v2618_v36, %s3217_s1  ;;  %s3238_s1 = sld [smem:[#allocation16_spill]] }
 0x5c1   : > { %v722_v16 = vpop.f32.mrf.mxu0 }
 0x5c2   : > { %2179 = vmatmul.msk.f32.vlgmr.msrb.gmra.mxu1 %vm591_vm6, %v722_v16 }
 0x5c3   : > { %1006 = vmatpush.msrb.mxu1 %v986_v61 }
 0x5c9   : > { %v796_v17 = vpop.f32.mrf.mxu0 }
 0x5ca   : > { %v799_v18 = vmul.f32 0.35355338, %v796_v17  ;;  %v894_v19 = vpop.xlane.xlu0 %893  ;;  %v981_v17 = vperm.slane %v2695_v46, 2 }
 0x5cb   : > { %v895_v20 = vsub.f32 %v891_v13, %v894_v19 }
 0x5cc   : > { %v800_v21 = vadd.f32 %v2637_v40, %v799_v18 }
 0x5cd   : > { %v896_v22 = vmul.f32 1.442695, %v895_v20  ;;  %v1034_v20 = vld [vmem:[%s3204_s9 + $0x58] sm:$0xff] }
 0x5ce   : > { %v801_v23 = vsel %vm591_vm6, %v800_v21, -inf  ;;  %1044 = vmatpush.msra.mxu3 %v1034_v20 }
 0x5cf   : > { %2315 = vpow2.f32 %v896_v22  ;;  %802 = vmax.xlane.f32.xlu1 %v801_v23  ;;  %v1032_v22 = vld [vmem:[%s3204_s9 + $0x48] sm:$0xff]  ;;  %v1031_v23 = vld [vmem:[%s3204_s9 + $0x40] sm:$0xff] }
 0x5d5   : > { %v2316_v24 = vpop.eup %2315 }
 0x5d6   : > { %v898_v25 = vsel %vm591_vm6, %v2316_v24, 0.0 }
 0x5d7   : > { %899 = vadd.xlane.f32.xlu1 %v898_v25  ;;  %v1029_v25 = vld [vmem:[%s3204_s9 + $0x30] sm:$0xff] }
 0x5dd   : > { %v813_v26 = vpop.permute.xlu0 %812 }
 0x5de   : > { %833 = vmatpush.msra.mxu2 %v813_v26  ;;  %v1028_v26 = vld [vmem:[%s3204_s9 + $0x28] sm:$0xff] }
 0x5f0   : > { %903 = vrot.lane.b32.xlu1 %v2618_v36, %s3218_s23  ;;  %v586_v36 = vld [vmem:[%s3201_s6 + $0x18] sm:$0xff]  ;;  %s3246_s23 = smov 80  }
 0x5f1   : > { %947 = vmatpush.msrb.mxu2 %v586_v36 }
 0x63f   : > { %v745_v45 = vpop.f32.mrf.mxu1 }
 0x640   : > { %v769_v47 = vadd.f32 %v768_v9, %v745_v45 }
 0x642   : > { %v803_v27 = vpop.xlane.xlu1 %802 }
 0x643   : > { %v804_v28 = vsub.f32 %v800_v21, %v803_v27  ;;  %v1033_v21 = vld [vmem:[%s3204_s9 + $0x50] sm:$0xff]  ;;  %v1027_v27 = vld [vmem:[%s3204_s9 + $0x20] sm:$0xff] }
 0x644   : > { %1045 = vmatpush.msra.mxu3 %v1033_v21 }
 0x645   : > { %v805_v29 = vmul.f32 1.442695, %v804_v28  ;;  %v1026_v28 = vld [vmem:[%s3204_s9 + $0x18] sm:$0xff] }
 0x646   : > { %1046 = vmatpush.msra.mxu3 %v1032_v22 }
 0x647   : > { %2317 = vpow2.f32 %v805_v29  ;;  %v1025_v29 = vld [vmem:[%s3204_s9 + $0x10] sm:$0xff] }
 0x648   : > { %1047 = vmatpush.msra.mxu3 %v1031_v23 }
 0x64a   : > { %v900_v33 = vpop.xlane.xlu1 %899 }
 0x64b   : > { %2319 = vrcp.f32 %v900_v33  ;;  %v2299_v33 = vld [vmem:[%s3238_s1] ss:$0 sm:$0xff] }
 0x64d   : > { %v2318_v30 = vpop.eup %2317 }
 0x64e   : > { %v807_v31 = vsel %vm591_vm6, %v2318_v30, 0.0 }
 0x64f   : > { %808 = vadd.xlane.f32.xlu2 %v807_v31  ;;  %v1023_v31 = vld [vmem:[%s3204_s9] sm:$0xff] }
 0x651   : > { %v2320_v34 = vpop.eup %2319 }
 0x652   : > { %v902_v35 = vmul.f32 %v2320_v34, %v2316_v24  ;;  %v1030_v24 = vld [vmem:[%s3204_s9 + $0x38] sm:$0xff] }
 0x653   : > { %1048 = vmatpush.msra.mxu3 %v1030_v24 }
 0x655   : > { %1049 = vmatpush.msra.mxu3 %v1029_v25 }
 0x657   : > { %1050 = vmatpush.msra.mxu3 %v1028_v26 }
 0x659   : > { %1051 = vmatpush.msra.mxu3 %v1027_v27 }
 0x65b   : > { %1052 = vmatpush.msra.mxu3 %v1026_v28 }
 0x65d   : > { %1053 = vmatpush.msra.mxu3 %v1025_v29 }
 0x662   : > { %v904_v37 = vpop.permute.xlu1 %903 }
 0x663   : > { %924 = vmatpush.msrb.mxu0 %v904_v37 }
 0x664   : > { %2187 = vmatmul.msk.f32.vlgmr.msrb.gmra.mxu0 %vm591_vm6, %v902_v35 }
 0x6c2   : > { %v809_v38 = vpop.xlane.xlu2 %808 }
 0x6c3   : > { %2321 = vrcp.f32 %v809_v38 }
 0x6c9   : > { %v2322_v39 = vpop.eup %2321 }
 0x6ca   : > { %v811_v41 = vmul.f32 %v2322_v39, %v2318_v30  ;;  %v1024_v30 = vld [vmem:[%s3204_s9 + $0x8] sm:$0xff] }
 0x6cb   : > { %1054 = vmatpush.msra.mxu3 %v1024_v30 }
 0x6cc   : > { %2183 = vmatmul.msk.f32.vlgmr.msra.gmra.mxu2 %vm591_vm6, %v811_v41 }
 0x6cd   : > { %1055 = vmatpush.msra.mxu3 %v1023_v31 }
 0x6e1   : > { %v926_v42 = vpop.f32.mrf.mxu0 }
 0x6e2   : > { %2188 = vmatmul.msk.f32.vlgmr.msrb.gmra.mxu2 %vm591_vm6, %v926_v42 }
 0x74f   : > { %v835_v44 = vpop.f32.mrf.mxu2 }
 0x750   : > { %2184 = vmatmul.msk.f32.vlgmr.msra.gmra.mxu1 %vm591_vm6, %v835_v44 }
 0x765   : > { %v949_v51 = vpop.f32.mrf.mxu2 }
 0x7cd   : > { %v858_v48 = vpop.f32.mrf.mxu1 }
 0x7ce   : > { %v861_v49 = vadd.f32 %v858_v48, %v769_v47  ;;  %v1039_v47 = vperm.slane %v2695_v46, 3 }
 0x7d0   : > { %v952_v52 = vadd.f32 %v949_v51, %v861_v49 }
 0x7d2   : > { %v955_v53 = vadd.f32 %v954_v50, %v952_v52 }
 0x7d4   : > { %v956_v54 = vadd.f32 %v955_v53, %v2610_v32  ;;  %v985_v32 = vld [vmem:[%s3202_s7 + $0x10] sm:$0xff] }
 0x7d5   : > { %1007 = vmatpush.msrb.mxu1 %v985_v32 }
 0x7d6   : > { %v957_v55 = vsel %vm516_vm0, %v956_v54, 0.0 }
 0x7d7   : > { %958 = vadd.xlane.f32.xlu2 %v957_v55  ;;  %1008 = vmatpush.msrb.mxu1 %v984_v62 }
 0x7d9   : > { %1009 = vmatpush.msrb.mxu1 %v983_v63 }
 0x84a   : > { %v959_v56 = vpop.xlane.xlu2 %958 }
 0x84b   : > { %v960_v57 = vmul.f32 %v959_v56, %v2587_v8 }
 0x84d   : > { %v961_v58 = vsub.f32 %v956_v54, %v960_v57  ;;  %v2193_v57 = vld [vmem:[%s3235_s4 + $0x38] sm:$0xff] }
 0x84e   : > { %1112 = vmatpush.msra.mxu0 %v2193_v57 }
 0x84f   : > { %v962_v59 = vmul.f32 %v961_v58, %v961_v58 }
 0x851   : > { %v963_v60 = vsel %vm516_vm0, %v962_v59, 0.0  ;;  %v2191_v59 = vld [vmem:[%s3235_s4 + $0x28] sm:$0xff] }
 0x852   : > { %964 = vadd.xlane.f32.xlu2 %v963_v60  ;;  %v2190_v60 = vld [vmem:[%s3235_s4 + $0x20] sm:$0xff] }
 0x8c5   : > { %v965_v3 = vpop.xlane.xlu2 %964 }
 0x8c6   : > { %v966_v4 = vmul.f32 %v965_v3, %v2587_v8 }
 0x8c8   : > { %v967_v6 = vadd.f32 1e-12, %v966_v4 }
 0x8ca   : > { %2323 = vrsqrt.f32 %v967_v6  ;;  %vm974_vm8 = vweird.f32 %v967_v6 }
 0x8d0   : > { %v2324_v7 = vpop.eup %2323 }
 0x8d1   : > { %v969_v9 = vmul.f32 %v2324_v7, %v967_v6  ;;  %vm975_vm7 = vweird.f32 %v2324_v7 }
 0x8d2   : > { %vm976_vm9 = vmor %vm974_vm8, %vm975_vm7 }
 0x8d3   : > { %v970_v10 = vmul.f32 %v2324_v7, %v969_v9  ;;  %v1085_v9 = vperm.slane %v2695_v46, 5 }
 0x8d5   : > { %v971_v11 = vmul.f32 0.5, %v970_v10 }
 0x8d7   : > { %v972_v12 = vsub.f32 1.5, %v971_v11 }
 0x8d9   : > { %v973_v13 = vmul.f32 %v2324_v7, %v972_v12  ;;  %v2300_v12 = vld [vmem:[%s3200_s5 + $0x1] ss:$0 sm:$0xff] }
 0x8db   : > { %v977_v15 = vsel %vm976_vm9, %v2324_v7, %v973_v13 }
 0x8dc   : > { %v978_v16 = vmul.f32 %v977_v15, %v961_v58  ;;  %v2192_v58 = vld [vmem:[%s3235_s4 + $0x30] sm:$0xff] }
 0x8dd   : > { %1113 = vmatpush.msra.mxu0 %v2192_v58 }
 0x8de   : > { %v980_v18 = vmul.f32 %v979_v14, %v978_v16 }
 0x8df   : > { %1114 = vmatpush.msra.mxu0 %v2191_v59 }
 0x8e0   : > { %v982_v19 = vadd.f32 %v981_v17, %v980_v18 }
 0x8e1   : > { %1115 = vmatpush.msra.mxu0 %v2190_v60 }
 0x8e2   : > { %2189 = vmatmul.msk.f32.vlgmr.msrb.gmra.mxu1 %vm516_vm0, %v982_v19 }
 0x95f   : > { %v1011_v34 = vpop.f32.mrf.mxu1 }
 0x960   : > { %v1012_v35 = vadd.f32 %v2299_v33, %v1011_v34 }
 0x962   : > { %v1015_v37 = vmul.f32 0.044715, %v1012_v35  ;;  %v1014_v43 = vmul.f32 0.5, %v1012_v35 }
 0x964   : > { %v1016_v36 = vmul.f32 %v1015_v37, %v1012_v35 }
 0x966   : > { %v1017_v38 = vmul.f32 %v1016_v36, %v1012_v35 }
 0x968   : > { %v1018_v39 = vadd.f32 %v1017_v38, %v1012_v35 }
 0x96a   : > { %v1019_v41 = vmul.f32 0.7978846, %v1018_v39 }
 0x96c   : > { %2325 = vtanh.f32 %v1019_v41 }
 0x972   : > { %v2326_v42 = vpop.eup %2325 }
 0x973   : > { %v1021_v44 = vadd.f32 1.0, %v2326_v42 }
 0x975   : > { %v1022_v45 = vmul.f32 %v1021_v44, %v1014_v43 }
 0x977   : > { %1056 = vmatmul.f32.vlgmr.msra.gmra.mxu3 %v1022_v45 }
 0x9fa   : > { %v1057_v48 = vpop.f32.mrf.mxu3 }
 0x9fb   : > { %v1058_v49 = vadd.f32 %v1057_v48, %v1039_v47 }
 0x9fd   : > { %v1060_v50 = vadd.f32 %v1058_v49, %v982_v19 }
 0x9ff   : > { %v1061_v51 = vsel %vm516_vm0, %v1060_v50, 0.0 }
 0xa00   : > { %1062 = vadd.xlane.f32.xlu0 %v1061_v51 }
 0xa73   : > { %v1063_v52 = vpop.xlane.xlu0 %1062 }
 0xa74   : > { %v1064_v53 = vmul.f32 %v1063_v52, %v2587_v8 }
 0xa76   : > { %v1065_v54 = vsub.f32 %v1060_v50, %v1064_v53 }
 0xa78   : > { %v1066_v55 = vmul.f32 %v1065_v54, %v1065_v54 }
 0xa7a   : > { %v1067_v56 = vsel %vm516_vm0, %v1066_v55, 0.0 }
 0xa7b   : > { %1068 = vadd.xlane.f32.xlu2 %v1067_v56 }
 0xaee   : > { %v1069_v61 = vpop.xlane.xlu2 %1068 }
 0xaef   : > { %v1070_v32 = vmul.f32 %v1069_v61, %v2587_v8 }
 0xaf1   : > { %v1071_v62 = vadd.f32 1e-12, %v1070_v32 }
 0xaf3   : > { %2327 = vrsqrt.f32 %v1071_v62  ;;  %vm1078_vm11 = vweird.f32 %v1071_v62 }
 0xaf9   : > { %v2328_v63 = vpop.eup %2327 }
 0xafa   : > { %v1073_v0 = vmul.f32 %v2328_v63, %v1071_v62  ;;  %vm1079_vm10 = vweird.f32 %v2328_v63 }
 0xafb   : > { %vm1080_vm12 = vmor %vm1078_vm11, %vm1079_vm10  ;;  %vm1705_vm10 = vcmask 32768  }
 0xafc   : > { %v1074_v1 = vmul.f32 %v2328_v63, %v1073_v0 }
 0xafe   : > { %v1075_v2 = vmul.f32 0.5, %v1074_v1 }
 0xb00   : > { %v1076_v3 = vsub.f32 1.5, %v1075_v2 }
 0xb02   : > { %v1077_v4 = vmul.f32 %v2328_v63, %v1076_v3  ;;  %v2197_v3 = vld [vmem:[%s3201_s6 + $0x28] sm:$0xff] }
 0xb04   : > { %v1081_v6 = vsel %vm1080_vm12, %v2328_v63, %v1077_v4 }
 0xb05   : > { %v1082_v7 = vmul.f32 %v1081_v6, %v1065_v54 }
 0xb07   : > { %v1084_v10 = vmul.f32 %v1083_v5, %v1082_v7  ;;  %v2196_v5 = vld [vmem:[%s3201_s6 + $0x20] sm:$0xff] }
 0xb09   : > { %v2788_v11 = vadd.f32 %v1085_v9, %v1084_v10 }
 0xb0b   : > { %2195 = vmatmul.msk.f32.vlgmr.msra.gmra.mxu0 %vm516_vm0, %v2788_v11 }
 0xb88   : > { %v1117_v13 = vpop.f32.mrf.mxu0 }
 0xb89   : > { %v1118_v14 = vadd.f32 %v2300_v12, %v1117_v13 }
 0xb8b   : > { %1120 = vst.msk [vmem:[#allocation2] sm:$0xff] %vm581_vm5, %v1118_v14 }
 0xb92   : > { %v2796_v15 = vld [vmem:[#allocation2] sm:$0xff] }
 0xb93   : > { %1193 = vrot.lane.b32.xlu2 %v2796_v15, %s3239_s24  ;;  %1195 = vrot.lane.b32.xlu1 %v2796_v15, %s3240_s0 }
 0xb9b   : > { %1128 = vrot.lane.b32.xlu2 %v2796_v15, %s3241_s2  ;;  %s3248_s2 = smov 48  }
 0xba3   : > { %1234 = vrot.lane.b32.xlu2 %v2796_v15, %s3242_s3  ;;  %s3249_s3 = smov 40  }
 0xbab   : > { %1306 = vrot.lane.b32.xlu2 %v2796_v15, %s3243_s22 }
 0xbb3   : > { %1397 = vrot.lane.b32.xlu2 %v2796_v15, %s3244_s17 }
 0xbed   : > { %v1194_v46 = vpop.permute.xlu2 %1193 }
 0xbf5   : > { %v1129_v16 = vpop.permute.xlu2 %1128 }
 0xbf6   : > { %2200 = vmatpush.xpose.msk.msra.mxu2 %vm591_vm6, %v1129_v16  ;;  %v2198_v16 = vld [vmem:[%s3201_s6 + $0x30] sm:$0xff] }
 0xbf9   : > { %2201 = vmatmul.msk.f32.vlgmr.msra.gmra.mxu2 %vm591_vm6, %v2796_v15 }
 0xbfd   : > { %v1235_v17 = vpop.permute.xlu2 %1234 }
 0xbfe   : > { %1255 = vmatpush.msrb.mxu2 %v1235_v17 }
 0xc05   : > { %v1196_v18 = vpop.permute.xlu1 %1195  ;;  %v1307_v27 = vpop.permute.xlu2 %1306 }
 0xc06   : > { %2203 = vmatpush.xpose.msk.msrb.mxu0 %vm591_vm6, %v1196_v18  ;;  %v2199_v18 = vld [vmem:[%s3201_s6 + $0x38] sm:$0xff] }
 0xc07   : > { %1482 = vmatpush.msrb.mxu3 %v2199_v18 }
 0xc09   : > { %2204 = vmatmul.msk.f32.vlgmr.msrb.gmra.mxu0 %vm591_vm6, %v1194_v46 }
 0xc0a   : > { %1301 = vmatpush.msra.mxu0 %v2196_v5  ;;  %v2225_v5 = vld [vmem:[%s3204_s9 + $0x90] sm:$0xff] }
 0xc0c   : > { %1391 = vmatpush.msrb.mxu0 %v2198_v16 }
 0xc0d   : > { %v1398_v28 = vpop.permute.xlu2 %1397 }
 0xc7c   : > { %v1151_v19 = vpop.f32.mrf.mxu2 }
 0xc7d   : > { %v1154_v20 = vmul.f32 0.35355338, %v1151_v19 }
 0xc7f   : > { %v1155_v21 = vadd.f32 %v2637_v40, %v1154_v20 }
 0xc81   : > { %v1156_v22 = vsel %vm591_vm6, %v1155_v21, -inf }
 0xc82   : > { %1157 = vmax.xlane.f32.xlu2 %v1156_v22 }
 0xc86   : > { %v1218_v23 = vpop.f32.mrf.mxu0 }
 0xc87   : > { %v1221_v24 = vmul.f32 0.35355338, %v1218_v23  ;;  %v2864_v23 = vld [vmem:[%s3205_s10 + $0x8] sm:$0x3f] }
 0xc89   : > { %v1222_v25 = vadd.f32 %v2637_v40, %v1221_v24 }
 0xc8b   : > { %v1223_v26 = vsel %vm591_vm6, %v1222_v25, -inf }
 0xc8c   : > { %1224 = vmax.xlane.f32.xlu1 %v1223_v26  ;;  %v1490_v26 = vperm.slane %v2864_v23, 0 }
 0xca5   : > { %1399 = vrot.lane.b32.xlu1 %v2796_v15, %s3245_s21 }
 0xcf5   : > { %v1158_v29 = vpop.xlane.xlu2 %1157 }
 0xcf6   : > { %v1159_v30 = vsub.f32 %v1155_v21, %v1158_v29 }
 0xcf8   : > { %v1160_v31 = vmul.f32 1.442695, %v1159_v30 }
 0xcfa   : > { %2329 = vpow2.f32 %v1160_v31 }
 0xcff   : > { %v1225_v33 = vpop.xlane.xlu1 %1224 }
 0xd00   : > { %v2330_v34 = vpop.eup %2329  ;;  %v1226_v35 = vsub.f32 %v1222_v25, %v1225_v33 }
 0xd01   : > { %v1162_v37 = vsel %vm591_vm6, %v2330_v34, 0.0 }
 0xd02   : > { %v1227_v36 = vmul.f32 1.442695, %v1226_v35  ;;  %1163 = vadd.xlane.f32.xlu2 %v1162_v37 }
 0xd04   : > { %2331 = vpow2.f32 %v1227_v36 }
 0xd0a   : > { %v2332_v38 = vpop.eup %2331 }
 0xd0b   : > { %v1229_v39 = vsel %vm591_vm6, %v2332_v38, 0.0 }
 0xd0c   : > { %1230 = vadd.xlane.f32.xlu0 %v1229_v39  ;;  %v2218_v39 = vld [vmem:[%s3202_s7 + $0x28] sm:$0xff] }
 0xd17   : > { %v1400_v45 = vpop.permute.xlu1 %1399 }
 0xd20   : > { %1308 = vrot.lane.b32.xlu0 %v2796_v15, %s3246_s23  ;;  %s2981_s23 = sshll.u32 %s2551_s8, 7 }
 0xd21   : > { %s1744_s21 = sadd.s32 3, %s2981_s23  ;;  %s1781_s24 = sadd.s32 4, %s2981_s23 }
 0xd22   : > { %s1782_s0 = sld [smem:[#allocation5 + %s1781_s24]]  ;;  %s1892_s24 = sadd.s32 7, %s2981_s23 }
 0xd28   : > { %p1783_p0 = scmp.gt.s32.totalorder %s1782_s0, 0  ;;  %s1893_s0 = sld [smem:[#allocation5 + %s1892_s24]] }
 0xd2e   : > { %p1894_p3 = scmp.gt.s32.totalorder %s1893_s0, 0 }
 0xd75   : > { %v1164_v59 = vpop.xlane.xlu2 %1163 }
 0xd7f   : > { %v1231_v41 = vpop.xlane.xlu0 %1230 }
 0xd80   : > { %2333 = vrcp.f32 %v1231_v41  ;;  %v2217_v41 = vld [vmem:[%s3202_s7 + $0x20] sm:$0xff] }
 0xd86   : > { %v2334_v42 = vpop.eup %2333 }
 0xd87   : > { %v1233_v43 = vmul.f32 %v2334_v42, %v2332_v38  ;;  %v2220_v38 = vld [vmem:[%s3202_s7 + $0x38] sm:$0xff] }
 0xd88   : > { %v2238_v42 = vld [vmem:[%s3204_s9 + $0xf8] sm:$0xff] }
 0xd89   : > { %2205 = vmatmul.msk.f32.vlgmr.msrb.gmra.mxu2 %vm591_vm6, %v1233_v43  ;;  %v2237_v43 = vld [vmem:[%s3204_s9 + $0xf0] sm:$0xff] }
 0xd92   : > { %v1309_v44 = vpop.permute.xlu0 %1308 }
 0xd93   : > { %2208 = vmatpush.xpose.msk.msra.mxu2 %vm591_vm6, %v1309_v44  ;;  %v2236_v44 = vld [vmem:[%s3204_s9 + $0xe8] sm:$0xff] }
 0xd96   : > { %2209 = vmatmul.msk.f32.vlgmr.msra.gmra.mxu2 %vm591_vm6, %v1307_v27 }
 0xd97   : > { %2212 = vmatpush.xpose.msk.msrb.mxu2 %vm591_vm6, %v1400_v45 }
 0xd9b   : > { %1579 = vmatpush.msra.mxu2 %v2238_v42 }
 0xd9d   : > { %1580 = vmatpush.msra.mxu2 %v2237_v43 }
 0xd9e   : > { %2213 = vmatmul.msk.f32.vlgmr.msrb.gmra.mxu2 %vm591_vm6, %v1398_v28 }
 0xd9f   : > { %1581 = vmatpush.msra.mxu2 %v2236_v44 }
 0xe0c   : > { %v1257_v47 = vpop.f32.mrf.mxu2 }
 0xe19   : > { %v1331_v48 = vpop.f32.mrf.mxu2 }
 0xe1a   : > { %v1334_v49 = vmul.f32 0.35355338, %v1331_v48  ;;  %v2235_v48 = vld [vmem:[%s3204_s9 + $0xe0] sm:$0xff] }
 0xe1b   : > { %1582 = vmatpush.msra.mxu2 %v2235_v48 }
 0xe1c   : > { %v1335_v50 = vadd.f32 %v2637_v40, %v1334_v49 }
 0xe1e   : > { %v1336_v51 = vsel %vm591_vm6, %v1335_v50, -inf }
 0xe1f   : > { %1337 = vmax.xlane.f32.xlu0 %v1336_v51 }
 0xe21   : > { %v1422_v52 = vpop.f32.mrf.mxu2 }
 0xe22   : > { %v1425_v53 = vmul.f32 0.35355338, %v1422_v52 }
 0xe24   : > { %v1426_v54 = vadd.f32 %v2637_v40, %v1425_v53 }
 0xe26   : > { %v1427_v55 = vsel %vm591_vm6, %v1426_v54, -inf }
 0xe27   : > { %1428 = vmax.xlane.f32.xlu1 %v1427_v55 }
 0xe33   : > { %1167 = vrot.lane.b32.xlu0 %v2796_v15, %s3247_s29  ;;  %s1665_s29 = sadd.s32 1, %s2981_s23 }
 0xe34   : > { %s1666_s4 = sld [smem:[#allocation5 + %s1665_s29]] }
 0xe35   : > { %s1745_s29 = sld [smem:[#allocation5 + %s1744_s21]]  ;;  %s1855_s21 = sadd.s32 6, %s2981_s23 }
 0xe3a   : > { %p1667_p11 = scmp.gt.s32.totalorder %s1666_s4, 0 }
 0xe3b   : > { %p1746_p13 = scmp.gt.s32.totalorder %s1745_s29, 0  ;;  %s1856_s29 = sld [smem:[#allocation5 + %s1855_s21]] }
 0xe3d   : > { %s1774_s4 = scalar_select %p1746_p13, 1, 0 }
 0xe41   : > { %p1857_p2 = scmp.gt.s32.totalorder %s1856_s29, 0  ;;  %s2099_s29 = scalar_lea.hbm %s3211_s16, %s2551_s8 }
 0xe42   : > { %s2103_s0 = sshll.u32 %s2099_s29, 4  ;;  %s2104_s0 = int_to_ptr.hbm [resolvable:$true] %s2103_s0 }
 0xe92   : > { %v1338_v56 = vpop.xlane.xlu0 %1337 }
 0xe93   : > { %v1339_v57 = vsub.f32 %v1335_v50, %v1338_v56  ;;  %v1515_v56 = vperm.slane %v2864_v23, 1 }
 0xe95   : > { %v1340_v58 = vmul.f32 1.442695, %v1339_v57 }
 0xe97   : > { %2335 = vpow2.f32 %v1340_v58 }
 0xe98   : > { %2337 = vrcp.f32 %v1164_v59  ;;  %v1517_v59 = vperm.slane %v2864_v23, 2 }
 0xe9a   : > { %v1429_v60 = vpop.xlane.xlu1 %1428 }
 0xe9b   : > { %v1430_v61 = vsub.f32 %v1426_v54, %v1429_v60 }
 0xe9d   : > { %v2336_v32 = vpop.eup %2335  ;;  %v1431_v62 = vmul.f32 1.442695, %v1430_v61 }
 0xe9e   : > { %v1342_v63 = vsel %vm591_vm6, %v2336_v32, 0.0  ;;  %v2338_v40 = vpop.eup %2337 }
 0xe9f   : > { %2339 = vpow2.f32 %v1431_v62  ;;  %1343 = vadd.xlane.f32.xlu2 %v1342_v63  ;;  %v1166_v1 = vmul.f32 %v2338_v40, %v2330_v34  ;;  %v2233_v62 = vld [vmem:[%s3204_s9 + $0xd0] sm:$0xff]  ;;  %v2232_v63 = vld [vmem:[%s3204_s9 + $0xc8] sm:$0xff]  ;;  %v2231_v40 = vld [vmem:[%s3204_s9 + $0xc0] sm:$0xff] }
 0xea5   : > { %v2340_v0 = vpop.eup %2339  ;;  %v1168_v2 = vpop.permute.xlu0 %1167 }
 0xea6   : > { %1188 = vmatpush.msra.mxu1 %v1168_v2  ;;  %v1433_v4 = vsel %vm591_vm6, %v2340_v0, 0.0  ;;  %v2228_v2 = vld [vmem:[%s3204_s9 + $0xa8] sm:$0xff] }
 0xea7   : > { %2202 = vmatmul.msk.f32.vlgmr.msra.gmra.mxu1 %vm591_vm6, %v1166_v1  ;;  %1434 = vadd.xlane.f32.xlu1 %v1433_v4  ;;  %v2229_v1 = vld [vmem:[%s3204_s9 + $0xb0] sm:$0xff]  ;;  %v2226_v4 = vld [vmem:[%s3204_s9 + $0x98] sm:$0xff] }
 0xea8   : > { %1278 = vmatpush.msrb.mxu1 %v2197_v3  ;;  %v2227_v3 = vld [vmem:[%s3204_s9 + $0xa0] sm:$0xff] }
 0xeaf   : > { %2206 = vmatmul.msk.f32.vlgmr.msrb.gmra.mxu1 %vm591_vm6, %v1257_v47 }
 0xeb7   : > { %1347 = vrot.lane.b32.xlu2 %v2796_v15, %s3248_s2  ;;  %s1699_s2 = scalar_select %p1667_p11, 1, 0 }
 0xec0   : > { %1438 = vrot.lane.b32.xlu1 %v2796_v15, %s3249_s3  ;;  %s1707_s3 = sadd.s32 2, %s2981_s23 }
 0xec1   : > { %s1708_s22 = sld [smem:[#allocation5 + %s1707_s3]]  ;;  %s1818_s3 = sadd.s32 5, %s2981_s23 }
 0xec7   : > { %p1709_p12 = scmp.gt.s32.totalorder %s1708_s22, 0  ;;  %s1819_s22 = sld [smem:[#allocation5 + %s1818_s3]] }
 0xec9   : > { %s1737_s17 = scalar_select %p1709_p12, 1, 0 }
 0xecd   : > { %p1820_p1 = scmp.gt.s32.totalorder %s1819_s22, 0  ;;  %s503_s22 = sand.u32 1, %s2419_s26  }
 0xece   : > { %s2091_s8 = scalar_lea.sflag [#allocation7], %s503_s22 }
 0xf12   : > { %v1344_v6 = vpop.xlane.xlu2 %1343 }
 0xf13   : > { %2341 = vrcp.f32 %v1344_v6  ;;  %v2224_v6 = vld [vmem:[%s3204_s9 + $0x88] sm:$0xff] }
 0xf19   : > { %v2342_v7 = vpop.eup %2341 }
 0xf1a   : > { %v1346_v9 = vmul.f32 %v2342_v7, %v2336_v32  ;;  %v1348_v10 = vpop.permute.xlu2 %1347  ;;  %v1435_v13 = vpop.xlane.xlu1 %1434  ;;  %v2234_v32 = vld [vmem:[%s3204_s9 + $0xd8] sm:$0xff]  ;;  %v2223_v7 = vld [vmem:[%s3204_s9 + $0x80] sm:$0xff] }
 0xf1b   : > { %1368 = vmatpush.msra.mxu1 %v1348_v10  ;;  %2343 = vrcp.f32 %v1435_v13  ;;  %1583 = vmatpush.msra.mxu2 %v2234_v32 }
 0xf1c   : > { %2210 = vmatmul.msk.f32.vlgmr.msra.gmra.mxu1 %vm591_vm6, %v1346_v9  ;;  %v2301_v9 = vld [vmem:[%s3238_s1 + $0x1] ss:$0 sm:$0xff] }
 0xf1d   : > { %1584 = vmatpush.msra.mxu2 %v2233_v62  ;;  %v2987_v62 = vld [vmem:[%s3208_s13] sm:$0x1f] }
 0xf1f   : > { %1585 = vmatpush.msra.mxu2 %v2232_v63 }
 0xf21   : > { %v2344_v14 = vpop.eup %2343  ;;  %1586 = vmatpush.msra.mxu2 %v2231_v40 }
 0xf22   : > { %v1437_v15 = vmul.f32 %v2344_v14, %v2340_v0  ;;  %v2230_v0 = vld [vmem:[%s3204_s9 + $0xb8] sm:$0xff] }
 0xf23   : > { %1587 = vmatpush.msra.mxu2 %v2230_v0 }
 0xf24   : > { %v1190_v12 = vpop.f32.mrf.mxu1 }
 0xf25   : > { %2207 = vmatmul.msk.f32.vlgmr.msra.gmra.mxu0 %vm591_vm6, %v1190_v12  ;;  %1588 = vmatpush.msra.mxu2 %v2229_v1 }
 0xf26   : > { %1544 = vmatpush.msra.mxu0 %v2220_v38 }
 0xf27   : > { %1589 = vmatpush.msra.mxu2 %v2228_v2 }
 0xf29   : > { %1590 = vmatpush.msra.mxu2 %v2227_v3 }
 0xf2b   : > { %1591 = vmatpush.msra.mxu2 %v2226_v4 }
 0xf2c   : > { %v1280_v17 = vpop.f32.mrf.mxu1 }
 0xf2d   : > { %1592 = vmatpush.msra.mxu2 %v2225_v5 }
 0xf2f   : > { %1593 = vmatpush.msra.mxu2 %v2224_v6 }
 0xf31   : > { %1594 = vmatpush.msra.mxu2 %v2223_v7  ;;  %v1700_v7 = vstv %s1699_s2  ;;  %s1811_s2 = scalar_select %p1783_p0, 1, 0 }
 0xf32   : > { %v1439_v46 = vpop.permute.xlu1 %1438  ;;  %vm2992_vm5 = vcmp.eq.s32.totalorder %v1700_v7, 1 }
 0xf33   : > { %1459 = vmatpush.msrb.mxu1 %v1439_v46 }
 0xf34   : > { %2214 = vmatmul.msk.f32.vlgmr.msrb.gmra.mxu1 %vm591_vm6, %v1437_v15 }
 0xf99   : > { %v1370_v19 = vpop.f32.mrf.mxu1 }
 0xf9a   : > { %2211 = vmatmul.msk.f32.vlgmr.msrb.gmra.mxu0 %vm591_vm6, %v1370_v19 }
 0xfa2   : > { %v1303_v21 = vpop.f32.mrf.mxu0 }
 0xfa3   : > { %v1304_v24 = vadd.f32 %v1303_v21, %v1280_v17  ;;  %v1578_v21 = vperm.slane %v2864_v23, 3 }
 0xfb1   : > { %v1461_v20 = vpop.f32.mrf.mxu1 }
 0xfb2   : > { %2215 = vmatmul.msk.f32.vlgmr.msrb.gmra.mxu3 %vm591_vm6, %v1461_v20 }
0x1017   : > { %v1393_v22 = vpop.f32.mrf.mxu0 }
0x1018   : > { %v1396_v25 = vadd.f32 %v1393_v22, %v1304_v24 }
0x1035   : > { %v1484_v27 = vpop.f32.mrf.mxu3 }
0x1036   : > { %v1487_v28 = vadd.f32 %v1484_v27, %v1396_v25 }
0x1038   : > { %v1491_v29 = vadd.f32 %v1490_v26, %v1487_v28 }
0x103a   : > { %v1492_v30 = vadd.f32 %v1491_v29, %v2788_v11  ;;  %v2219_v11 = vld [vmem:[%s3202_s7 + $0x30] sm:$0xff] }
0x103b   : > { %1545 = vmatpush.msra.mxu0 %v2219_v11 }
0x103c   : > { %v1493_v31 = vsel %vm516_vm0, %v1492_v30, 0.0 }
0x103d   : > { %1494 = vadd.xlane.f32.xlu0 %v1493_v31  ;;  %1546 = vmatpush.msra.mxu0 %v2218_v39 }
0x103f   : > { %1547 = vmatpush.msra.mxu0 %v2217_v41 }
0x10b0   : > { %v1495_v33 = vpop.xlane.xlu0 %1494 }
0x10b1   : > { %v1496_v34 = vmul.f32 %v1495_v33, %v2587_v8  ;;  %v1629_v33 = vld [vmem:[%s3206_s11 + $0x18] sm:$0xff] }
0x10b2   : > { %1649 = vmatpush.msra.mxu1 %v1629_v33 }
0x10b3   : > { %v1497_v35 = vsub.f32 %v1492_v30, %v1496_v34  ;;  %v1628_v34 = vld [vmem:[%s3206_s11 + $0x10] sm:$0xff] }
0x10b4   : > { %1650 = vmatpush.msra.mxu1 %v1628_v34 }
0x10b5   : > { %v1498_v37 = vmul.f32 %v1497_v35, %v1497_v35 }
0x10b7   : > { %v1499_v36 = vsel %vm516_vm0, %v1498_v37, 0.0  ;;  %v1626_v37 = vld [vmem:[%s3206_s11] sm:$0xff] }
0x10b8   : > { %1500 = vadd.xlane.f32.xlu2 %v1499_v36 }
0x112b   : > { %v1501_v45 = vpop.xlane.xlu2 %1500 }
0x112c   : > { %v1502_v47 = vmul.f32 %v1501_v45, %v2587_v8 }
0x112e   : > { %v1503_v49 = vadd.f32 1e-12, %v1502_v47  ;;  %v1622_v47 = vperm.slane %v2864_v23, 4 }
0x1130   : > { %2345 = vrsqrt.f32 %v1503_v49  ;;  %vm1510_vm14 = vweird.f32 %v1503_v49 }
0x1136   : > { %v2346_v50 = vpop.eup %2345 }
0x1137   : > { %v1505_v51 = vmul.f32 %v2346_v50, %v1503_v49  ;;  %vm1511_vm13 = vweird.f32 %v2346_v50 }
0x1138   : > { %vm1512_vm15 = vmor %vm1510_vm14, %vm1511_vm13 }
0x1139   : > { %v1506_v52 = vmul.f32 %v2346_v50, %v1505_v51 }
0x113b   : > { %v1507_v53 = vmul.f32 0.5, %v1506_v52 }
0x113d   : > { %v1508_v54 = vsub.f32 1.5, %v1507_v53  ;;  %v2302_v53 = vld [vmem:[%s3207_s12] ss:$0 sm:$0xff] }
0x113f   : > { %v1509_v55 = vmul.f32 %v2346_v50, %v1508_v54 }
0x1141   : > { %v1513_v57 = vsel %vm1512_vm15, %v2346_v50, %v1509_v55  ;;  %v1624_v50 = vperm.slane %v2864_v23, 5 }
0x1142   : > { %v1514_v58 = vmul.f32 %v1513_v57, %v1497_v35  ;;  %v1627_v35 = vld [vmem:[%s3206_s11 + $0x8] sm:$0xff]  ;;  %v1662_v57 = vld [vmem:[%s3209_s14] sm:$0x1] }
0x1143   : > { %1651 = vmatpush.msra.mxu1 %v1627_v35 }
0x1144   : > { %v1516_v60 = vmul.f32 %v1515_v56, %v1514_v58 }
0x1145   : > { %1652 = vmatpush.msra.mxu1 %v1626_v37  ;;  %v1738_v37 = vstv %s1737_s17  ;;  %s1848_s17 = scalar_select %p1820_p1, 1, 0 }
0x1146   : > { %v1518_v61 = vadd.f32 %v1517_v59, %v1516_v60  ;;  %vm3011_vm11 = vcmp.eq.s32.totalorder %v1738_v37, 1 }
0x1148   : > { %2222 = vmatmul.msk.f32.vlgmr.msra.gmra.mxu0 %vm516_vm0, %v1518_v61 }
0x11c5   : > { %v1549_v10 = vpop.f32.mrf.mxu0 }
0x11c6   : > { %v1550_v12 = vadd.f32 %v2301_v9, %v1549_v10 }
0x11c8   : > { %v1553_v13 = vmul.f32 0.044715, %v1550_v12  ;;  %v1552_v18 = vmul.f32 0.5, %v1550_v12 }
0x11ca   : > { %v1554_v14 = vmul.f32 %v1553_v13, %v1550_v12 }
0x11cc   : > { %v1555_v15 = vmul.f32 %v1554_v14, %v1550_v12 }
0x11ce   : > { %v1556_v46 = vadd.f32 %v1555_v15, %v1550_v12 }
0x11d0   : > { %v1557_v16 = vmul.f32 0.7978846, %v1556_v46 }
0x11d2   : > { %2347 = vtanh.f32 %v1557_v16 }
0x11d8   : > { %v2348_v17 = vpop.eup %2347 }
0x11d9   : > { %v1559_v19 = vadd.f32 1.0, %v2348_v17 }
0x11db   : > { %v1560_v20 = vmul.f32 %v1559_v19, %v1552_v18 }
0x11dd   : > { %1595 = vmatmul.f32.vlgmr.msra.gmra.mxu2 %v1560_v20 }
0x1260   : > { %v1596_v22 = vpop.f32.mrf.mxu2 }
0x1261   : > { %v1597_v24 = vadd.f32 %v1596_v22, %v1578_v21 }
0x1263   : > { %v1599_v25 = vadd.f32 %v1597_v24, %v1518_v61 }
0x1265   : > { %v1600_v26 = vsel %vm516_vm0, %v1599_v25, 0.0 }
0x1266   : > { %1601 = vadd.xlane.f32.xlu1 %v1600_v26 }
0x12d9   : > { %v1602_v27 = vpop.xlane.xlu1 %1601 }
0x12da   : > { %v1603_v28 = vmul.f32 %v1602_v27, %v2587_v8 }
0x12dc   : > { %v1604_v29 = vsub.f32 %v1599_v25, %v1603_v28 }
0x12de   : > { %v1605_v30 = vmul.f32 %v1604_v29, %v1604_v29 }
0x12e0   : > { %v1606_v31 = vsel %vm516_vm0, %v1605_v30, 0.0 }
0x12e1   : > { %1607 = vadd.xlane.f32.xlu0 %v1606_v31 }
0x1354   : > { %v1608_v36 = vpop.xlane.xlu0 %1607 }
0x1355   : > { %v1609_v38 = vmul.f32 %v1608_v36, %v2587_v8  ;;  %v1658_v8 = vlaneseq }
0x1357   : > { %v1610_v11 = vadd.f32 1e-12, %v1609_v38  ;;  %v2961_v55 = vshrl.u32 %v1658_v8, 7  ;;  %v2963_v56 = vand.u32 127, %v1658_v8 }
0x1359   : > { %2349 = vrsqrt.f32 %v1610_v11  ;;  %vm1617_vm2 = vweird.f32 %v1610_v11 }
0x135f   : > { %v2350_v39 = vpop.eup %2349 }
0x1360   : > { %v1612_v41 = vmul.f32 %v2350_v39, %v1610_v11  ;;  %vm1618_vm1 = vweird.f32 %v2350_v39 }
0x1361   : > { %vm1619_vm3 = vmor %vm1617_vm2, %vm1618_vm1 }
0x1362   : > { %v1613_v42 = vmul.f32 %v2350_v39, %v1612_v41 }
0x1364   : > { %v1614_v43 = vmul.f32 0.5, %v1613_v42 }
0x1366   : > { %v1615_v44 = vsub.f32 1.5, %v1614_v43 }
0x1368   : > { %v1616_v45 = vmul.f32 %v2350_v39, %v1615_v44 }
0x136a   : > { %v1620_v48 = vsel %vm1619_vm3, %v2350_v39, %v1616_v45 }
0x136b   : > { %v1621_v49 = vmul.f32 %v1620_v48, %v1604_v29 }
0x136d   : > { %v1623_v51 = vmul.f32 %v1622_v47, %v1621_v49 }
0x136f   : > { %v1625_v52 = vadd.f32 %v1624_v50, %v1623_v51 }
0x1371   : > { %2239 = vmatmul.msk.f32.vlgmr.msra.gmra.mxu1 %vm516_vm0, %v1625_v52  ;;  %vm2973_vm0 = vcmp.eq.s32.totalorder %v2961_v55, %v2963_v56 }
0x13ee   : > { %v1654_v54 = vpop.f32.mrf.mxu1 }
0x13ef   : > { %v2968_v23 = vadd.f32 %v2302_v53, %v1654_v54 }
0x13f1   : > { %v1663_v58 = vadd.f32 %v1662_v57, %v2968_v23  ;;  %v1678_v40 = vperm.slane %v2968_v23, 1  ;;  %v1716_v27 = vperm.slane %v2968_v23, 2  ;;  %v1753_v54 = vperm.slane %v2968_v23, 3 }
0x13f3   : > { %v1670_v60 = vperm.slane %v1663_v58, 0 }
0x13f5   : > { %v1672_v61 = vsel %vm2973_vm0, %v1670_v60, 0.0 }
0x13f6   : > { %v1674_v32 = vsel %vm1673_vm4, %v1672_v61, 0.0 }
0x13f7   : > { %1675 = vadd.xlane.f32.xlu0 %v1674_v32 }
0x146a   : > { %v1676_v63 = vpop.xlane.xlu0 %1675 }
0x146b   : > { %v1677_v0 = vadd.f32 %v1676_v63, %v2987_v62 }
0x146d   : > { %v1679_v1 = vadd.f32 %v1678_v40, %v1677_v0  ;;  %v1775_v0 = vstv %s1774_s4  ;;  %s1885_s4 = scalar_select %p1857_p2, 1, 0 }
0x146e   : > { %vm3030_vm1 = vcmp.eq.s32.totalorder %v1775_v0, 1 }
0x146f   : > { %v1680_v2 = vsel %vm1673_vm4, %v1679_v1, -inf }
0x1470   : > { %v1681_v3 = vrot.slane %v1680_v2, 4 }
0x1472   : > { %v1682_v4 = vmax.f32 %v1680_v2, %v1681_v3 }
0x1474   : > { %v1683_v5 = vrot.slane %v1682_v4, 2 }
0x1476   : > { %v1684_v6 = vmax.f32 %v1682_v4, %v1683_v5 }
0x1478   : > { %v1685_v9 = vrot.slane %v1684_v6, 1 }
0x147a   : > { %v1686_v12 = vmax.f32 %v1684_v6, %v1685_v9 }
0x147c   : > { %vm1687_vm6 = vcmp.ge.f32.partialorder %v1679_v1, %v1686_v12  ;;  %v1702_v13 = vsel %vm2992_vm5, %v1686_v12, %v1663_v58 }
0x147d   : > { %v1688_v14 = vsel %vm1687_vm6, %v2961_v55, 5  ;;  %v1710_v15 = vperm.slane %v1702_v13, 0 }
0x147e   : > { %v1689_v46 = vsel %vm1673_vm4, %v1688_v14, 2147483647 }
0x147f   : > { %v1690_v16 = vrot.slane %v1689_v46, 4  ;;  %v1711_v17 = vsel %vm2973_vm0, %v1710_v15, 0.0 }
0x1480   : > { %v1712_v18 = vsel %vm1673_vm4, %v1711_v17, 0.0 }
0x1481   : > { %vm1691_vm7 = vcmp.lt.s32.totalorder %v1689_v46, %v1690_v16  ;;  %1713 = vadd.xlane.f32.xlu2 %v1712_v18 }
0x1482   : > { %v1692_v19 = vsel %vm1691_vm7, %v1689_v46, %v1690_v16 }
0x1483   : > { %v1693_v20 = vrot.slane %v1692_v19, 2 }
0x1485   : > { %vm1694_vm8 = vcmp.lt.s32.totalorder %v1692_v19, %v1693_v20 }
0x1486   : > { %v1695_v21 = vsel %vm1694_vm8, %v1692_v19, %v1693_v20  ;;  %v1790_v19 = vperm.slane %v2968_v23, 4 }
0x1487   : > { %v1696_v22 = vrot.slane %v1695_v21, 1 }
0x1489   : > { %vm1697_vm9 = vcmp.lt.s32.totalorder %v1695_v21, %v1696_v22 }
0x148a   : > { %v1698_v24 = vsel %vm1697_vm9, %v1695_v21, %v1696_v22 }
0x148b   : > { %v1703_v25 = vsel %vm2992_vm5, %v1698_v24, %v2963_v56 }
0x148c   : > { %1706 = vst.msk [vmem:[#allocation3 + $0x1] sm:$0x1] %vm1705_vm10, %v1703_v25 }
0x14f4   : > { %v1714_v26 = vpop.xlane.xlu2 %1713 }
0x14f5   : > { %v1715_v28 = vadd.f32 %v1714_v26, %v2987_v62 }
0x14f7   : > { %v1717_v29 = vadd.f32 %v1716_v27, %v1715_v28  ;;  %v1812_v28 = vstv %s1811_s2  ;;  %s1922_s2 = scalar_select %p1894_p3, 1, 0 }
0x14f8   : > { %vm3049_vm7 = vcmp.eq.s32.totalorder %v1812_v28, 1 }
0x14f9   : > { %v1718_v30 = vsel %vm1673_vm4, %v1717_v29, -inf }
0x14fa   : > { %v1719_v31 = vrot.slane %v1718_v30, 4 }
0x14fc   : > { %v1720_v33 = vmax.f32 %v1718_v30, %v1719_v31 }
0x14fe   : > { %v1721_v34 = vrot.slane %v1720_v33, 2 }
0x1500   : > { %v1722_v35 = vmax.f32 %v1720_v33, %v1721_v34 }
0x1502   : > { %v1723_v36 = vrot.slane %v1722_v35, 1 }
0x1504   : > { %v1724_v11 = vmax.f32 %v1722_v35, %v1723_v36 }
0x1506   : > { %vm1725_vm12 = vcmp.ge.f32.partialorder %v1717_v29, %v1724_v11  ;;  %v1740_v39 = vsel %vm3011_vm11, %v1724_v11, %v1702_v13 }
0x1507   : > { %v1726_v41 = vsel %vm1725_vm12, %v2961_v55, 5  ;;  %v1747_v42 = vperm.slane %v1740_v39, 0 }
0x1508   : > { %v1727_v43 = vsel %vm1673_vm4, %v1726_v41, 2147483647 }
0x1509   : > { %v1728_v44 = vrot.slane %v1727_v43, 4  ;;  %v1748_v45 = vsel %vm2973_vm0, %v1747_v42, 0.0 }
0x150a   : > { %v1749_v47 = vsel %vm1673_vm4, %v1748_v45, 0.0 }
0x150b   : > { %vm1729_vm13 = vcmp.lt.s32.totalorder %v1727_v43, %v1728_v44  ;;  %1750 = vadd.xlane.f32.xlu0 %v1749_v47 }
0x150c   : > { %v1730_v48 = vsel %vm1729_vm13, %v1727_v43, %v1728_v44 }
0x150d   : > { %v1731_v49 = vrot.slane %v1730_v48, 2 }
0x150f   : > { %vm1732_vm14 = vcmp.lt.s32.totalorder %v1730_v48, %v1731_v49 }
0x1510   : > { %v1733_v50 = vsel %vm1732_vm14, %v1730_v48, %v1731_v49  ;;  %v1827_v48 = vperm.slane %v2968_v23, 5 }
0x1511   : > { %v1734_v51 = vrot.slane %v1733_v50, 1 }
0x1513   : > { %vm1735_vm15 = vcmp.lt.s32.totalorder %v1733_v50, %v1734_v51 }
0x1514   : > { %v1736_v52 = vsel %vm1735_vm15, %v1733_v50, %v1734_v51 }
0x1515   : > { %v1741_v8 = vsel %vm3011_vm11, %v1736_v52, %v2963_v56 }
0x1516   : > { %1743 = vst.msk [vmem:[#allocation3 + $0x2] sm:$0x1] %vm1705_vm10, %v1741_v8 }
0x157e   : > { %v1751_v53 = vpop.xlane.xlu0 %1750 }
0x157f   : > { %v1752_v57 = vadd.f32 %v1751_v53, %v2987_v62 }
0x1581   : > { %v1754_v58 = vadd.f32 %v1753_v54, %v1752_v57  ;;  %v1849_v57 = vstv %s1848_s17  ;;  %s2383_s17 = scalar_lea.hbm %s3211_s16, 2 }
0x1582   : > { %vm3068_vm13 = vcmp.eq.s32.totalorder %v1849_v57, 1 }
0x1583   : > { %v1755_v60 = vsel %vm1673_vm4, %v1754_v58, -inf }
0x1584   : > { %v1756_v61 = vrot.slane %v1755_v60, 4 }
0x1586   : > { %v1757_v32 = vmax.f32 %v1755_v60, %v1756_v61 }
0x1588   : > { %v1758_v63 = vrot.slane %v1757_v32, 2 }
0x158a   : > { %v1759_v40 = vmax.f32 %v1757_v32, %v1758_v63 }
0x158c   : > { %v1760_v1 = vrot.slane %v1759_v40, 1 }
0x158e   : > { %v1761_v3 = vmax.f32 %v1759_v40, %v1760_v1 }
0x1590   : > { %vm1762_vm2 = vcmp.ge.f32.partialorder %v1754_v58, %v1761_v3  ;;  %v1777_v4 = vsel %vm3030_vm1, %v1761_v3, %v1740_v39 }
0x1591   : > { %v1763_v5 = vsel %vm1762_vm2, %v2961_v55, 5  ;;  %v1784_v6 = vperm.slane %v1777_v4, 0 }
0x1592   : > { %v1764_v7 = vsel %vm1673_vm4, %v1763_v5, 2147483647 }
0x1593   : > { %v1765_v9 = vrot.slane %v1764_v7, 4  ;;  %v1785_v10 = vsel %vm2973_vm0, %v1784_v6, 0.0 }
0x1594   : > { %v1786_v12 = vsel %vm1673_vm4, %v1785_v10, 0.0 }
0x1595   : > { %vm1766_vm3 = vcmp.lt.s32.totalorder %v1764_v7, %v1765_v9  ;;  %1787 = vadd.xlane.f32.xlu2 %v1786_v12 }
0x1596   : > { %v1767_v13 = vsel %vm1766_vm3, %v1764_v7, %v1765_v9 }
0x1597   : > { %v1768_v14 = vrot.slane %v1767_v13, 2 }
0x1599   : > { %vm1769_vm5 = vcmp.lt.s32.totalorder %v1767_v13, %v1768_v14 }
0x159a   : > { %v1770_v15 = vsel %vm1769_vm5, %v1767_v13, %v1768_v14  ;;  %v1864_v13 = vperm.slane %v2968_v23, 6 }
0x159b   : > { %v1771_v46 = vrot.slane %v1770_v15, 1 }
0x159d   : > { %vm1772_vm6 = vcmp.lt.s32.totalorder %v1770_v15, %v1771_v46 }
0x159e   : > { %v1773_v16 = vsel %vm1772_vm6, %v1770_v15, %v1771_v46 }
0x159f   : > { %v1778_v17 = vsel %vm3030_vm1, %v1773_v16, %v2963_v56 }
0x15a0   : > { %1780 = vst.msk [vmem:[#allocation3 + $0x3] sm:$0x1] %vm1705_vm10, %v1778_v17 }
0x1608   : > { %v1788_v18 = vpop.xlane.xlu2 %1787 }
0x1609   : > { %v1789_v20 = vadd.f32 %v1788_v18, %v2987_v62 }
0x160b   : > { %v1791_v21 = vadd.f32 %v1790_v19, %v1789_v20  ;;  %v1886_v20 = vstv %s1885_s4  ;;  %s504_s4 = scalar_lea.vmem [#allocation6], %s503_s22 }
0x160c   : > { %vm3087_vm3 = vcmp.eq.s32.totalorder %v1886_v20, 1  ;;  %s2101_s24 = sshll.u32 %s504_s4, 4  ;;  %s2102_s24 = int_to_ptr.vmem [resolvable:$true] %s2101_s24 }
0x160d   : > { %v1792_v22 = vsel %vm1673_vm4, %v1791_v21, -inf }
0x160e   : > { %v1793_v24 = vrot.slane %v1792_v22, 4 }
0x1610   : > { %v1794_v25 = vmax.f32 %v1792_v22, %v1793_v24 }
0x1612   : > { %v1795_v26 = vrot.slane %v1794_v25, 2 }
0x1614   : > { %v1796_v27 = vmax.f32 %v1794_v25, %v1795_v26 }
0x1616   : > { %v1797_v29 = vrot.slane %v1796_v27, 1 }
0x1618   : > { %v1798_v31 = vmax.f32 %v1796_v27, %v1797_v29 }
0x161a   : > { %vm1799_vm8 = vcmp.ge.f32.partialorder %v1791_v21, %v1798_v31  ;;  %v1814_v33 = vsel %vm3049_vm7, %v1798_v31, %v1777_v4 }
0x161b   : > { %v1800_v34 = vsel %vm1799_vm8, %v2961_v55, 5  ;;  %v1821_v35 = vperm.slane %v1814_v33, 0 }
0x161c   : > { %v1801_v37 = vsel %vm1673_vm4, %v1800_v34, 2147483647 }
0x161d   : > { %v1802_v36 = vrot.slane %v1801_v37, 4  ;;  %v1822_v38 = vsel %vm2973_vm0, %v1821_v35, 0.0 }
0x161e   : > { %v1823_v11 = vsel %vm1673_vm4, %v1822_v38, 0.0 }
0x161f   : > { %vm1803_vm9 = vcmp.lt.s32.totalorder %v1801_v37, %v1802_v36  ;;  %1824 = vadd.xlane.f32.xlu0 %v1823_v11  ;;  %v1901_v11 = vperm.slane %v2968_v23, 7  ;;  %v1929_v23 = vld [vmem:[%s3210_s15] sm:$0x1] }
0x1620   : > { %v1804_v39 = vsel %vm1803_vm9, %v1801_v37, %v1802_v36 }
0x1621   : > { %v1805_v41 = vrot.slane %v1804_v39, 2 }
0x1623   : > { %vm1806_vm11 = vcmp.lt.s32.totalorder %v1804_v39, %v1805_v41 }
0x1624   : > { %v1807_v42 = vsel %vm1806_vm11, %v1804_v39, %v1805_v41 }
0x1625   : > { %v1808_v43 = vrot.slane %v1807_v42, 1 }
0x1627   : > { %vm1809_vm12 = vcmp.lt.s32.totalorder %v1807_v42, %v1808_v43 }
0x1628   : > { %v1810_v44 = vsel %vm1809_vm12, %v1807_v42, %v1808_v43 }
0x1629   : > { %v1815_v45 = vsel %vm3049_vm7, %v1810_v44, %v2963_v56 }
0x162a   : > { %1817 = vst.msk [vmem:[#allocation3 + $0x4] sm:$0x1] %vm1705_vm10, %v1815_v45 }
0x1692   : > { %v1825_v47 = vpop.xlane.xlu0 %1824 }
0x1693   : > { %v1826_v49 = vadd.f32 %v1825_v47, %v2987_v62 }
0x1695   : > { %v1828_v50 = vadd.f32 %v1827_v48, %v1826_v49  ;;  %v1923_v48 = vstv %s1922_s2 }
0x1697   : > { %v1829_v51 = vsel %vm1673_vm4, %v1828_v50, -inf }
0x1698   : > { %v1830_v52 = vrot.slane %v1829_v51, 4 }
0x169a   : > { %v1831_v8 = vmax.f32 %v1829_v51, %v1830_v52 }
0x169c   : > { %v1832_v53 = vrot.slane %v1831_v8, 2 }
0x169e   : > { %v1833_v54 = vmax.f32 %v1831_v8, %v1832_v53 }
0x16a0   : > { %v1834_v58 = vrot.slane %v1833_v54, 1 }
0x16a2   : > { %v1835_v61 = vmax.f32 %v1833_v54, %v1834_v58 }
0x16a4   : > { %vm1836_vm14 = vcmp.ge.f32.partialorder %v1828_v50, %v1835_v61  ;;  %v1851_v32 = vsel %vm3068_vm13, %v1835_v61, %v1814_v33 }
0x16a5   : > { %v1837_v63 = vsel %vm1836_vm14, %v2961_v55, 5  ;;  %v1858_v40 = vperm.slane %v1851_v32, 0 }
0x16a6   : > { %v1838_v0 = vsel %vm1673_vm4, %v1837_v63, 2147483647 }
0x16a7   : > { %v1839_v1 = vrot.slane %v1838_v0, 4  ;;  %v1859_v2 = vsel %vm2973_vm0, %v1858_v40, 0.0 }
0x16a8   : > { %v1860_v3 = vsel %vm1673_vm4, %v1859_v2, 0.0 }
0x16a9   : > { %vm1840_vm15 = vcmp.lt.s32.totalorder %v1838_v0, %v1839_v1  ;;  %1861 = vadd.xlane.f32.xlu1 %v1860_v3 }
0x16aa   : > { %v1841_v4 = vsel %vm1840_vm15, %v1838_v0, %v1839_v1 }
0x16ab   : > { %v1842_v5 = vrot.slane %v1841_v4, 2 }
0x16ad   : > { %vm1843_vm1 = vcmp.lt.s32.totalorder %v1841_v4, %v1842_v5 }
0x16ae   : > { %v1844_v6 = vsel %vm1843_vm1, %v1841_v4, %v1842_v5 }
0x16af   : > { %v1845_v7 = vrot.slane %v1844_v6, 1 }
0x16b1   : > { %vm1846_vm2 = vcmp.lt.s32.totalorder %v1844_v6, %v1845_v7 }
0x16b2   : > { %v1847_v9 = vsel %vm1846_vm2, %v1844_v6, %v1845_v7 }
0x16b3   : > { %v1852_v10 = vsel %vm3068_vm13, %v1847_v9, %v2963_v56 }
0x16b4   : > { %1854 = vst.msk [vmem:[#allocation3 + $0x5] sm:$0x1] %vm1705_vm10, %v1852_v10 }
0x171c   : > { %v1862_v12 = vpop.xlane.xlu1 %1861 }
0x171d   : > { %v1863_v14 = vadd.f32 %v1862_v12, %v2987_v62 }
0x171f   : > { %v1865_v15 = vadd.f32 %v1864_v13, %v1863_v14 }
0x1721   : > { %v1866_v46 = vsel %vm1673_vm4, %v1865_v15, -inf }
0x1722   : > { %v1867_v16 = vrot.slane %v1866_v46, 4 }
0x1724   : > { %v1868_v17 = vmax.f32 %v1866_v46, %v1867_v16 }
0x1726   : > { %v1869_v18 = vrot.slane %v1868_v17, 2 }
0x1728   : > { %v1870_v19 = vmax.f32 %v1868_v17, %v1869_v18 }
0x172a   : > { %v1871_v21 = vrot.slane %v1870_v19, 1 }
0x172c   : > { %v1872_v24 = vmax.f32 %v1870_v19, %v1871_v21 }
0x172e   : > { %vm1873_vm5 = vcmp.ge.f32.partialorder %v1865_v15, %v1872_v24  ;;  %v1888_v25 = vsel %vm3087_vm3, %v1872_v24, %v1851_v32 }
0x172f   : > { %v1874_v26 = vsel %vm1873_vm5, %v2961_v55, 5  ;;  %v1895_v27 = vperm.slane %v1888_v25, 0 }
0x1730   : > { %v1875_v28 = vsel %vm1673_vm4, %v1874_v26, 2147483647 }
0x1731   : > { %v1876_v29 = vrot.slane %v1875_v28, 4  ;;  %v1896_v30 = vsel %vm2973_vm0, %v1895_v27, 0.0  ;;  %vm3106_vm0 = vcmp.eq.s32.totalorder %v1923_v48, 1 }
0x1732   : > { %v1897_v31 = vsel %vm1673_vm4, %v1896_v30, 0.0 }
0x1733   : > { %vm1877_vm6 = vcmp.lt.s32.totalorder %v1875_v28, %v1876_v29  ;;  %1898 = vadd.xlane.f32.xlu2 %v1897_v31 }
0x1734   : > { %v1878_v33 = vsel %vm1877_vm6, %v1875_v28, %v1876_v29 }
0x1735   : > { %v1879_v34 = vrot.slane %v1878_v33, 2 }
0x1737   : > { %vm1880_vm7 = vcmp.lt.s32.totalorder %v1878_v33, %v1879_v34 }
0x1738   : > { %v1881_v35 = vsel %vm1880_vm7, %v1878_v33, %v1879_v34 }
0x1739   : > { %v1882_v37 = vrot.slane %v1881_v35, 1 }
0x173b   : > { %vm1883_vm8 = vcmp.lt.s32.totalorder %v1881_v35, %v1882_v37 }
0x173c   : > { %v1884_v36 = vsel %vm1883_vm8, %v1881_v35, %v1882_v37  ;;  %vm2065_vm8 = vcmp.eq.s32.totalorder %v2963_v56, 1 }
0x173d   : > { %v1889_v38 = vsel %vm3087_vm3, %v1884_v36, %v2963_v56 }
0x173e   : > { %1891 = vst.msk [vmem:[#allocation3 + $0x6] sm:$0x1] %vm1705_vm10, %v1889_v38 }
0x1745   : > { %v1968_v28 = vld [vmem:[#allocation3 + $0x6] sm:$0x1] }
0x17a6   : > { %v1899_v59 = vpop.xlane.xlu2 %1898 }
0x17a7   : > { %v1900_v39 = vadd.f32 %v1899_v59, %v2987_v62 }
0x17a9   : > { %v1902_v41 = vadd.f32 %v1901_v11, %v1900_v39 }
0x17ab   : > { %v1903_v42 = vsel %vm1673_vm4, %v1902_v41, -inf }
0x17ac   : > { %v1904_v43 = vrot.slane %v1903_v42, 4 }
0x17ae   : > { %v1905_v44 = vmax.f32 %v1903_v42, %v1904_v43 }
0x17b0   : > { %v1906_v45 = vrot.slane %v1905_v44, 2 }
0x17b2   : > { %v1907_v47 = vmax.f32 %v1905_v44, %v1906_v45 }
0x17b4   : > { %v1908_v49 = vrot.slane %v1907_v47, 1 }
0x17b6   : > { %v1909_v51 = vmax.f32 %v1907_v47, %v1908_v49 }
0x17b8   : > { %vm1910_vm9 = vcmp.ge.f32.partialorder %v1902_v41, %v1909_v51  ;;  %v1925_v62 = vsel %vm3106_vm0, %v1909_v51, %v1888_v25  ;;  %v1984_v41 = vld [vmem:[#allocation3 + $0x5] sm:$0x1] }
0x17b9   : > { %v1911_v52 = vsel %vm1910_vm9, %v2961_v55, 5  ;;  %v1930_v8 = vadd.f32 %v1929_v23, %v1925_v62  ;;  %vm2068_vm9 = vcmp.eq.s32.totalorder %v2963_v56, 2 }
0x17ba   : > { %v1912_v53 = vsel %vm1673_vm4, %v1911_v52, 2147483647 }
0x17bb   : > { %v1913_v54 = vrot.slane %v1912_v53, 4  ;;  %v1931_v57 = vsel %vm1705_vm10, %v1930_v8, -inf }
0x17bc   : > { %1932 = vmax.xlane.f32.xlu0 %v1931_v57 }
0x17bd   : > { %vm1914_vm11 = vcmp.lt.s32.totalorder %v1912_v53, %v1913_v54 }
0x17be   : > { %v1915_v58 = vsel %vm1914_vm11, %v1912_v53, %v1913_v54  ;;  %vm2074_vm11 = vcmp.eq.s32.totalorder %v2963_v56, 4 }
0x17bf   : > { %v1916_v60 = vrot.slane %v1915_v58, 2 }
0x17c1   : > { %vm1917_vm12 = vcmp.lt.s32.totalorder %v1915_v58, %v1916_v60 }
0x17c2   : > { %v1918_v61 = vsel %vm1917_vm12, %v1915_v58, %v1916_v60  ;;  %vm2077_vm12 = vcmp.eq.s32.totalorder %v2963_v56, 5 }
0x17c3   : > { %v1919_v32 = vrot.slane %v1918_v61, 1 }
0x17c5   : > { %vm1920_vm13 = vcmp.lt.s32.totalorder %v1918_v61, %v1919_v32 }
0x17c6   : > { %v1921_v63 = vsel %vm1920_vm13, %v1918_v61, %v1919_v32  ;;  %vm2080_vm13 = vcmp.eq.s32.totalorder %v2963_v56, 6 }
0x17c7   : > { %v1926_v40 = vsel %vm3106_vm0, %v1921_v63, %v2963_v56  ;;  %vm2063_vm0 = vcmp.eq.s32.totalorder %v2963_v56, 0 }
0x17c8   : > { %1928 = vst.msk [vmem:[#allocation3 + $0x7] sm:$0x1] %vm1705_vm10, %v1926_v40 }
0x17cf   : > { %v1952_v15 = vld [vmem:[#allocation3 + $0x7] sm:$0x1] }
0x182f   : > { %v1933_v55 = vpop.xlane.xlu0 %1932 }
0x1830   : > { %vm1934_vm4 = vcmp.ge.f32.partialorder %v1930_v8, %v1933_v55  ;;  %v2000_v8 = vld [vmem:[#allocation3 + $0x4] sm:$0x1] }
0x1831   : > { %v1935_v0 = vsel %vm1934_vm4, %v2963_v56, 5  ;;  %vm2083_vm4 = vcmp.eq.s32.totalorder %v2963_v56, 7 }
0x1832   : > { %v1936_v1 = vsel %vm1705_vm10, %v1935_v0, 2147483647 }
0x1833   : > { %v1938_v2 = vshra.s32 %v1936_v1, 16  ;;  %v1937_v4 = vand.u32 65535, %v1936_v1 }
0x1835   : > { %v1940_v3 = vcvt.s32.f32 %v1938_v2  ;;  %v1939_v6 = vcvt.s32.f32 %v1937_v4  ;;  %v2016_v2 = vld [vmem:[#allocation3 + $0x3] sm:$0x1] }
0x1837   : > { %1941 = vmin.xlane.f32.xlu1 %v1940_v3 }
0x18aa   : > { %v1942_v5 = vpop.xlane.xlu1 %1941 }
0x18ab   : > { %vm1943_vm14 = vcmp.eq.f32.partialorder %v1940_v3, %v1942_v5  ;;  %v1948_v9 = vcvt.f32.s32 %v1942_v5 }
0x18ac   : > { %v1944_v7 = vsel %vm1943_vm14, %v1939_v6, inf }
0x18ad   : > { %1945 = vmin.xlane.f32.xlu2 %v1944_v7  ;;  %v1949_v12 = vshll.u32 %v1948_v9, 16 }
0x1920   : > { %v1946_v10 = vpop.xlane.xlu2 %1945 }
0x1921   : > { %v1947_v13 = vcvt.f32.s32 %v1946_v10 }
0x1923   : > { %v3124_v14 = vadd.s32 %v1949_v12, %v1947_v13 }
0x1925   : > { %vm1951_vm15 = vcmp.eq.s32.totalorder %v2963_v56, %v3124_v14 }
0x1926   : > { %v1953_v46 = vsel %vm1951_vm15, %v1952_v15, 0  ;;  %vm2088_vm15 = vcmask 57344  }
0x1927   : > { %v1954_v16 = vsel %vm1705_vm10, %v1953_v46, 0 }
0x1928   : > { %v1956_v17 = vshrl.u32 %v1954_v16, 16  ;;  %v1955_v18 = vand.u32 65535, %v1954_v16 }
0x192a   : > { %v1958_v19 = vcvt.s32.f32 %v1956_v17  ;;  %v1957_v20 = vcvt.s32.f32 %v1955_v18  ;;  %v2032_v17 = vld [vmem:[#allocation3 + $0x2] sm:$0x1] }
0x192c   : > { %1961 = vadd.xlane.f32.xlu0 %v1958_v19  ;;  %1959 = vadd.xlane.f32.xlu1 %v1957_v20 }
0x199f   : > { %v1962_v21 = vpop.xlane.xlu0 %1961  ;;  %v1960_v22 = vpop.xlane.xlu1 %1959 }
0x19a0   : > { %v1964_v24 = vcvt.f32.s32 %v1962_v21  ;;  %v1963_v26 = vcvt.f32.s32 %v1960_v22 }
0x19a2   : > { %v1965_v25 = vshll.u32 %v1964_v24, 16 }
0x19a4   : > { %v3129_v27 = vadd.s32 %v1965_v25, %v1963_v26 }
0x19a6   : > { %vm1967_vm1 = vcmp.eq.s32.totalorder %v2963_v56, %v3129_v27 }
0x19a7   : > { %v1969_v29 = vsel %vm1967_vm1, %v1968_v28, 0 }
0x19a8   : > { %v1970_v30 = vsel %vm1705_vm10, %v1969_v29, 0 }
0x19a9   : > { %v1972_v31 = vshrl.u32 %v1970_v30, 16  ;;  %v1971_v33 = vand.u32 65535, %v1970_v30 }
0x19ab   : > { %v1974_v34 = vcvt.s32.f32 %v1972_v31  ;;  %v1973_v35 = vcvt.s32.f32 %v1971_v33  ;;  %v2048_v33 = vld [vmem:[#allocation3 + $0x1] sm:$0x1] }
0x19ad   : > { %1977 = vadd.xlane.f32.xlu2 %v1974_v34  ;;  %1975 = vadd.xlane.f32.xlu0 %v1973_v35 }
0x1a20   : > { %v1978_v37 = vpop.xlane.xlu2 %1977  ;;  %v1976_v36 = vpop.xlane.xlu0 %1975 }
0x1a21   : > { %v1980_v38 = vcvt.f32.s32 %v1978_v37  ;;  %v1979_v11 = vcvt.f32.s32 %v1976_v36 }
0x1a23   : > { %v1981_v59 = vshll.u32 %v1980_v38, 16 }
0x1a25   : > { %v3134_v39 = vadd.s32 %v1981_v59, %v1979_v11 }
0x1a27   : > { %vm1983_vm2 = vcmp.eq.s32.totalorder %v2963_v56, %v3134_v39 }
0x1a28   : > { %v1985_v42 = vsel %vm1983_vm2, %v1984_v41, 0 }
0x1a29   : > { %v1986_v43 = vsel %vm1705_vm10, %v1985_v42, 0 }
0x1a2a   : > { %v1988_v44 = vshrl.u32 %v1986_v43, 16  ;;  %v1987_v45 = vand.u32 65535, %v1986_v43 }
0x1a2c   : > { %v1990_v47 = vcvt.s32.f32 %v1988_v44  ;;  %v1989_v48 = vcvt.s32.f32 %v1987_v45 }
0x1a2e   : > { %1993 = vadd.xlane.f32.xlu1 %v1990_v47  ;;  %1991 = vadd.xlane.f32.xlu2 %v1989_v48 }
0x1aa1   : > { %v1994_v49 = vpop.xlane.xlu1 %1993  ;;  %v1992_v50 = vpop.xlane.xlu2 %1991 }
0x1aa2   : > { %v1996_v51 = vcvt.f32.s32 %v1994_v49  ;;  %v1995_v62 = vcvt.f32.s32 %v1992_v50 }
0x1aa4   : > { %v1997_v23 = vshll.u32 %v1996_v51, 16 }
0x1aa6   : > { %v3139_v52 = vadd.s32 %v1997_v23, %v1995_v62 }
0x1aa8   : > { %vm1999_vm3 = vcmp.eq.s32.totalorder %v2963_v56, %v3139_v52 }
0x1aa9   : > { %v2001_v53 = vsel %vm1999_vm3, %v2000_v8, 0  ;;  %v2075_v8 = vsel %vm2074_vm11, %v3139_v52, 0  ;;  %v2084_v52 = vsel %vm2083_vm4, %v3124_v14, 0 }
0x1aaa   : > { %v2002_v54 = vsel %vm1705_vm10, %v2001_v53, 0 }
0x1aab   : > { %v2004_v57 = vshrl.u32 %v2002_v54, 16  ;;  %v2003_v58 = vand.u32 65535, %v2002_v54  ;;  %v2078_v54 = vsel %vm2077_vm12, %v3134_v39, 0 }
0x1aad   : > { %v2006_v60 = vcvt.s32.f32 %v2004_v57  ;;  %v2005_v61 = vcvt.s32.f32 %v2003_v58  ;;  %v512_v57 = vld [vmem:[%s2634_s18] sm:$0x1]  ;;  %s2377_s18 = sshra.s32 %s2104_s0, 4  ;;  %s2378_s18 = int_to_ptr.hbm [resolvable:$true] %s2377_s18 }
0x1aae   : > { %vm2086_vm14 = vcmp.gt.f32.partialorder %v512_v57, -5e+08  ;;  %s2379_s2 = scalar_lea.hbm %s2378_s18, 1  ;;  %p2384_p9 = scmp.lt.s32.totalorder %s2378_s18, %s3211_s16 }
0x1aaf   : > { %2009 = vadd.xlane.f32.xlu0 %v2006_v60  ;;  %2007 = vadd.xlane.f32.xlu1 %v2005_v61  ;;  %v2081_v60 = vsel %vm2080_vm13, %v3129_v27, 0  ;;  %p2380_p4 = scmp.ne.s32.totalorder %s2378_s18, %s2379_s2  ;;  %p2385_p10 = scmp.lt.s32.totalorder %s2383_s17, %s2379_s2 }
0x1ab1   : > { %p2381_p7 = pnand %p2380_p4, %p2568_p5  ;;  %p2386_p11 = por %p2385_p10, %p2384_p9 }
0x1ab3   : > { %p2382_p8 = pneg %p2381_p7 }
0x1ab5   : > { %p2387_p12 = pnand %p2386_p11, %p2382_p8 }
0x1b22   : > { %v2010_v32 = vpop.xlane.xlu0 %2009  ;;  %v2008_v63 = vpop.xlane.xlu1 %2007 }
0x1b23   : > { %v2012_v40 = vcvt.f32.s32 %v2010_v32  ;;  %v2011_v0 = vcvt.f32.s32 %v2008_v63 }
0x1b25   : > { %v2013_v55 = vshll.u32 %v2012_v40, 16 }
0x1b27   : > { %v2014_v1 = vadd.s32 %v2013_v55, %v2011_v0 }
0x1b29   : > { %vm2015_vm5 = vcmp.eq.s32.totalorder %v2963_v56, %v2014_v1 }
0x1b2a   : > { %v2017_v3 = vsel %vm2015_vm5, %v2016_v2, 0 }
0x1b2b   : > { %v2018_v4 = vsel %vm1705_vm10, %v2017_v3, 0 }
0x1b2c   : > { %v2020_v5 = vshrl.u32 %v2018_v4, 16  ;;  %v2019_v6 = vand.u32 65535, %v2018_v4 }
0x1b2e   : > { %v2022_v7 = vcvt.s32.f32 %v2020_v5  ;;  %v2021_v9 = vcvt.s32.f32 %v2019_v6 }
0x1b30   : > { %2025 = vadd.xlane.f32.xlu2 %v2022_v7  ;;  %2023 = vadd.xlane.f32.xlu0 %v2021_v9 }
0x1ba3   : > { %v2026_v10 = vpop.xlane.xlu2 %2025  ;;  %v2024_v12 = vpop.xlane.xlu0 %2023 }
0x1ba4   : > { %v2028_v13 = vcvt.f32.s32 %v2026_v10  ;;  %v2027_v46 = vcvt.f32.s32 %v2024_v12 }
0x1ba6   : > { %v2029_v15 = vshll.u32 %v2028_v13, 16 }
0x1ba8   : > { %v2030_v16 = vadd.s32 %v2029_v15, %v2027_v46 }
0x1baa   : > { %vm2031_vm6 = vcmp.eq.s32.totalorder %v2963_v56, %v2030_v16  ;;  %v2069_v50 = vsel %vm2068_vm9, %v2030_v16, 0 }
0x1bab   : > { %v2033_v18 = vsel %vm2031_vm6, %v2032_v17, 0 }
0x1bac   : > { %v2034_v19 = vsel %vm1705_vm10, %v2033_v18, 0 }
0x1bad   : > { %v2036_v20 = vshrl.u32 %v2034_v19, 16  ;;  %v2035_v21 = vand.u32 65535, %v2034_v19 }
0x1baf   : > { %v2038_v22 = vcvt.s32.f32 %v2036_v20  ;;  %v2037_v24 = vcvt.s32.f32 %v2035_v21 }
0x1bb1   : > { %2041 = vadd.xlane.f32.xlu1 %v2038_v22  ;;  %2039 = vadd.xlane.f32.xlu2 %v2037_v24 }
0x1c24   : > { %v2042_v25 = vpop.xlane.xlu1 %2041  ;;  %v2040_v26 = vpop.xlane.xlu2 %2039 }
0x1c25   : > { %v2044_v28 = vcvt.f32.s32 %v2042_v25  ;;  %v2043_v30 = vcvt.f32.s32 %v2040_v26 }
0x1c27   : > { %v2045_v29 = vshll.u32 %v2044_v28, 16 }
0x1c29   : > { %v2046_v31 = vadd.s32 %v2045_v29, %v2043_v30 }
0x1c2b   : > { %vm2047_vm7 = vcmp.eq.s32.totalorder %v2963_v56, %v2046_v31  ;;  %v2066_v47 = vsel %vm2065_vm8, %v2046_v31, 0 }
0x1c2c   : > { %v2049_v34 = vsel %vm2047_vm7, %v2048_v33, 0 }
0x1c2d   : > { %v2050_v35 = vsel %vm1705_vm10, %v2049_v34, 0  ;;  %vm2071_vm10 = vcmp.eq.s32.totalorder %v2963_v56, 3 }
0x1c2e   : > { %v2052_v37 = vshrl.u32 %v2050_v35, 16  ;;  %v2051_v36 = vand.u32 65535, %v2050_v35  ;;  %v2072_v23 = vsel %vm2071_vm10, %v2014_v1, 0 }
0x1c30   : > { %v2054_v38 = vcvt.s32.f32 %v2052_v37  ;;  %v2053_v59 = vcvt.s32.f32 %v2051_v36 }
0x1c32   : > { %2057 = vadd.xlane.f32.xlu0 %v2054_v38  ;;  %2055 = vadd.xlane.f32.xlu1 %v2053_v59 }
0x1ca5   : > { %v2058_v11 = vpop.xlane.xlu0 %2057  ;;  %v2056_v41 = vpop.xlane.xlu1 %2055 }
0x1ca6   : > { %v2060_v42 = vcvt.f32.s32 %v2058_v11  ;;  %v2059_v44 = vcvt.f32.s32 %v2056_v41 }
0x1ca8   : > { %v2061_v43 = vshll.u32 %v2060_v42, 16 }
0x1caa   : > { %v2062_v45 = vadd.s32 %v2061_v43, %v2059_v44 }
0x1cac   : > { %v2064_v48 = vsel %vm2063_vm0, %v2062_v45, 0 }
0x1cad   : > { %v2067_v49 = vadd.s32 %v2066_v47, %v2064_v48 }
0x1caf   : > { %v2070_v51 = vadd.s32 %v2069_v50, %v2067_v49 }
0x1cb1   : > { %v2073_v62 = vadd.s32 %v2072_v23, %v2070_v51 }
0x1cb3   : > { %v2076_v53 = vadd.s32 %v2075_v8, %v2073_v62 }
0x1cb5   : > { %v2079_v58 = vadd.s32 %v2078_v54, %v2076_v53 }
0x1cb7   : > { %v2082_v61 = vadd.s32 %v2081_v60, %v2079_v58 }
0x1cb9   : > { %v2085_v32 = vadd.s32 %v2084_v52, %v2082_v61 }
0x1cbb   : > { %v2087_v39 = vsel %vm2086_vm14, %v2085_v32, 4294967295 }
0x1cbc   : > { %2089 = vst.msk [vmem:[%s504_s4] sm:$0x1] %vm2088_vm15, %v2087_v39 }
0x1cbd   : > { %2390 = shalt.err (!%p2387_p12)
}
0x1cbe   : > { %2243 = dma.vmem_to_hbm [thread:$0]  (%p2568_p5), %s2102_s24, 16, %s2104_s0, %s2091_s8  }
0x1cbf PF: > { %p2249_p13 = scmp.ge.s32.totalorder %s2427_s28, 2  ;;  %s2115_s22 = sand.u32 1, %s2415_s25  }
0x1cc0   : > { %s2116_s4 = scalar_lea.sflag [#allocation7], %s2115_s22 }
0x1cc1   : > { %p2246_p0 = pnand %p2249_p13, %p2572_p6 }
0x1cc3   : > { %p2247_p1 = pneg %p2246_p0 }
0x1cc5   : > { %2410 = dma.done.wait (%p2247_p1), %s2116_s4, 16  }
0x1cc6   : > { %2412 = vsyncadd (%p2247_p1), %s2116_s4, 4294967280  ;;  %s3266_s18 = sld [smem:[#allocation10_spill]]  ;;  %p34_p2 = scmp.ge.s32.totalorder %s2555_s30, 4  }
0x1cc7   : > { %s3267_s25 = smov %s2419_s26  ;;  %s3268_s26 = smov %s2423_s27 }
0x1cc8   : > { %s3270_s28 = smov %s2555_s30  ;;  %36 = sbr.rel (!%p34_p2) target bundleno = 21 (0x15), region = 132 }
0x1ccc   : > { %s3269_s27 = smov %s3266_s18 }
0x1ccd   :  { %2121 = vsyncpa [#allocation7], 1 }
0x1cce   :  { %2123 = vsyncpa [#allocation7 + $0x1], 1 }

</bundles_post_ra>
